<compile_context>
chip_gen: v7x
topology: tpu7x:2x2x1
jax: 0.10.0
libtpu: 0.0.40
codegen_flags: <defaults>
</compile_context>

<pallas_src>
import functools

import jax
import jax.numpy as jnp
from jax.experimental import pallas as pl
from jax.experimental.pallas import tpu as pltpu


def _convlstm_kernel(p_ref, c_ref, w_ref, b_ref, out_ref, *, hid):
    """One M-tile per grid step.

    p_ref  : (TM, KCp)     im2col patches, contraction zero-padded to KCp
    c_ref  : (TM, hid)     previous cell state (rows aligned with p_ref rows)
    w_ref  : (KCp, 4*hid)  flattened conv weight, rows zero-padded; cell-gate
                           columns pre-scaled by 2 (tanh-via-sigmoid rewrite)
    b_ref  : (1, 4*hid)    conv bias, cell-gate part pre-scaled by 2
    out_ref: (TM, OUT_W)   lane-dense output slab (OUT_W multiple of 128):
                           lanes [0,hid)=hidden, [hid,2*hid)=cell, rest zero
    """
    # Single deep MXU matmul: (TM, KCp) @ (KCp, 4*hid) -> (TM, 4*hid).
    gates = jnp.dot(p_ref[...], w_ref[...], preferred_element_type=jnp.float32)
    gates = gates + b_ref[...]                      # (TM, 4*hid), lane-dense

    # One full-tile sigmoid on the EUP.  Cell-gate tanh recovered via
    # tanh(x) = 2*sigmoid(2x) - 1 (the 2x is folded into weights/bias).
    sig = jax.nn.sigmoid(gates)

    # Same chunk order as torch.chunk(gates, 4, dim=1):
    in_gate = sig[:, 0 * hid:1 * hid]
    rem_gate = sig[:, 1 * hid:2 * hid]
    out_gate = sig[:, 2 * hid:3 * hid]
    cell_gate = 2.0 * sig[:, 3 * hid:4 * hid] - 1.0   # == tanh(original gate)

    cell = rem_gate * c_ref[...] + in_gate * cell_gate
    hidden = out_gate * jnp.tanh(cell)

    # Assemble a lane-dense 128-multiple-wide tile -> unmasked full-vreg store.
    out_w = out_ref.shape[-1]
    parts = [hidden, cell]
    pad_w = out_w - 2 * hid
    if pad_w:
        parts.append(jnp.zeros((hidden.shape[0], pad_w), hidden.dtype))
    out_ref[...] = jnp.concatenate(parts, axis=-1).astype(out_ref.dtype)


def _is_dual_tensorcore_chip():
    """Best-effort detection of dual-TensorCore chips (v7x). Falls back to False."""
    try:
        kind = jax.devices()[0].device_kind.lower()
    except Exception:
        return False
    return ("v7" in kind) or ("7x" in kind)


def _pick_num_m_tiles(M, kc_pad, itemsize, dual_tc):
    """Generation-aware grid sizing.

    Dual-TC (v7x): >=4 tiles so each core runs >=2 grid steps and the patch
    DMA can double-buffer.  Single-TC (v5e/v6e): one big tile unless the patch
    block would exceed ~4 MiB of VMEM (per-step overhead ~0.35 us otherwise
    dominates at these sizes).
    """
    n = 4 if dual_tc else 1
    max_tile_bytes = 4 << 20
    while n < max(M // 8, 1) and (M // n) * kc_pad * itemsize > max_tile_bytes:
        n *= 2
    # Back off until tiles divide M evenly and stay sublane (8) aligned.
    while n > 1 and not (M % n == 0 and (M // n) % 8 == 0):
        n //= 2
    return max(n, 1)


def delta_conv_lstm(x_nhwc, prev_state, weight_hwio, bias, *, hidden_size,
                    kernel_size, operand_dtype=None):
    """ConvLSTM cell step (matches DeltaConvLSTM.forward).

    x_nhwc      : (B, H, W, Cin)  float32
    prev_state  : None or (prev_hidden, prev_cell), each (B, H, W, hid)
    weight_hwio : (K, K, Cin + hid, 4*hid)
    bias        : (4*hid,)
    operand_dtype : optional (e.g. jnp.bfloat16) cast of the matmul operands;
                    default None keeps f32 and the 1e-5 tolerance.
    returns (hidden, cell), each (B, H, W, hid)
    """
    B, H, W, Cin = x_nhwc.shape
    K = kernel_size
    pad = K // 2
    hid = hidden_size
    cin_t = Cin + hid

    if prev_state is None:
        prev_h = jnp.zeros((B, H, W, hid), x_nhwc.dtype)
        prev_c = jnp.zeros((B, H, W, hid), x_nhwc.dtype)
    else:
        prev_h, prev_c = prev_state

    # --- im2col + lane-alignment padding in plain JAX (fuses in XLA at this
    # size).  The zero columns are appended inside the same concat so the
    # (M, kc_pad) patch slab is materialised in HBM exactly once.
    stacked = jnp.concatenate([x_nhwc, prev_h], axis=-1)            # (B,H,W,cin_t)
    stacked_pad = jnp.pad(stacked, ((0, 0), (pad, pad), (pad, pad), (0, 0)))

    kc = K * K * cin_t
    kc_pad = ((kc + 127) // 128) * 128        # contraction padded to 128-lane mult
    M = B * H * W

    cols = []
    for dy in range(K):
        for dx in range(K):
            cols.append(stacked_pad[:, dy:dy + H, dx:dx + W, :])
    if kc_pad > kc:
        cols.append(jnp.zeros((B, H, W, kc_pad - kc), stacked.dtype))
    # Tap-major (dy, dx, c) ordering matches weight_hwio.reshape(kc, 4*hid).
    patches = jnp.concatenate(cols, axis=-1).reshape(M, kc_pad)

    # Flatten weight; fold the factor 2 of tanh(x)=2*sigmoid(2x)-1 into the
    # cell-gate columns of the weight and bias (free, wrapper side).
    w_flat = weight_hwio.reshape(kc, 4 * hid)
    gate_scale = jnp.concatenate(
        [jnp.ones((3 * hid,), w_flat.dtype), jnp.full((hid,), 2.0, w_flat.dtype)])
    w_flat = w_flat * gate_scale
    bias2 = (bias * gate_scale).reshape(1, 4 * hid).astype(jnp.float32)
    w_flat = jnp.pad(w_flat, ((0, kc_pad - kc), (0, 0)))

    if operand_dtype is not None:
        patches = patches.astype(operand_dtype)
        w_flat = w_flat.astype(operand_dtype)

    prev_c_flat = prev_c.reshape(M, hid)

    dual_tc = _is_dual_tensorcore_chip()
    num_m_tiles = _pick_num_m_tiles(M, kc_pad, patches.dtype.itemsize, dual_tc)
    TM = M // num_m_tiles

    # Lane-dense output slab width (multiple of 128 lanes).
    out_w = max(((2 * hid + 127) // 128) * 128, 128)

    kernel = functools.partial(_convlstm_kernel, hid=hid)

    hc = pl.pallas_call(
        kernel,
        out_shape=jax.ShapeDtypeStruct((M, out_w), x_nhwc.dtype),
        grid_spec=pltpu.PrefetchScalarGridSpec(
            num_scalar_prefetch=0,
            grid=(num_m_tiles,),
            in_specs=[
                pl.BlockSpec((TM, kc_pad), lambda i: (i, 0)),
                pl.BlockSpec((TM, hid), lambda i: (i, 0)),
                pl.BlockSpec((kc_pad, 4 * hid), lambda i: (0, 0)),  # resident weight
                pl.BlockSpec((1, 4 * hid), lambda i: (0, 0)),       # resident bias
            ],
            out_specs=pl.BlockSpec((TM, out_w), lambda i: (i, 0)),
        ),
        compiler_params=pltpu.CompilerParams(
            dimension_semantics=("parallel",),
            vmem_limit_bytes=32 << 20,   # footprint today ~1.5 MiB; headroom on v7x
        ),
    )(patches, prev_c_flat, w_flat, bias2)

    hidden = hc[:, :hid].reshape(B, H, W, hid)
    cell = hc[:, hid:2 * hid].reshape(B, H, W, hid)
    return hidden, cell


def _reference_step(x_nhwc, prev_state, weight_hwio, bias, *, hidden_size,
                    kernel_size):
    """Pure-JAX reference (lax conv) for correctness check."""
    B, H, W, Cin = x_nhwc.shape
    hid = hidden_size
    pad = kernel_size // 2
    if prev_state is None:
        prev_h = jnp.zeros((B, H, W, hid), x_nhwc.dtype)
        prev_c = jnp.zeros((B, H, W, hid), x_nhwc.dtype)
    else:
        prev_h, prev_c = prev_state
    stacked = jnp.concatenate([x_nhwc, prev_h], axis=-1)
    gates = jax.lax.conv_general_dilated(
        stacked, weight_hwio, window_strides=(1, 1),
        padding=((pad, pad), (pad, pad)),
        dimension_numbers=("NHWC", "HWIO", "NHWC")) + bias
    i_g, r_g, o_g, g_g = jnp.split(gates, 4, axis=-1)
    i_g, r_g, o_g = jax.nn.sigmoid(i_g), jax.nn.sigmoid(r_g), jax.nn.sigmoid(o_g)
    g_g = jnp.tanh(g_g)
    cell = r_g * prev_c + i_g * g_g
    hidden = o_g * jnp.tanh(cell)
    return hidden, cell


if __name__ == "__main__":
    # Small shapes consistent with the module's forward.
    B, Cin, H, W = 2, 4, 16, 16
    hidden_size = 32
    kernel_size = 3
    cin_t = Cin + hidden_size

    key = jax.random.PRNGKey(0)
    k_x, k_w, k_b = jax.random.split(key, 3)

    # PyTorch-style input is NCHW (2, 4, 16, 16); kernel uses NHWC.
    x_nchw = jax.random.normal(k_x, (B, Cin, H, W), jnp.float32)
    x_nhwc = jnp.transpose(x_nchw, (0, 2, 3, 1))

    # Deterministic Conv2d parameters, generated directly in HWIO layout
    # (torch would be (4*hid, cin_t, K, K)).
    w_scale = 1.0 / jnp.sqrt(float(cin_t * kernel_size * kernel_size))
    weight_hwio = w_scale * jax.random.normal(
        k_w, (kernel_size, kernel_size, cin_t, 4 * hidden_size), jnp.float32)
    bias = w_scale * jax.random.normal(k_b, (4 * hidden_size,), jnp.float32)

    # Step 1: prev_state=None (zeros path of the module).
    h1, c1 = delta_conv_lstm(x_nhwc, None, weight_hwio, bias,
                             hidden_size=hidden_size, kernel_size=kernel_size)
    # Step 2: feed the previous state back in (non-None path).
    h2, c2 = delta_conv_lstm(x_nhwc, (h1, c1), weight_hwio, bias,
                             hidden_size=hidden_size, kernel_size=kernel_size)
    jax.block_until_ready((h2, c2))

    # Correctness check against a pure-JAX reference.
    rh1, rc1 = _reference_step(x_nhwc, None, weight_hwio, bias,
                               hidden_size=hidden_size, kernel_size=kernel_size)
    rh2, rc2 = _reference_step(x_nhwc, (rh1, rc1), weight_hwio, bias,
                               hidden_size=hidden_size, kernel_size=kernel_size)
    assert jnp.allclose(h1, rh1, atol=1e-5, rtol=1e-5)
    assert jnp.allclose(c1, rc1, atol=1e-5, rtol=1e-5)
    assert jnp.allclose(h2, rh2, atol=1e-5, rtol=1e-5)
    assert jnp.allclose(c2, rc2, atol=1e-5, rtol=1e-5)

    print("KERNEL_OK")
</pallas_src>

<mosaic_0001>
module attributes {stable_mosaic.version = 11 : i64} {
  func.func @_convlstm_kernel(%arg0: i32, %arg1: memref<512x384xf32, #tpu.memory_space<vmem>>, %arg2: memref<512x32xf32, #tpu.memory_space<vmem>>, %arg3: memref<384x128xf32, #tpu.memory_space<vmem>>, %arg4: memref<1x128xf32, #tpu.memory_space<vmem>>, %arg5: memref<512x128xf32, #tpu.memory_space<vmem>>) attributes {dimension_semantics = [#tpu.dimension_semantics<parallel>], iteration_bounds = array<i64: 1>, scalar_prefetch = 0 : i64, scratch_operands = 0 : i64, tpu.core_type = #tpu.core_type<tc>, window_params = [{transform_indices = @transform_0, window_bounds = array<i64: 512, 384>}, {transform_indices = @transform_1, window_bounds = array<i64: 512, 32>}, {pipeline_mode = #tpu.pipeline_mode<synchronous>, transform_indices = @transform_2, window_bounds = array<i64: 384, 128>}, {pipeline_mode = #tpu.pipeline_mode<synchronous>, transform_indices = @transform_3, window_bounds = array<i64: 1, 128>}, {transform_indices = @transform_4, window_bounds = array<i64: 512, 128>}]} {
    %c0 = arith.constant 0 : index
    %c0_0 = arith.constant 0 : index
    %0 = vector.load %arg1[%c0, %c0_0] : memref<512x384xf32, #tpu.memory_space<vmem>>, vector<512x384xf32>
    %c0_1 = arith.constant 0 : index
    %c0_2 = arith.constant 0 : index
    %1 = vector.load %arg3[%c0_1, %c0_2] : memref<384x128xf32, #tpu.memory_space<vmem>>, vector<384x128xf32>
    %cst = arith.constant dense<0.000000e+00> : vector<512x128xf32>
    %2 = tpu.matmul %0, %1, %cst {dimension_numbers = #tpu.dot_dimension_numbers<[1], [0], [0], [1], [0, 0, 1, 1], [], []>} : vector<512x384xf32>, vector<384x128xf32>, vector<512x128xf32> -> vector<512x128xf32>
    %c0_3 = arith.constant 0 : index
    %c0_4 = arith.constant 0 : index
    %3 = vector.load %arg4[%c0_3, %c0_4] : memref<1x128xf32, #tpu.memory_space<vmem>>, vector<1x128xf32>
    %4 = vector.broadcast %3 : vector<1x128xf32> to vector<512x128xf32>
    %5 = arith.addf %2, %4 : vector<512x128xf32>
    %6 = arith.negf %5 : vector<512x128xf32>
    %7 = math.exp %6 : vector<512x128xf32>
    %cst_5 = arith.constant 1.000000e+00 : f32
    %8 = vector.broadcast %cst_5 : f32 to vector<512x128xf32>
    %9 = arith.addf %8, %7 : vector<512x128xf32>
    %10 = arith.divf %8, %9 : vector<512x128xf32>
    %11 = vector.extract_strided_slice %10 {offsets = [0, 0], sizes = [512, 32], strides = [1, 1]} : vector<512x128xf32> to vector<512x32xf32>
    %12 = vector.extract_strided_slice %10 {offsets = [0, 32], sizes = [512, 32], strides = [1, 1]} : vector<512x128xf32> to vector<512x32xf32>
    %13 = vector.extract_strided_slice %10 {offsets = [0, 64], sizes = [512, 32], strides = [1, 1]} : vector<512x128xf32> to vector<512x32xf32>
    %14 = vector.extract_strided_slice %10 {offsets = [0, 96], sizes = [512, 32], strides = [1, 1]} : vector<512x128xf32> to vector<512x32xf32>
    %cst_6 = arith.constant 2.000000e+00 : f32
    %15 = vector.broadcast %cst_6 : f32 to vector<512x32xf32>
    %16 = arith.mulf %15, %14 : vector<512x32xf32>
    %cst_7 = arith.constant 1.000000e+00 : f32
    %17 = vector.broadcast %cst_7 : f32 to vector<512x32xf32>
    %18 = arith.subf %16, %17 : vector<512x32xf32>
    %c0_8 = arith.constant 0 : index
    %c0_9 = arith.constant 0 : index
    %19 = vector.load %arg2[%c0_8, %c0_9] : memref<512x32xf32, #tpu.memory_space<vmem>>, vector<512x32xf32>
    %20 = arith.mulf %12, %19 : vector<512x32xf32>
    %21 = arith.mulf %11, %18 : vector<512x32xf32>
    %22 = arith.addf %20, %21 : vector<512x32xf32>
    %23 = math.tanh %22 : vector<512x32xf32>
    %24 = arith.mulf %13, %23 : vector<512x32xf32>
    %cst_10 = arith.constant 0.000000e+00 : f32
    %25 = vector.broadcast %cst_10 : f32 to vector<512x64xf32>
    %26 = tpu.concatenate %24, %22, %25 in 1 : vector<512x32xf32>, vector<512x32xf32>, vector<512x64xf32> -> vector<512x128xf32>
    %c0_11 = arith.constant 0 : index
    %c0_12 = arith.constant 0 : index
    %27 = vector.load %arg5[%c0_11, %c0_12] : memref<512x128xf32, #tpu.memory_space<vmem>>, vector<512x128xf32>
    tpu.vector_store %arg5[%c0_11, %c0_12], %26 {strides = array<i32>} : memref<512x128xf32, #tpu.memory_space<vmem>>, vector<512x128xf32>,
    return
  }
  func.func @transform_0(%arg0: i32) -> (i32, i32) {
    %c0_i32 = arith.constant 0 : i32
    %c0_i32_0 = arith.constant 0 : i32
    return %arg0, %c0_i32 : i32, i32
  }
  func.func @transform_1(%arg0: i32) -> (i32, i32) {
    %c0_i32 = arith.constant 0 : i32
    %c0_i32_0 = arith.constant 0 : i32
    return %arg0, %c0_i32 : i32, i32
  }
  func.func @transform_2(%arg0: i32) -> (i32, i32) {
    %c0_i32 = arith.constant 0 : i32
    %c0_i32_0 = arith.constant 0 : i32
    %c0_i32_1 = arith.constant 0 : i32
    return %c0_i32, %c0_i32_0 : i32, i32
  }
  func.func @transform_3(%arg0: i32) -> (i32, i32) {
    %c0_i32 = arith.constant 0 : i32
    %c0_i32_0 = arith.constant 0 : i32
    %c0_i32_1 = arith.constant 0 : i32
    return %c0_i32, %c0_i32_0 : i32, i32
  }
  func.func @transform_4(%arg0: i32) -> (i32, i32) {
    %c0_i32 = arith.constant 0 : i32
    %c0_i32_0 = arith.constant 0 : i32
    return %arg0, %c0_i32 : i32, i32
  }
}

</mosaic_0001>

<bundles_post_ra>
// kernel: tpu_custom_call.1
= control target key start
LH: loop header
LB: loop body
LE: loop exit
PB: predicated region body
PF: predicated region fallthrough
CT: control target
= control target key end

     0   :  { %9 = vsyncpa [#allocation3], 0  ;;  %s6290_s0 = inlined_call_operand.hbm [shape: f32[512,384], index: 0, kind: input, shape index: {}]   ;;  %s6291_s1 = inlined_call_operand.vmem [shape: f32[512,32], index: 1, kind: input, shape index: {}]   ;;  %s6292_s2 = inlined_call_operand.vmem [shape: f32[384,128], index: 2, kind: input, shape index: {}]   ;;  %s6293_s3 = inlined_call_operand.vmem [shape: f32[1,128], index: 3, kind: input, shape index: {}]   ;;  %s6294_s4 = inlined_call_operand.hbm [shape: f32[512,128], index: 4, kind: output, shape index: {}]  }
   0x1   :  { %10 = vsyncpa [#allocation4], 0  ;;  %s4327_s15 = smov [#allocation2]   ;;  %s4279_s19 = scalar_lea.hbm %s6290_s0, 24576 }
   0x2   :  { %s16_s16 = sshll.u32 %s4327_s15, 4  ;;  %p4280_p0 = scmp.ne.s32.totalorder %s6290_s0, %s4279_s19  ;;  %s17_s16 = int_to_ptr.vmem [resolvable:$true] %s16_s16 }
   0x3   :  { %p4283_p1 = scmp.lt.u32.totalorder %s4279_s19, %s6290_s0 }
   0x5   :  { %p4285_p2 = pnand %p4283_p1, %p4280_p0 }
   0x7   :  { %4288 = shalt.err (!%p4285_p2)
}
   0x8   :  { %s4289_s24 = scalar_lea.vmem %s17_s16, 24576  ;;  %p4294_p4 = scmp.lt.s32.totalorder %s17_s16, %s17_s16 }
   0x9   :  { %p4290_p3 = scmp.ne.s32.totalorder %s17_s16, %s4289_s24  ;;  %p4295_p5 = scmp.lt.s32.totalorder %s4289_s24, %s4289_s24 }
   0xb   :  { %p4296_p6 = por %p4295_p5, %p4294_p4 }
   0xd   :  { %p4297_p7 = pnand %p4296_p6, %p4290_p3 }
   0xf   :  { %4300 = shalt.err (!%p4297_p7)
}
  0x10   :  { %s4328_s25 = smov 384   ;;  %s4329_s26 = smov 24  }
  0x11   :  { %22 = dma.hbm_to_vmem [thread:$0]  %s6290_s0, 24576, %s17_s16, [#allocation3], %s4328_s25, %s4328_s25, %s4329_s26  }
  0x12   :  { %4323 = dma.done.wait [#allocation3], 24576  }
  0x13   :  { %4324 = vsyncadd [#allocation3], 4294942720  ;;  %v4330_v0 = vmov 0.0|0.0   ;;  %v224_v1 = vld [vmem:[%s6292_s2] sm:$0xff]  ;;  %v225_v2 = vld [vmem:[%s6292_s2 + $0x8] sm:$0xff]  ;;  %s4331_s18 = smov 32  }
  0x14   :  { %3773 = vmatprep.subr.bf16.mxu0 %v4330_v0  ;;  %3853 = vmatprep.subr.bf16.mxu1 %v4330_v0  ;;  %v226_v3 = vld [vmem:[%s6292_s2 + $0x10] sm:$0xff]  ;;  %v3774_v4 = vpack.c.bf16 %v225_v2, %v224_v1  ;;  %v227_v5 = vld [vmem:[%s6292_s2 + $0x18] sm:$0xff]  ;;  %v228_v7 = vld [vmem:[%s6292_s2 + $0x20] sm:$0xff]  ;;  %vm3225_vm0 = vcmask 261120   ;;  %vm3290_vm1 = vcmask 523264  }
  0x15   :  { %v3777_v6 = vpack.c.bf16 %v227_v5, %v226_v3  ;;  %v229_v8 = vld [vmem:[%s6292_s2 + $0x28] sm:$0xff]  ;;  %v230_v10 = vld [vmem:[%s6292_s2 + $0x30] sm:$0xff]  ;;  %v231_v11 = vld [vmem:[%s6292_s2 + $0x38] sm:$0xff] }
  0x16   :  { %3775 = vmatpush1.bf16.msra.mxu0 %v3774_v4  ;;  %3869 = vmatpush1.bf16.msra.mxu1 %v3774_v4  ;;  %v3780_v9 = vpack.c.bf16 %v229_v8, %v228_v7  ;;  %v33_v12 = vld [vmem:[#allocation2 + $0x8] sm:$0xff]  ;;  %v3783_v13 = vpack.c.bf16 %v231_v11, %v230_v10  ;;  %v232_v15 = vld [vmem:[%s6292_s2 + $0x40] sm:$0xff]  ;;  %v234_v18 = vld [vmem:[%s6292_s2 + $0x50] sm:$0xff] }
  0x17   :  { %3776 = vmatprep.subr.bf16.mxu0 %v4330_v0  ;;  %3854 = vmatprep.subr.bf16.mxu1 %v4330_v0  ;;  %v177_v14 = vld [vmem:[#allocation2 + $0x488] sm:$0xff]  ;;  %v235_v19 = vld [vmem:[%s6292_s2 + $0x58] sm:$0xff]  ;;  %v236_v21 = vld [vmem:[%s6292_s2 + $0x60] sm:$0xff] }
  0x18   :  { %v233_v16 = vld [vmem:[%s6292_s2 + $0x48] sm:$0xff]  ;;  %343 = vmatprep.mubr.f32.mxu0 %v33_v12  ;;  %583 = vmatprep.mubr.f32.mxu1 %v177_v14  ;;  %v3789_v20 = vpack.c.bf16 %v235_v19, %v234_v18  ;;  %v238_v24 = vld [vmem:[%s6292_s2 + $0x70] sm:$0xff]  ;;  %v239_v25 = vld [vmem:[%s6292_s2 + $0x78] sm:$0xff] }
  0x19   :  { %v3786_v17 = vpack.c.bf16 %v233_v16, %v232_v15  ;;  %v237_v22 = vld [vmem:[%s6292_s2 + $0x68] sm:$0xff]  ;;  %v3795_v26 = vpack.c.bf16 %v239_v25, %v238_v24  ;;  %v240_v27 = vld [vmem:[%s6292_s2 + $0x80] sm:$0xff]  ;;  %v242_v30 = vld [vmem:[%s6292_s2 + $0x90] sm:$0xff] }
  0x1a   :  { %3778 = vmatpush1.bf16.msra.mxu0 %v3777_v6  ;;  %3870 = vmatpush1.bf16.msra.mxu1 %v3777_v6  ;;  %v3792_v23 = vpack.c.bf16 %v237_v22, %v236_v21  ;;  %v241_v28 = vld [vmem:[%s6292_s2 + $0x88] sm:$0xff]  ;;  %v243_v31 = vld [vmem:[%s6292_s2 + $0x98] sm:$0xff]  ;;  %v244_v33 = vld [vmem:[%s6292_s2 + $0xa0] sm:$0xff] }
  0x1b   :  { %3779 = vmatprep.subr.bf16.mxu0 %v4330_v0  ;;  %3855 = vmatprep.subr.bf16.mxu1 %v4330_v0  ;;  %v3798_v29 = vpack.c.bf16 %v241_v28, %v240_v27  ;;  %v3801_v32 = vpack.c.bf16 %v243_v31, %v242_v30  ;;  %v245_v34 = vld [vmem:[%s6292_s2 + $0xa8] sm:$0xff]  ;;  %v246_v36 = vld [vmem:[%s6292_s2 + $0xb0] sm:$0xff]  ;;  %v247_v37 = vld [vmem:[%s6292_s2 + $0xb8] sm:$0xff] }
  0x1c   :  { %v3804_v35 = vpack.c.bf16 %v245_v34, %v244_v33  ;;  %v3807_v38 = vpack.c.bf16 %v247_v37, %v246_v36  ;;  %v248_v39 = vld [vmem:[%s6292_s2 + $0xc0] sm:$0xff]  ;;  %v249_v40 = vld [vmem:[%s6292_s2 + $0xc8] sm:$0xff]  ;;  %v250_v42 = vld [vmem:[%s6292_s2 + $0xd0] sm:$0xff] }
  0x1d   :  { %v3810_v41 = vpack.c.bf16 %v249_v40, %v248_v39  ;;  %v251_v43 = vld [vmem:[%s6292_s2 + $0xd8] sm:$0xff]  ;;  %v252_v45 = vld [vmem:[%s6292_s2 + $0xe0] sm:$0xff]  ;;  %v253_v46 = vld [vmem:[%s6292_s2 + $0xe8] sm:$0xff] }
  0x1e   :  { %3781 = vmatpush1.bf16.msra.mxu0 %v3780_v9  ;;  %3871 = vmatpush1.bf16.msra.mxu1 %v3780_v9  ;;  %v3813_v44 = vpack.c.bf16 %v251_v43, %v250_v42  ;;  %v3816_v47 = vpack.c.bf16 %v253_v46, %v252_v45  ;;  %v254_v48 = vld [vmem:[%s6292_s2 + $0xf0] sm:$0xff]  ;;  %v255_v49 = vld [vmem:[%s6292_s2 + $0xf8] sm:$0xff]  ;;  %v256_v50 = vld [vmem:[%s6292_s2 + $0x100] sm:$0xff] }
  0x1f   :  { %3782 = vmatprep.subr.bf16.mxu0 %v4330_v0  ;;  %3856 = vmatprep.subr.bf16.mxu1 %v4330_v0  ;;  %v257_v51 = vld [vmem:[%s6292_s2 + $0x108] sm:$0xff]  ;;  %v3819_v52 = vpack.c.bf16 %v255_v49, %v254_v48  ;;  %v258_v54 = vld [vmem:[%s6292_s2 + $0x110] sm:$0xff]  ;;  %v259_v55 = vld [vmem:[%s6292_s2 + $0x118] sm:$0xff] }
  0x20   :  { %v3821_v53 = vpack.c.bf16 %v257_v51, %v256_v50  ;;  %v32_v56 = vld [vmem:[#allocation2] sm:$0xff]  ;;  %v3825_v59 = vpack.c.bf16 %v259_v55, %v258_v54  ;;  %v261_v62 = vld [vmem:[%s6292_s2 + $0x128] sm:$0xff]  ;;  %v35_v63 = vld [vmem:[#allocation2 + $0x18] sm:$0xff] }
  0x21   :  { %v176_v57 = vld [vmem:[#allocation2 + $0x480] sm:$0xff]  ;;  %v39_v1 = vld [vmem:[#allocation2 + $0x38] sm:$0xff]  ;;  %v262_v4 = vld [vmem:[%s6292_s2 + $0x130] sm:$0xff] }
  0x22   :  { %3784 = vmatpush1.bf16.msra.mxu0 %v3783_v13  ;;  %3872 = vmatpush1.bf16.msra.mxu1 %v3783_v13  ;;  %v36_v58 = vld [vmem:[#allocation2 + $0x20] sm:$0xff]  ;;  %v183_v2 = vld [vmem:[#allocation2 + $0x4b8] sm:$0xff]  ;;  %v38_v6 = vld [vmem:[#allocation2 + $0x30] sm:$0xff] }
  0x23   :  { %3785 = vmatprep.subr.bf16.mxu0 %v4330_v0  ;;  %3857 = vmatprep.subr.bf16.mxu1 %v4330_v0  ;;  %v180_v60 = vld [vmem:[#allocation2 + $0x4a0] sm:$0xff]  ;;  %v263_v5 = vld [vmem:[%s6292_s2 + $0x138] sm:$0xff]  ;;  %v182_v7 = vld [vmem:[#allocation2 + $0x4b0] sm:$0xff] }
  0x24   :  { %v260_v61 = vld [vmem:[%s6292_s2 + $0x120] sm:$0xff]  ;;  %v42_v8 = vld [vmem:[#allocation2 + $0x50] sm:$0xff]  ;;  %v3833_v10 = vpack.c.bf16 %v263_v5, %v262_v4  ;;  %v265_v12 = vld [vmem:[%s6292_s2 + $0x148] sm:$0xff] }
  0x25   :  { %v3829_v3 = vpack.c.bf16 %v261_v62, %v260_v61  ;;  %v186_v9 = vld [vmem:[#allocation2 + $0x4d0] sm:$0xff]  ;;  %v264_v11 = vld [vmem:[%s6292_s2 + $0x140] sm:$0xff]  ;;  %v41_v13 = vld [vmem:[#allocation2 + $0x48] sm:$0xff] }
  0x26   :  { %3787 = vmatpush1.bf16.msra.mxu0 %v3786_v17  ;;  %3873 = vmatpush1.bf16.msra.mxu1 %v3786_v17  ;;  %v185_v14 = vld [vmem:[#allocation2 + $0x4c8] sm:$0xff]  ;;  %v3837_v17 = vpack.c.bf16 %v265_v12, %v264_v11  ;;  %v266_v18 = vld [vmem:[%s6292_s2 + $0x150] sm:$0xff]  ;;  %v267_v19 = vld [vmem:[%s6292_s2 + $0x158] sm:$0xff] }
  0x27   :  { %3788 = vmatprep.subr.bf16.mxu0 %v4330_v0  ;;  %3858 = vmatprep.subr.bf16.mxu1 %v4330_v0  ;;  %v45_v15 = vld [vmem:[#allocation2 + $0x68] sm:$0xff]  ;;  %v188_v21 = vld [vmem:[#allocation2 + $0x4e0] sm:$0xff]  ;;  %v3841_v24 = vpack.c.bf16 %v267_v19, %v266_v18  ;;  %v47_v27 = vld [vmem:[#allocation2 + $0x78] sm:$0xff] }
  0x28   :  { %v189_v16 = vld [vmem:[#allocation2 + $0x4e8] sm:$0xff]  ;;  %v48_v22 = vld [vmem:[#allocation2 + $0x80] sm:$0xff]  ;;  %v191_v28 = vld [vmem:[#allocation2 + $0x4f8] sm:$0xff] }
  0x29   :  { %v268_v25 = vld [vmem:[%s6292_s2 + $0x160] sm:$0xff]  ;;  %v195_v30 = vld [vmem:[#allocation2 + $0x518] sm:$0xff]  ;;  %v50_v34 = vld [vmem:[#allocation2 + $0x90] sm:$0xff] }
  0x2a   :  { %3790 = vmatpush1.bf16.msra.mxu0 %v3789_v20  ;;  %3874 = vmatpush1.bf16.msra.mxu1 %v3789_v20  ;;  %v44_v20 = vld [vmem:[#allocation2 + $0x60] sm:$0xff]  ;;  %v271_v33 = vld [vmem:[%s6292_s2 + $0x178] sm:$0xff]  ;;  %v54_v36 = vld [vmem:[#allocation2 + $0xb0] sm:$0xff] }
  0x2b   :  { %3791 = vmatprep.subr.bf16.mxu0 %v4330_v0  ;;  %3859 = vmatprep.subr.bf16.mxu1 %v4330_v0  ;;  %v198_v37 = vld [vmem:[#allocation2 + $0x530] sm:$0xff]  ;;  %v53_v39 = vld [vmem:[#allocation2 + $0xa8] sm:$0xff]  ;;  %v56_v43 = vld [vmem:[#allocation2 + $0xc0] sm:$0xff] }
  0x2c   :  { %v197_v40 = vld [vmem:[#allocation2 + $0x528] sm:$0xff]  ;;  %v60_v45 = vld [vmem:[#allocation2 + $0xe0] sm:$0xff]  ;;  %v203_v48 = vld [vmem:[#allocation2 + $0x558] sm:$0xff] }
  0x2d   :  { %v201_v42 = vld [vmem:[#allocation2 + $0x548] sm:$0xff]  ;;  %v204_v46 = vld [vmem:[#allocation2 + $0x560] sm:$0xff]  ;;  %v63_v49 = vld [vmem:[#allocation2 + $0xf8] sm:$0xff] }
  0x2e   :  { %3793 = vmatpush1.bf16.msra.mxu0 %v3792_v23  ;;  %3875 = vmatpush1.bf16.msra.mxu1 %v3792_v23  ;;  %v192_v23 = vld [vmem:[#allocation2 + $0x500] sm:$0xff]  ;;  %v207_v50 = vld [vmem:[#allocation2 + $0x578] sm:$0xff]  ;;  %v62_v51 = vld [vmem:[#allocation2 + $0xf0] sm:$0xff] }
  0x2f   :  { %3794 = vmatprep.subr.bf16.mxu0 %v4330_v0  ;;  %3860 = vmatprep.subr.bf16.mxu1 %v4330_v0  ;;  %v210_v54 = vld [vmem:[#allocation2 + $0x590] sm:$0xff]  ;;  %v65_v55 = vld [vmem:[#allocation2 + $0x108] sm:$0xff]  ;;  %v72_v61 = vld [vmem:[#allocation2 + $0x140] sm:$0xff] }
  0x30   :  { %v216_v62 = vld [vmem:[#allocation2 + $0x5c0] sm:$0xff]  ;;  %v74_v5 = vld [vmem:[#allocation2 + $0x150] sm:$0xff]  ;;  %v77_v11 = vld [vmem:[#allocation2 + $0x168] sm:$0xff] }
  0x31   :  { %v1561_v4 = vld [vmem:[%s6291_s1] sm:$0xff]  ;;  %v221_v12 = vld [vmem:[#allocation2 + $0x5e8] sm:$0xff] }
  0x32   :  { %3796 = vmatpush1.bf16.msra.mxu0 %v3795_v26  ;;  %3876 = vmatpush1.bf16.msra.mxu1 %v3795_v26  ;;  %v269_v26 = vld [vmem:[%s6292_s2 + $0x168] sm:$0xff]  ;;  %v80_v18 = vld [vmem:[#allocation2 + $0x180] sm:$0xff] }
  0x33   :  { %3797 = vmatprep.subr.bf16.mxu0 %v4330_v0  ;;  %3861 = vmatprep.subr.bf16.mxu1 %v4330_v0  ;;  %v3845_v31 = vpack.c.bf16 %v269_v26, %v268_v25  ;;  %v37_v19 = vld [vmem:[#allocation2 + $0x28] sm:$0xff]  ;;  %v43_v25 = vld [vmem:[#allocation2 + $0x58] sm:$0xff] }
  0x34   :  { %1689 = vrot.lane.b32.xlu0 %v1561_v4, %s4331_s18  ;;  %v87_v26 = vld [vmem:[#allocation2 + $0x1b8] sm:$0xff]  ;;  %v88_v4 = vld [vmem:[#allocation2 + $0x1c0] sm:$0xff] }
  0x36   :  { %3799 = vmatpush1.bf16.msra.mxu0 %v3798_v29  ;;  %3877 = vmatpush1.bf16.msra.mxu1 %v3798_v29  ;;  %v51_v29 = vld [vmem:[#allocation2 + $0x98] sm:$0xff] }
  0x37   :  { %3800 = vmatprep.subr.bf16.mxu0 %v4330_v0  ;;  %3862 = vmatprep.subr.bf16.mxu1 %v4330_v0 }
  0x3a   :  { %3802 = vmatpush1.bf16.msra.mxu0 %v3801_v32  ;;  %3878 = vmatpush1.bf16.msra.mxu1 %v3801_v32  ;;  %v270_v32 = vld [vmem:[%s6292_s2 + $0x170] sm:$0xff] }
  0x3b   :  { %3803 = vmatprep.subr.bf16.mxu0 %v4330_v0  ;;  %3863 = vmatprep.subr.bf16.mxu1 %v4330_v0 }
  0x3e   :  { %3805 = vmatpush1.bf16.msra.mxu0 %v3804_v35  ;;  %3879 = vmatpush1.bf16.msra.mxu1 %v3804_v35  ;;  %v194_v35 = vld [vmem:[#allocation2 + $0x510] sm:$0xff] }
  0x3f   :  { %3806 = vmatprep.subr.bf16.mxu0 %v4330_v0  ;;  %3864 = vmatprep.subr.bf16.mxu1 %v4330_v0 }
  0x42   :  { %3808 = vmatpush1.bf16.msra.mxu0 %v3807_v38  ;;  %3880 = vmatpush1.bf16.msra.mxu1 %v3807_v38  ;;  %v3849_v38 = vpack.c.bf16 %v271_v33, %v270_v32  ;;  %v90_v32 = vld [vmem:[#allocation2 + $0x1d0] sm:$0xff]  ;;  %v52_v33 = vld [vmem:[#allocation2 + $0xa0] sm:$0xff] }
  0x43   :  { %3809 = vmatprep.subr.bf16.mxu0 %v4330_v0  ;;  %3865 = vmatprep.subr.bf16.mxu1 %v4330_v0 }
  0x46   :  { %3811 = vmatpush1.bf16.msra.mxu0 %v3810_v41  ;;  %3881 = vmatpush1.bf16.msra.mxu1 %v3810_v41  ;;  %v57_v41 = vld [vmem:[#allocation2 + $0xc8] sm:$0xff] }
  0x47   :  { %3812 = vmatprep.subr.bf16.mxu0 %v4330_v0  ;;  %3866 = vmatprep.subr.bf16.mxu1 %v4330_v0 }
  0x4a   :  { %3814 = vmatpush1.bf16.msra.mxu0 %v3813_v44  ;;  %3882 = vmatpush1.bf16.msra.mxu1 %v3813_v44  ;;  %v200_v44 = vld [vmem:[#allocation2 + $0x540] sm:$0xff] }
  0x4b   :  { %3815 = vmatprep.subr.bf16.mxu0 %v4330_v0  ;;  %3867 = vmatprep.subr.bf16.mxu1 %v4330_v0 }
  0x4e   :  { %3817 = vmatpush1.bf16.msra.mxu0 %v3816_v47  ;;  %3883 = vmatpush1.bf16.msra.mxu1 %v3816_v47  ;;  %v59_v47 = vld [vmem:[#allocation2 + $0xd8] sm:$0xff] }
  0x4f   :  { %3818 = vmatprep.subr.bf16.mxu0 %v4330_v0  ;;  %3868 = vmatprep.subr.bf16.mxu1 %v4330_v0  ;;  %v179_v0 = vld [vmem:[#allocation2 + $0x498] sm:$0xff] }
  0x52   :  { %3820 = vmatpush1.bf16.msra.mxu0 %v3819_v52  ;;  %3884 = vmatpush1.bf16.msra.mxu1 %v3819_v52  ;;  %v206_v52 = vld [vmem:[#allocation2 + $0x570] sm:$0xff] }
  0x53   :  { %3822 = vmatprep.subr.bf16.mxu1 %v3821_v53 }
  0x55   :  { %344 = vmatmul.mubr.f32.vlgmr.msra.gmra.mrb[0].mxu0 %v32_v56  ;;  %584 = vmatmul.mubr.f32.vlgmr.msra.gmra.mrb[0].mxu1 %v176_v57  ;;  %v209_v56 = vld [vmem:[#allocation2 + $0x588] sm:$0xff] }
  0x56   :  { %3824 = vmatpush3.bf16.msra.mxu1 %v3821_v53  ;;  %348 = vmatprep.mubr.f32.mxu0 %v36_v58  ;;  %v66_v53 = vld [vmem:[#allocation2 + $0x110] sm:$0xff]  ;;  %v69_v57 = vld [vmem:[#allocation2 + $0x128] sm:$0xff] }
  0x57   :  { %588 = vmatprep.mubr.f32.mxu1 %v180_v60  ;;  %3826 = vmatprep.subr.bf16.mxu1 %v3825_v59  ;;  %v213_v58 = vld [vmem:[#allocation2 + $0x5a8] sm:$0xff]  ;;  %v212_v60 = vld [vmem:[#allocation2 + $0x5a0] sm:$0xff] }
  0x59   :  { %349 = vmatmul.mubr.f32.gmra.mrb[2].mxu0 %v35_v63  ;;  %589 = vmatmul.mubr.f32.gmra.mrb[2].mxu1 %v179_v0  ;;  %v71_v63 = vld [vmem:[#allocation2 + $0x138] sm:$0xff] }
  0x5a   :  { %353 = vmatprep.mubr.f32.mxu0 %v39_v1  ;;  %593 = vmatprep.mubr.f32.mxu1 %v183_v2  ;;  %v215_v0 = vld [vmem:[#allocation2 + $0x5b8] sm:$0xff]  ;;  %v1563_v1 = vld [vmem:[%s6291_s1 + $0x10] sm:$0xff] }
  0x5b   :  { %3828 = vmatpush3.bf16.msra.mxu1 %v3825_v59  ;;  %v68_v59 = vld [vmem:[#allocation2 + $0x120] sm:$0xff]  ;;  %v75_v2 = vld [vmem:[#allocation2 + $0x158] sm:$0xff]  ;;  %1693 = vrot.lane.b32.xlu1 %v1563_v1, %s4331_s18 }
  0x5c   :  { %3830 = vmatprep.subr.bf16.mxu1 %v3829_v3  ;;  %v104_v1 = vld [vmem:[#allocation2 + $0x240] sm:$0xff] }
  0x5d   :  { %354 = vmatmul.mubr.f32.gmra.mrb[4].mxu0 %v38_v6  ;;  %594 = vmatmul.mubr.f32.gmra.mrb[4].mxu1 %v182_v7  ;;  %v218_v6 = vld [vmem:[#allocation2 + $0x5d0] sm:$0xff]  ;;  %v1564_v7 = vld [vmem:[%s6291_s1 + $0x18] sm:$0xff] }
  0x5e   :  { %358 = vmatprep.mubr.f32.mxu0 %v42_v8  ;;  %598 = vmatprep.mubr.f32.mxu1 %v186_v9  ;;  %v78_v8 = vld [vmem:[#allocation2 + $0x170] sm:$0xff] }
  0x5f   :  { %3832 = vmatpush3.bf16.msra.mxu1 %v3829_v3  ;;  %v219_v3 = vld [vmem:[#allocation2 + $0x5d8] sm:$0xff]  ;;  %v222_v9 = vld [vmem:[#allocation2 + $0x5f0] sm:$0xff]  ;;  %1695 = vrot.lane.b32.xlu1 %v1564_v7, %s4331_s18 }
  0x60   :  { %3834 = vmatprep.subr.bf16.mxu1 %v3833_v10  ;;  %v107_v7 = vld [vmem:[#allocation2 + $0x258] sm:$0xff] }
  0x61   :  { %359 = vmatmul.mubr.f32.gmra.mrb[6].mxu0 %v41_v13  ;;  %599 = vmatmul.mubr.f32.gmra.mrb[6].mxu1 %v185_v14  ;;  %v1566_v13 = vld [vmem:[%s6291_s1 + $0x28] sm:$0xff] }
  0x62   :  { %363 = vmatprep.mubr.f32.mxu0 %v45_v15  ;;  %603 = vmatprep.mubr.f32.mxu1 %v189_v16  ;;  %v81_v14 = vld [vmem:[#allocation2 + $0x188] sm:$0xff]  ;;  %v34_v15 = vld [vmem:[#allocation2 + $0x10] sm:$0xff]  ;;  %v1565_v16 = vld [vmem:[%s6291_s1 + $0x20] sm:$0xff] }
  0x63   :  { %3836 = vmatpush3.bf16.msra.mxu1 %v3833_v10  ;;  %v1562_v10 = vld [vmem:[%s6291_s1 + $0x8] sm:$0xff]  ;;  %1699 = vrot.lane.b32.xlu1 %v1566_v13, %s4331_s18  ;;  %v110_v13 = vld [vmem:[#allocation2 + $0x270] sm:$0xff] }
  0x64   :  { %3838 = vmatprep.subr.bf16.mxu1 %v3837_v17  ;;  %1691 = vrot.lane.b32.xlu0 %v1562_v10, %s4331_s18  ;;  %v94_v10 = vld [vmem:[#allocation2 + $0x1f0] sm:$0xff] }
  0x65   :  { %364 = vmatmul.mubr.f32.gmra.mrb[8].mxu0 %v44_v20  ;;  %604 = vmatmul.mubr.f32.gmra.mrb[8].mxu1 %v188_v21  ;;  %v84_v20 = vld [vmem:[#allocation2 + $0x1a0] sm:$0xff] }
  0x66   :  { %368 = vmatprep.mubr.f32.mxu0 %v48_v22  ;;  %608 = vmatprep.mubr.f32.mxu1 %v192_v23  ;;  %v40_v21 = vld [vmem:[#allocation2 + $0x40] sm:$0xff]  ;;  %v1567_v22 = vld [vmem:[%s6291_s1 + $0x30] sm:$0xff]  ;;  %v1570_v23 = vld [vmem:[%s6291_s1 + $0x48] sm:$0xff] }
  0x67   :  { %3840 = vmatpush3.bf16.msra.mxu1 %v3837_v17  ;;  %v1568_v17 = vld [vmem:[%s6291_s1 + $0x38] sm:$0xff] }
  0x68   :  { %3842 = vmatprep.subr.bf16.mxu1 %v3841_v24  ;;  %1697 = vrot.lane.b32.xlu0 %v1565_v16, %s4331_s18  ;;  %v100_v16 = vld [vmem:[#allocation2 + $0x220] sm:$0xff] }
  0x69   :  { %369 = vmatmul.mubr.f32.gmra.mrb[10].mxu0 %v47_v27  ;;  %609 = vmatmul.mubr.f32.gmra.mrb[10].mxu1 %v191_v28  ;;  %v46_v27 = vld [vmem:[#allocation2 + $0x70] sm:$0xff]  ;;  %v1569_v28 = vld [vmem:[%s6291_s1 + $0x40] sm:$0xff] }
  0x6a   :  { %373 = vmatprep.mubr.f32.mxu0 %v51_v29  ;;  %613 = vmatprep.mubr.f32.mxu1 %v195_v30  ;;  %v1572_v29 = vld [vmem:[%s6291_s1 + $0x58] sm:$0xff]  ;;  %v86_v30 = vld [vmem:[#allocation2 + $0x1b0] sm:$0xff] }
  0x6b   :  { %3844 = vmatpush3.bf16.msra.mxu1 %v3841_v24  ;;  %1703 = vrot.lane.b32.xlu1 %v1568_v17, %s4331_s18  ;;  %v83_v24 = vld [vmem:[#allocation2 + $0x198] sm:$0xff] }
  0x6c   :  { %3846 = vmatprep.subr.bf16.mxu1 %v3845_v31  ;;  %1701 = vrot.lane.b32.xlu0 %v1567_v22, %s4331_s18  ;;  %v1588_v17 = vld [vmem:[%s6291_s1 + $0xd8] sm:$0xff]  ;;  %v106_v22 = vld [vmem:[#allocation2 + $0x250] sm:$0xff] }
  0x6d   :  { %374 = vmatmul.mubr.f32.gmra.mrb[12].mxu0 %v50_v34  ;;  %614 = vmatmul.mubr.f32.gmra.mrb[12].mxu1 %v194_v35  ;;  %v1571_v34 = vld [vmem:[%s6291_s1 + $0x50] sm:$0xff]  ;;  %v1574_v35 = vld [vmem:[%s6291_s1 + $0x68] sm:$0xff] }
  0x6e   :  { %378 = vmatprep.mubr.f32.mxu0 %v54_v36  ;;  %618 = vmatprep.mubr.f32.mxu1 %v198_v37  ;;  %v89_v36 = vld [vmem:[#allocation2 + $0x1c8] sm:$0xff]  ;;  %v55_v37 = vld [vmem:[#allocation2 + $0xb8] sm:$0xff] }
  0x6f   :  { %3848 = vmatpush3.bf16.msra.mxu1 %v3845_v31  ;;  %1707 = vrot.lane.b32.xlu1 %v1570_v23, %s4331_s18  ;;  %v49_v31 = vld [vmem:[#allocation2 + $0x88] sm:$0xff] }
  0x70   :  { %3850 = vmatprep.subr.bf16.mxu1 %v3849_v38  ;;  %1705 = vrot.lane.b32.xlu0 %v1569_v28, %s4331_s18  ;;  %v1590_v23 = vld [vmem:[%s6291_s1 + $0xe8] sm:$0xff]  ;;  %v112_v28 = vld [vmem:[#allocation2 + $0x280] sm:$0xff] }
  0x71   :  { %379 = vmatmul.mubr.f32.gmra.mrb[14].mxu0 %v53_v39  ;;  %619 = vmatmul.mubr.f32.gmra.mrb[14].mxu1 %v197_v40  ;;  %v58_v39 = vld [vmem:[#allocation2 + $0xd0] sm:$0xff]  ;;  %v1573_v40 = vld [vmem:[%s6291_s1 + $0x60] sm:$0xff] }
  0x72   :  { %383 = vmatprep.mubr.f32.mxu0 %v57_v41  ;;  %623 = vmatprep.mubr.f32.mxu1 %v201_v42  ;;  %v1576_v41 = vld [vmem:[%s6291_s1 + $0x78] sm:$0xff]  ;;  %v92_v42 = vld [vmem:[#allocation2 + $0x1e0] sm:$0xff] }
  0x73   :  { %3852 = vmatpush3.bf16.msra.mxu1 %v3849_v38  ;;  %1711 = vrot.lane.b32.xlu1 %v1572_v29, %s4331_s18  ;;  %v93_v38 = vld [vmem:[#allocation2 + $0x1e8] sm:$0xff]  ;;  %v1592_v29 = vld [vmem:[%s6291_s1 + $0xf8] sm:$0xff] }
  0x74   :  { %1709 = vrot.lane.b32.xlu0 %v1571_v34, %s4331_s18  ;;  %v118_v34 = vld [vmem:[#allocation2 + $0x2b0] sm:$0xff] }
  0x75   :  { %384 = vmatmul.mubr.f32.gmra.mrb[16].mxu0 %v56_v43  ;;  %624 = vmatmul.mubr.f32.gmra.mrb[16].mxu1 %v200_v44  ;;  %v61_v43 = vld [vmem:[#allocation2 + $0xe8] sm:$0xff]  ;;  %v96_v44 = vld [vmem:[#allocation2 + $0x200] sm:$0xff] }
  0x76   :  { %388 = vmatprep.mubr.f32.mxu0 %v60_v45  ;;  %628 = vmatprep.mubr.f32.mxu1 %v204_v46  ;;  %v64_v45 = vld [vmem:[#allocation2 + $0x100] sm:$0xff]  ;;  %v1575_v46 = vld [vmem:[%s6291_s1 + $0x70] sm:$0xff] }
  0x77   :  { %1715 = vrot.lane.b32.xlu1 %v1574_v35, %s4331_s18  ;;  %v1594_v35 = vld [vmem:[%s6291_s1 + $0x108] sm:$0xff] }
  0x78   :  { %1713 = vrot.lane.b32.xlu0 %v1573_v40, %s4331_s18  ;;  %v124_v40 = vld [vmem:[#allocation2 + $0x2e0] sm:$0xff] }
  0x79   :  { %389 = vmatmul.mubr.f32.gmra.mrb[18].mxu0 %v59_v47  ;;  %629 = vmatmul.mubr.f32.gmra.mrb[18].mxu1 %v203_v48  ;;  %v95_v47 = vld [vmem:[#allocation2 + $0x1f8] sm:$0xff] }
  0x7a   :  { %393 = vmatprep.mubr.f32.mxu0 %v63_v49  ;;  %633 = vmatprep.mubr.f32.mxu1 %v207_v50  ;;  %v67_v48 = vld [vmem:[#allocation2 + $0x118] sm:$0xff]  ;;  %v70_v50 = vld [vmem:[#allocation2 + $0x130] sm:$0xff] }
  0x7b   :  { %1719 = vrot.lane.b32.xlu1 %v1576_v41, %s4331_s18  ;;  %v99_v49 = vld [vmem:[#allocation2 + $0x218] sm:$0xff] }
  0x7c   :  { %1717 = vrot.lane.b32.xlu0 %v1575_v46, %s4331_s18  ;;  %v1596_v41 = vld [vmem:[%s6291_s1 + $0x118] sm:$0xff]  ;;  %v130_v46 = vld [vmem:[#allocation2 + $0x310] sm:$0xff] }
  0x7d   :  { %394 = vmatmul.mubr.f32.gmra.mrb[20].mxu0 %v62_v51  ;;  %634 = vmatmul.mubr.f32.gmra.mrb[20].mxu1 %v206_v52  ;;  %v1578_v51 = vld [vmem:[%s6291_s1 + $0x88] sm:$0xff]  ;;  %v1577_v52 = vld [vmem:[%s6291_s1 + $0x80] sm:$0xff] }
  0x7e   :  { %398 = vmatprep.mubr.f32.mxu0 %v66_v53  ;;  %638 = vmatprep.mubr.f32.mxu1 %v210_v54  ;;  %v98_v53 = vld [vmem:[#allocation2 + $0x210] sm:$0xff]  ;;  %v73_v54 = vld [vmem:[#allocation2 + $0x148] sm:$0xff] }
  0x7f   :  { %1723 = vrot.lane.b32.xlu1 %v1578_v51, %s4331_s18  ;;  %v132_v51 = vld [vmem:[#allocation2 + $0x320] sm:$0xff] }
  0x80   :  { %1721 = vrot.lane.b32.xlu0 %v1577_v52, %s4331_s18  ;;  %v136_v52 = vld [vmem:[#allocation2 + $0x340] sm:$0xff] }
  0x81   :  { %399 = vmatmul.mubr.f32.gmra.mrb[22].mxu0 %v65_v55  ;;  %639 = vmatmul.mubr.f32.gmra.mrb[22].mxu1 %v209_v56  ;;  %v102_v55 = vld [vmem:[#allocation2 + $0x230] sm:$0xff]  ;;  %v76_v56 = vld [vmem:[#allocation2 + $0x160] sm:$0xff] }
  0x82   :  { %403 = vmatprep.mubr.f32.mxu0 %v69_v57  ;;  %643 = vmatprep.mubr.f32.mxu1 %v213_v58  ;;  %v1580_v57 = vld [vmem:[%s6291_s1 + $0x98] sm:$0xff]  ;;  %v1579_v58 = vld [vmem:[%s6291_s1 + $0x90] sm:$0xff] }
  0x83   :  { %1727 = vrot.lane.b32.xlu1 %v1580_v57, %s4331_s18  ;;  %v135_v57 = vld [vmem:[#allocation2 + $0x338] sm:$0xff] }
  0x84   :  { %1725 = vrot.lane.b32.xlu0 %v1579_v58, %s4331_s18  ;;  %v142_v58 = vld [vmem:[#allocation2 + $0x370] sm:$0xff] }
  0x85   :  { %404 = vmatmul.mubr.f32.gmra.mrb[24].mxu0 %v68_v59  ;;  %644 = vmatmul.mubr.f32.gmra.mrb[24].mxu1 %v212_v60  ;;  %v101_v59 = vld [vmem:[#allocation2 + $0x228] sm:$0xff]  ;;  %v79_v60 = vld [vmem:[#allocation2 + $0x178] sm:$0xff] }
  0x86   :  { %408 = vmatprep.mubr.f32.mxu0 %v72_v61  ;;  %648 = vmatprep.mubr.f32.mxu1 %v216_v62  ;;  %v105_v61 = vld [vmem:[#allocation2 + $0x248] sm:$0xff]  ;;  %v82_v62 = vld [vmem:[#allocation2 + $0x190] sm:$0xff] }
  0x89   :  { %409 = vmatmul.mubr.f32.gmra.mrb[26].mxu0 %v71_v63  ;;  %649 = vmatmul.mubr.f32.gmra.mrb[26].mxu1 %v215_v0  ;;  %v1582_v63 = vld [vmem:[%s6291_s1 + $0xa8] sm:$0xff]  ;;  %v1581_v0 = vld [vmem:[%s6291_s1 + $0xa0] sm:$0xff] }
  0x8a   :  { %413 = vmatprep.mubr.f32.mxu0 %v75_v2  ;;  %653 = vmatprep.mubr.f32.mxu1 %v219_v3  ;;  %v85_v2 = vld [vmem:[#allocation2 + $0x1a8] sm:$0xff]  ;;  %v108_v3 = vld [vmem:[#allocation2 + $0x260] sm:$0xff] }
  0x8b   :  { %1731 = vrot.lane.b32.xlu1 %v1582_v63, %s4331_s18  ;;  %1729 = vrot.lane.b32.xlu0 %v1581_v0, %s4331_s18  ;;  %v138_v63 = vld [vmem:[#allocation2 + $0x350] sm:$0xff]  ;;  %v148_v0 = vld [vmem:[#allocation2 + $0x3a0] sm:$0xff] }
  0x8d   :  { %414 = vmatmul.mubr.f32.gmra.mrb[28].mxu0 %v74_v5  ;;  %654 = vmatmul.mubr.f32.gmra.mrb[28].mxu1 %v218_v6  ;;  %v1584_v5 = vld [vmem:[%s6291_s1 + $0xb8] sm:$0xff]  ;;  %v1583_v6 = vld [vmem:[%s6291_s1 + $0xb0] sm:$0xff] }
  0x8e   :  { %418 = vmatprep.mubr.f32.mxu0 %v78_v8  ;;  %658 = vmatprep.mubr.f32.mxu1 %v222_v9  ;;  %v91_v8 = vld [vmem:[#allocation2 + $0x1d8] sm:$0xff] }
  0x8f   :  { %v111_v9 = vld [vmem:[#allocation2 + $0x278] sm:$0xff]  ;;  %1735 = vrot.lane.b32.xlu1 %v1584_v5, %s4331_s18  ;;  %1733 = vrot.lane.b32.xlu0 %v1583_v6, %s4331_s18  ;;  %v141_v5 = vld [vmem:[#allocation2 + $0x368] sm:$0xff]  ;;  %v154_v6 = vld [vmem:[#allocation2 + $0x3d0] sm:$0xff] }
  0x91   :  { %419 = vmatmul.mubr.f32.gmra.mrb[30].mxu0 %v77_v11  ;;  %659 = vmatmul.mubr.f32.gmra.mrb[30].mxu1 %v221_v12  ;;  %v1586_v11 = vld [vmem:[%s6291_s1 + $0xc8] sm:$0xff]  ;;  %v1585_v12 = vld [vmem:[%s6291_s1 + $0xc0] sm:$0xff] }
  0x92   :  { %423 = vmatprep.mubr.f32.mxu0 %v81_v14  ;;  %3677 = vmatprep.mubr.f32.mxu1 %v34_v15  ;;  %v97_v14 = vld [vmem:[#allocation2 + $0x208] sm:$0xff]  ;;  %v114_v15 = vld [vmem:[#allocation2 + $0x290] sm:$0xff] }
  0x93   :  { %1739 = vrot.lane.b32.xlu1 %v1586_v11, %s4331_s18  ;;  %1737 = vrot.lane.b32.xlu0 %v1585_v12, %s4331_s18  ;;  %v144_v11 = vld [vmem:[#allocation2 + $0x380] sm:$0xff] }
  0x94   :  { %v160_v12 = vld [vmem:[#allocation2 + $0x400] sm:$0xff] }
  0x95   :  { %424 = vmatmul.mubr.f32.gmra.mrb[32].mxu0 %v80_v18  ;;  %3678 = vmatmul.mubr.f32.vlgmr.msra.gmra.mrb[32].mxu1 %v37_v19  ;;  %v1587_v18 = vld [vmem:[%s6291_s1 + $0xd0] sm:$0xff]  ;;  %v113_v19 = vld [vmem:[#allocation2 + $0x288] sm:$0xff] }
  0x96   :  { %428 = vmatprep.mubr.f32.mxu0 %v84_v20  ;;  %3680 = vmatprep.mubr.f32.mxu1 %v40_v21  ;;  %v103_v20 = vld [vmem:[#allocation2 + $0x238] sm:$0xff]  ;;  %v117_v21 = vld [vmem:[#allocation2 + $0x2a8] sm:$0xff] }
  0x97   :  { %1743 = vrot.lane.b32.xlu1 %v1588_v17, %s4331_s18  ;;  %1741 = vrot.lane.b32.xlu0 %v1587_v18, %s4331_s18  ;;  %v147_v17 = vld [vmem:[#allocation2 + $0x398] sm:$0xff]  ;;  %v166_v18 = vld [vmem:[#allocation2 + $0x430] sm:$0xff] }
  0x99   :  { %429 = vmatmul.mubr.f32.gmra.mrb[34].mxu0 %v83_v24  ;;  %3681 = vmatmul.mubr.f32.gmra.mrb[34].mxu1 %v43_v25  ;;  %v1589_v24 = vld [vmem:[%s6291_s1 + $0xe0] sm:$0xff] }
  0x9a   :  { %433 = vmatprep.mubr.f32.mxu0 %v87_v26  ;;  %3683 = vmatprep.mubr.f32.mxu1 %v46_v27  ;;  %v116_v25 = vld [vmem:[#allocation2 + $0x2a0] sm:$0xff]  ;;  %v109_v26 = vld [vmem:[#allocation2 + $0x268] sm:$0xff] }
  0x9b   :  { %v120_v27 = vld [vmem:[#allocation2 + $0x2c0] sm:$0xff]  ;;  %1747 = vrot.lane.b32.xlu1 %v1590_v23, %s4331_s18  ;;  %1745 = vrot.lane.b32.xlu0 %v1589_v24, %s4331_s18  ;;  %v150_v23 = vld [vmem:[#allocation2 + $0x3b0] sm:$0xff] }
  0x9c   :  { %v172_v24 = vld [vmem:[#allocation2 + $0x460] sm:$0xff] }
  0x9d   :  { %434 = vmatmul.mubr.f32.gmra.mrb[36].mxu0 %v86_v30  ;;  %3684 = vmatmul.mubr.f32.gmra.mrb[36].mxu1 %v49_v31  ;;  %v1591_v30 = vld [vmem:[%s6291_s1 + $0xf0] sm:$0xff]  ;;  %v119_v31 = vld [vmem:[#allocation2 + $0x2b8] sm:$0xff] }
  0x9e   :  { %438 = vmatprep.mubr.f32.mxu0 %v90_v32  ;;  %3686 = vmatprep.mubr.f32.mxu1 %v52_v33  ;;  %v115_v32 = vld [vmem:[#allocation2 + $0x298] sm:$0xff] }
  0x9f   :  { %v123_v33 = vld [vmem:[#allocation2 + $0x2d8] sm:$0xff]  ;;  %1751 = vrot.lane.b32.xlu1 %v1592_v29, %s4331_s18  ;;  %1749 = vrot.lane.b32.xlu0 %v1591_v30, %s4331_s18  ;;  %v153_v29 = vld [vmem:[#allocation2 + $0x3c8] sm:$0xff]  ;;  %v178_v30 = vld [vmem:[#allocation2 + $0x490] sm:$0xff] }
  0xa1   :  { %439 = vmatmul.mubr.f32.gmra.mrb[38].mxu0 %v89_v36  ;;  %3687 = vmatmul.mubr.f32.gmra.mrb[38].mxu1 %v55_v37  ;;  %v1593_v36 = vld [vmem:[%s6291_s1 + $0x100] sm:$0xff]  ;;  %v122_v37 = vld [vmem:[#allocation2 + $0x2d0] sm:$0xff] }
  0xa2   :  { %443 = vmatprep.mubr.f32.mxu0 %v93_v38  ;;  %3689 = vmatprep.mubr.f32.mxu1 %v58_v39  ;;  %v121_v38 = vld [vmem:[#allocation2 + $0x2c8] sm:$0xff]  ;;  %v126_v39 = vld [vmem:[#allocation2 + $0x2f0] sm:$0xff] }
  0xa3   :  { %1755 = vrot.lane.b32.xlu1 %v1594_v35, %s4331_s18  ;;  %1753 = vrot.lane.b32.xlu0 %v1593_v36, %s4331_s18  ;;  %v156_v35 = vld [vmem:[#allocation2 + $0x3e0] sm:$0xff] }
  0xa4   :  { %v184_v36 = vld [vmem:[#allocation2 + $0x4c0] sm:$0xff] }
  0xa5   :  { %444 = vmatmul.mubr.f32.gmra.mrb[40].mxu0 %v92_v42  ;;  %3690 = vmatmul.mubr.f32.gmra.mrb[40].mxu1 %v61_v43  ;;  %v1595_v42 = vld [vmem:[%s6291_s1 + $0x110] sm:$0xff]  ;;  %v125_v43 = vld [vmem:[#allocation2 + $0x2e8] sm:$0xff] }
  0xa6   :  { %448 = vmatprep.mubr.f32.mxu0 %v96_v44  ;;  %3692 = vmatprep.mubr.f32.mxu1 %v64_v45  ;;  %v127_v44 = vld [vmem:[#allocation2 + $0x2f8] sm:$0xff]  ;;  %v129_v45 = vld [vmem:[#allocation2 + $0x308] sm:$0xff] }
  0xa7   :  { %1759 = vrot.lane.b32.xlu1 %v1596_v41, %s4331_s18  ;;  %1757 = vrot.lane.b32.xlu0 %v1595_v42, %s4331_s18  ;;  %v190_v41 = vld [vmem:[#allocation2 + $0x4f0] sm:$0xff] }
  0xa8   :  { %v1615_v42 = vld [vmem:[%s6291_s1 + $0x1b0] sm:$0xff] }
  0xa9   :  { %449 = vmatmul.mubr.f32.gmra.mrb[42].mxu0 %v95_v47  ;;  %3693 = vmatmul.mubr.f32.gmra.mrb[42].mxu1 %v67_v48  ;;  %v1598_v47 = vld [vmem:[%s6291_s1 + $0x128] sm:$0xff]  ;;  %v1597_v48 = vld [vmem:[%s6291_s1 + $0x120] sm:$0xff] }
  0xaa   :  { %453 = vmatprep.mubr.f32.mxu0 %v99_v49  ;;  %3695 = vmatprep.mubr.f32.mxu1 %v70_v50  ;;  %v128_v49 = vld [vmem:[#allocation2 + $0x300] sm:$0xff]  ;;  %v133_v50 = vld [vmem:[#allocation2 + $0x328] sm:$0xff] }
  0xab   :  { %1763 = vrot.lane.b32.xlu1 %v1598_v47, %s4331_s18  ;;  %1761 = vrot.lane.b32.xlu0 %v1597_v48, %s4331_s18  ;;  %v196_v47 = vld [vmem:[#allocation2 + $0x520] sm:$0xff] }
  0xac   :  { %v1617_v48 = vld [vmem:[%s6291_s1 + $0x1c0] sm:$0xff] }
  0xad   :  { %454 = vmatmul.mubr.f32.gmra.mrb[44].mxu0 %v98_v53  ;;  %3696 = vmatmul.mubr.f32.gmra.mrb[44].mxu1 %v73_v54  ;;  %v1600_v53 = vld [vmem:[%s6291_s1 + $0x138] sm:$0xff]  ;;  %v1599_v54 = vld [vmem:[%s6291_s1 + $0x130] sm:$0xff] }
  0xae   :  { %458 = vmatprep.mubr.f32.mxu0 %v102_v55  ;;  %3698 = vmatprep.mubr.f32.mxu1 %v76_v56  ;;  %v131_v55 = vld [vmem:[#allocation2 + $0x318] sm:$0xff] }
  0xaf   :  { %v139_v56 = vld [vmem:[#allocation2 + $0x358] sm:$0xff]  ;;  %1767 = vrot.lane.b32.xlu1 %v1600_v53, %s4331_s18  ;;  %1765 = vrot.lane.b32.xlu0 %v1599_v54, %s4331_s18  ;;  %v202_v53 = vld [vmem:[#allocation2 + $0x550] sm:$0xff] }
  0xb0   :  { %v1619_v54 = vld [vmem:[%s6291_s1 + $0x1d0] sm:$0xff] }
  0xb1   :  { %459 = vmatmul.mubr.f32.gmra.mrb[46].mxu0 %v101_v59  ;;  %3699 = vmatmul.mubr.f32.gmra.mrb[46].mxu1 %v79_v60  ;;  %v1602_v59 = vld [vmem:[%s6291_s1 + $0x148] sm:$0xff]  ;;  %v1601_v60 = vld [vmem:[%s6291_s1 + $0x140] sm:$0xff] }
  0xb2   :  { %463 = vmatprep.mubr.f32.mxu0 %v105_v61  ;;  %3701 = vmatprep.mubr.f32.mxu1 %v82_v62  ;;  %v134_v61 = vld [vmem:[#allocation2 + $0x330] sm:$0xff]  ;;  %v145_v62 = vld [vmem:[#allocation2 + $0x388] sm:$0xff] }
  0xb3   :  { %1771 = vrot.lane.b32.xlu1 %v1602_v59, %s4331_s18  ;;  %1769 = vrot.lane.b32.xlu0 %v1601_v60, %s4331_s18  ;;  %v208_v59 = vld [vmem:[#allocation2 + $0x580] sm:$0xff] }
  0xb4   :  { %v1621_v60 = vld [vmem:[%s6291_s1 + $0x1e0] sm:$0xff] }
  0xb5   :  { %464 = vmatmul.mubr.f32.gmra.mrb[48].mxu0 %v104_v1  ;;  %3702 = vmatmul.mubr.f32.gmra.mrb[48].mxu1 %v85_v2  ;;  %v1604_v1 = vld [vmem:[%s6291_s1 + $0x158] sm:$0xff]  ;;  %v1603_v2 = vld [vmem:[%s6291_s1 + $0x150] sm:$0xff] }
  0xb6   :  { %468 = vmatprep.mubr.f32.mxu0 %v108_v3  ;;  %3704 = vmatprep.mubr.f32.mxu1 %v88_v4  ;;  %v137_v3 = vld [vmem:[#allocation2 + $0x348] sm:$0xff]  ;;  %v151_v4 = vld [vmem:[#allocation2 + $0x3b8] sm:$0xff] }
  0xb7   :  { %1775 = vrot.lane.b32.xlu1 %v1604_v1, %s4331_s18  ;;  %1773 = vrot.lane.b32.xlu0 %v1603_v2, %s4331_s18  ;;  %v214_v1 = vld [vmem:[#allocation2 + $0x5b0] sm:$0xff] }
  0xb8   :  { %v1623_v2 = vld [vmem:[%s6291_s1 + $0x1f0] sm:$0xff] }
  0xb9   :  { %469 = vmatmul.mubr.f32.gmra.mrb[50].mxu0 %v107_v7  ;;  %3705 = vmatmul.mubr.f32.gmra.mrb[50].mxu1 %v91_v8  ;;  %v1606_v7 = vld [vmem:[%s6291_s1 + $0x168] sm:$0xff]  ;;  %v1605_v8 = vld [vmem:[%s6291_s1 + $0x160] sm:$0xff] }
  0xba   :  { %473 = vmatprep.mubr.f32.mxu0 %v111_v9  ;;  %3707 = vmatprep.mubr.f32.mxu1 %v94_v10  ;;  %v140_v9 = vld [vmem:[#allocation2 + $0x360] sm:$0xff]  ;;  %v157_v10 = vld [vmem:[#allocation2 + $0x3e8] sm:$0xff] }
  0xbb   :  { %1779 = vrot.lane.b32.xlu1 %v1606_v7, %s4331_s18  ;;  %1777 = vrot.lane.b32.xlu0 %v1605_v8, %s4331_s18  ;;  %v173_v7 = vld [vmem:[#allocation2 + $0x468] sm:$0xff]  ;;  %v223_v8 = vld [vmem:[#allocation2 + $0x5f8] sm:$0xff] }
  0xbd   :  { %474 = vmatmul.mubr.f32.gmra.mrb[52].mxu0 %v110_v13  ;;  %3708 = vmatmul.mubr.f32.gmra.mrb[52].mxu1 %v97_v14  ;;  %v1608_v13 = vld [vmem:[%s6291_s1 + $0x178] sm:$0xff]  ;;  %v1607_v14 = vld [vmem:[%s6291_s1 + $0x170] sm:$0xff] }
  0xbe   :  { %478 = vmatprep.mubr.f32.mxu0 %v114_v15  ;;  %3710 = vmatprep.mubr.f32.mxu1 %v100_v16  ;;  %v143_v15 = vld [vmem:[#allocation2 + $0x378] sm:$0xff] }
  0xbf   :  { %v163_v16 = vld [vmem:[#allocation2 + $0x418] sm:$0xff]  ;;  %1783 = vrot.lane.b32.xlu1 %v1608_v13, %s4331_s18  ;;  %1781 = vrot.lane.b32.xlu0 %v1607_v14, %s4331_s18 }
  0xc1   :  { %479 = vmatmul.mubr.f32.gmra.mrb[54].mxu0 %v113_v19  ;;  %3711 = vmatmul.mubr.f32.gmra.mrb[54].mxu1 %v103_v20  ;;  %v1610_v19 = vld [vmem:[%s6291_s1 + $0x188] sm:$0xff]  ;;  %v1609_v20 = vld [vmem:[%s6291_s1 + $0x180] sm:$0xff] }
  0xc2   :  { %483 = vmatprep.mubr.f32.mxu0 %v117_v21  ;;  %3713 = vmatprep.mubr.f32.mxu1 %v106_v22  ;;  %v146_v21 = vld [vmem:[#allocation2 + $0x390] sm:$0xff]  ;;  %v169_v22 = vld [vmem:[#allocation2 + $0x448] sm:$0xff] }
  0xc3   :  { %1787 = vrot.lane.b32.xlu1 %v1610_v19, %s4331_s18  ;;  %1785 = vrot.lane.b32.xlu0 %v1609_v20, %s4331_s18 }
  0xc5   :  { %484 = vmatmul.mubr.f32.gmra.mrb[56].mxu0 %v116_v25  ;;  %3714 = vmatmul.mubr.f32.gmra.mrb[56].mxu1 %v109_v26  ;;  %v1612_v25 = vld [vmem:[%s6291_s1 + $0x198] sm:$0xff]  ;;  %v1611_v26 = vld [vmem:[%s6291_s1 + $0x190] sm:$0xff] }
  0xc6   :  { %488 = vmatprep.mubr.f32.mxu0 %v120_v27  ;;  %3716 = vmatprep.mubr.f32.mxu1 %v112_v28  ;;  %v149_v27 = vld [vmem:[#allocation2 + $0x3a8] sm:$0xff]  ;;  %v175_v28 = vld [vmem:[#allocation2 + $0x478] sm:$0xff] }
  0xc7   :  { %1791 = vrot.lane.b32.xlu1 %v1612_v25, %s4331_s18  ;;  %1789 = vrot.lane.b32.xlu0 %v1611_v26, %s4331_s18 }
  0xc9   :  { %489 = vmatmul.mubr.f32.gmra.mrb[58].mxu0 %v119_v31  ;;  %3717 = vmatmul.mubr.f32.gmra.mrb[58].mxu1 %v115_v32  ;;  %v1614_v31 = vld [vmem:[%s6291_s1 + $0x1a8] sm:$0xff]  ;;  %v1613_v32 = vld [vmem:[%s6291_s1 + $0x1a0] sm:$0xff] }
  0xca   :  { %493 = vmatprep.mubr.f32.mxu0 %v123_v33  ;;  %3719 = vmatprep.mubr.f32.mxu1 %v118_v34  ;;  %v152_v33 = vld [vmem:[#allocation2 + $0x3c0] sm:$0xff]  ;;  %v181_v34 = vld [vmem:[#allocation2 + $0x4a8] sm:$0xff] }
  0xcb   :  { %1795 = vrot.lane.b32.xlu1 %v1614_v31, %s4331_s18  ;;  %1793 = vrot.lane.b32.xlu0 %v1613_v32, %s4331_s18 }
  0xcd   :  { %494 = vmatmul.mubr.f32.gmra.mrb[60].mxu0 %v122_v37  ;;  %3720 = vmatmul.mubr.f32.gmra.mrb[60].mxu1 %v121_v38  ;;  %v1616_v37 = vld [vmem:[%s6291_s1 + $0x1b8] sm:$0xff] }
  0xce   :  { %498 = vmatprep.mubr.f32.mxu0 %v126_v39  ;;  %3722 = vmatprep.mubr.f32.mxu1 %v124_v40  ;;  %v155_v38 = vld [vmem:[#allocation2 + $0x3d8] sm:$0xff] }
  0xcf   :  { %v187_v39 = vld [vmem:[#allocation2 + $0x4d8] sm:$0xff]  ;;  %1799 = vrot.lane.b32.xlu1 %v1616_v37, %s4331_s18  ;;  %1797 = vrot.lane.b32.xlu0 %v1615_v42, %s4331_s18 }
  0xd0   :  { %v159_v40 = vld [vmem:[#allocation2 + $0x3f8] sm:$0xff] }
  0xd1   :  { %499 = vmatmul.mubr.f32.gmra.mrb[62].mxu0 %v125_v43  ;;  %3723 = vmatmul.mubr.f32.gmra.mrb[62].mxu1 %v127_v44  ;;  %v158_v43 = vld [vmem:[#allocation2 + $0x3f0] sm:$0xff]  ;;  %v193_v44 = vld [vmem:[#allocation2 + $0x508] sm:$0xff] }
  0xd2   :  { %503 = vmatprep.mubr.f32.mxu0 %v129_v45  ;;  %3725 = vmatprep.mubr.f32.mxu1 %v130_v46  ;;  %v1618_v45 = vld [vmem:[%s6291_s1 + $0x1c8] sm:$0xff]  ;;  %v162_v46 = vld [vmem:[#allocation2 + $0x410] sm:$0xff] }
  0xd3   :  { %1803 = vrot.lane.b32.xlu1 %v1618_v45, %s4331_s18  ;;  %1801 = vrot.lane.b32.xlu0 %v1617_v48, %s4331_s18 }
  0xd5   :  { %504 = vmatmul.mubr.f32.gmra.mrb[64].mxu0 %v128_v49  ;;  %3726 = vmatmul.mubr.f32.gmra.mrb[64].mxu1 %v133_v50  ;;  %v161_v49 = vld [vmem:[#allocation2 + $0x408] sm:$0xff]  ;;  %v199_v50 = vld [vmem:[#allocation2 + $0x538] sm:$0xff] }
  0xd6   :  { %508 = vmatprep.mubr.f32.mxu0 %v132_v51  ;;  %3728 = vmatprep.mubr.f32.mxu1 %v136_v52  ;;  %v1620_v51 = vld [vmem:[%s6291_s1 + $0x1d8] sm:$0xff]  ;;  %v165_v52 = vld [vmem:[#allocation2 + $0x428] sm:$0xff] }
  0xd7   :  { %1807 = vrot.lane.b32.xlu1 %v1620_v51, %s4331_s18  ;;  %1805 = vrot.lane.b32.xlu0 %v1619_v54, %s4331_s18 }
  0xd9   :  { %509 = vmatmul.mubr.f32.gmra.mrb[66].mxu0 %v131_v55  ;;  %3729 = vmatmul.mubr.f32.gmra.mrb[66].mxu1 %v139_v56  ;;  %v164_v55 = vld [vmem:[#allocation2 + $0x420] sm:$0xff]  ;;  %v205_v56 = vld [vmem:[#allocation2 + $0x568] sm:$0xff] }
  0xda   :  { %513 = vmatprep.mubr.f32.mxu0 %v135_v57  ;;  %3731 = vmatprep.mubr.f32.mxu1 %v142_v58  ;;  %v1622_v57 = vld [vmem:[%s6291_s1 + $0x1e8] sm:$0xff]  ;;  %v168_v58 = vld [vmem:[#allocation2 + $0x440] sm:$0xff] }
  0xdb   :  { %1811 = vrot.lane.b32.xlu1 %v1622_v57, %s4331_s18  ;;  %1809 = vrot.lane.b32.xlu0 %v1621_v60, %s4331_s18 }
  0xdd   :  { %514 = vmatmul.mubr.f32.gmra.mrb[68].mxu0 %v134_v61  ;;  %3732 = vmatmul.mubr.f32.gmra.mrb[68].mxu1 %v145_v62  ;;  %v167_v61 = vld [vmem:[#allocation2 + $0x438] sm:$0xff] }
  0xde   :  { %518 = vmatprep.mubr.f32.mxu0 %v138_v63  ;;  %3734 = vmatprep.mubr.f32.mxu1 %v148_v0  ;;  %v211_v62 = vld [vmem:[#allocation2 + $0x598] sm:$0xff] }
  0xdf   :  { %v1624_v63 = vld [vmem:[%s6291_s1 + $0x1f8] sm:$0xff]  ;;  %1813 = vrot.lane.b32.xlu0 %v1623_v2, %s4331_s18 }
  0xe0   :  { %v171_v0 = vld [vmem:[#allocation2 + $0x458] sm:$0xff]  ;;  %1815 = vrot.lane.b32.xlu1 %v1624_v63, %s4331_s18 }
  0xe1   :  { %519 = vmatmul.mubr.f32.gmra.mrb[70].mxu0 %v137_v3  ;;  %3735 = vmatmul.mubr.f32.gmra.mrb[70].mxu1 %v151_v4  ;;  %v170_v3 = vld [vmem:[#allocation2 + $0x450] sm:$0xff]  ;;  %v217_v4 = vld [vmem:[#allocation2 + $0x5c8] sm:$0xff] }
  0xe2   :  { %523 = vmatprep.mubr.f32.mxu0 %v141_v5  ;;  %3737 = vmatprep.mubr.f32.mxu1 %v154_v6  ;;  %v174_v5 = vld [vmem:[#allocation2 + $0x470] sm:$0xff]  ;;  %v220_v6 = vld [vmem:[#allocation2 + $0x5e0] sm:$0xff] }
  0xe5   :  { %524 = vmatmul.mubr.f32.gmra.mrb[72].mxu0 %v140_v9  ;;  %3738 = vmatmul.mubr.f32.gmra.mrb[72].mxu1 %v157_v10  ;;  %v4805_v9 = vpop.permute.xlu1 %1693  ;;  %v4807_v10 = vpop.permute.xlu0 %1689 }
  0xe6   :  { %528 = vmatprep.mubr.f32.mxu0 %v144_v11  ;;  %3740 = vmatprep.mubr.f32.mxu1 %v160_v12  ;;  %6420 = vst [vmem:[#allocation8_spill] sm:$0xff] %v4805_v9  ;;  %6421 = vst [vmem:[#allocation9_spill] sm:$0xff] %v4807_v10 }
  0xe9   :  { %529 = vmatmul.mubr.f32.gmra.mrb[74].mxu0 %v143_v15  ;;  %3741 = vmatmul.mubr.f32.gmra.mrb[74].mxu1 %v163_v16  ;;  %v4809_v11 = vpop.permute.xlu1 %1695  ;;  %v4811_v12 = vpop.permute.xlu0 %1691 }
  0xea   :  { %533 = vmatprep.mubr.f32.mxu0 %v147_v17  ;;  %3743 = vmatprep.mubr.f32.mxu1 %v166_v18  ;;  %6422 = vst [vmem:[#allocation10_spill] sm:$0xff] %v4809_v11  ;;  %6423 = vst [vmem:[#allocation11_spill] sm:$0xff] %v4811_v12 }
  0xed   :  { %534 = vmatmul.mubr.f32.gmra.mrb[76].mxu0 %v146_v21  ;;  %3744 = vmatmul.mubr.f32.gmra.mrb[76].mxu1 %v169_v22  ;;  %v4813_v13 = vpop.permute.xlu1 %1699  ;;  %v4815_v14 = vpop.permute.xlu0 %1697 }
  0xee   :  { %538 = vmatprep.mubr.f32.mxu0 %v150_v23  ;;  %3746 = vmatprep.mubr.f32.mxu1 %v172_v24  ;;  %6424 = vst [vmem:[#allocation12_spill] sm:$0xff] %v4813_v13  ;;  %6425 = vst [vmem:[#allocation13_spill] sm:$0xff] %v4815_v14 }
  0xf1   :  { %539 = vmatmul.mubr.f32.gmra.mrb[78].mxu0 %v149_v27  ;;  %3747 = vmatmul.mubr.f32.gmra.mrb[78].mxu1 %v175_v28  ;;  %v4817_v15 = vpop.permute.xlu1 %1703  ;;  %v4819_v16 = vpop.permute.xlu0 %1701 }
  0xf2   :  { %543 = vmatprep.mubr.f32.mxu0 %v153_v29  ;;  %3749 = vmatprep.mubr.f32.mxu1 %v178_v30  ;;  %6426 = vst [vmem:[#allocation14_spill] sm:$0xff] %v4817_v15  ;;  %6427 = vst [vmem:[#allocation15_spill] sm:$0xff] %v4819_v16 }
  0xf5   :  { %544 = vmatmul.mubr.f32.gmra.mrb[80].mxu0 %v152_v33  ;;  %3750 = vmatmul.mubr.f32.gmra.mrb[80].mxu1 %v181_v34  ;;  %v4821_v17 = vpop.permute.xlu1 %1707  ;;  %v4827_v22 = vpop.permute.xlu0 %1705 }
  0xf6   :  { %548 = vmatprep.mubr.f32.mxu0 %v156_v35  ;;  %3752 = vmatprep.mubr.f32.mxu1 %v184_v36  ;;  %6428 = vst [vmem:[#allocation16_spill] sm:$0xff] %v4821_v17  ;;  %6429 = vst [vmem:[#allocation17_spill] sm:$0xff] %v4827_v22 }
  0xf9   :  { %549 = vmatmul.mubr.f32.gmra.mrb[82].mxu0 %v155_v38  ;;  %3753 = vmatmul.mubr.f32.gmra.mrb[82].mxu1 %v187_v39  ;;  %v4833_v27 = vpop.permute.xlu1 %1711  ;;  %v4839_v32 = vpop.permute.xlu0 %1709 }
  0xfa   :  { %553 = vmatprep.mubr.f32.mxu0 %v159_v40  ;;  %3755 = vmatprep.mubr.f32.mxu1 %v190_v41  ;;  %6430 = vst [vmem:[#allocation18_spill] sm:$0xff] %v4833_v27  ;;  %6431 = vst [vmem:[#allocation19_spill] sm:$0xff] %v4839_v32 }
  0xfd   :  { %554 = vmatmul.mubr.f32.gmra.mrb[84].mxu0 %v158_v43  ;;  %3756 = vmatmul.mubr.f32.gmra.mrb[84].mxu1 %v193_v44  ;;  %v4845_v37 = vpop.permute.xlu1 %1715  ;;  %v4851_v42 = vpop.permute.xlu0 %1713 }
  0xfe   :  { %558 = vmatprep.mubr.f32.mxu0 %v162_v46  ;;  %3758 = vmatprep.mubr.f32.mxu1 %v196_v47  ;;  %6432 = vst [vmem:[#allocation20_spill] sm:$0xff] %v4845_v37  ;;  %6433 = vst [vmem:[#allocation21_spill] sm:$0xff] %v4851_v42 }
 0x101   :  { %559 = vmatmul.mubr.f32.gmra.mrb[86].mxu0 %v161_v49  ;;  %3759 = vmatmul.mubr.f32.gmra.mrb[86].mxu1 %v199_v50  ;;  %v4857_v47 = vpop.permute.xlu1 %1719 }
 0x102   :  { %563 = vmatprep.mubr.f32.mxu0 %v165_v52  ;;  %3761 = vmatprep.mubr.f32.mxu1 %v202_v53  ;;  %6434 = vst [vmem:[#allocation22_spill] sm:$0xff] %v4857_v47  ;;  %v4863_v52 = vpop.permute.xlu0 %1717 }
 0x103   :  { %6435 = vst [vmem:[#allocation23_spill] sm:$0xff] %v4863_v52 }
 0x105   :  { %564 = vmatmul.mubr.f32.gmra.mrb[88].mxu0 %v164_v55  ;;  %3762 = vmatmul.mubr.f32.gmra.mrb[88].mxu1 %v205_v56  ;;  %v4869_v57 = vpop.permute.xlu1 %1723 }
 0x106   :  { %568 = vmatprep.mubr.f32.mxu0 %v168_v58  ;;  %3764 = vmatprep.mubr.f32.mxu1 %v208_v59  ;;  %6436 = vst [vmem:[#allocation24_spill] sm:$0xff] %v4869_v57 }
 0x109   :  { %569 = vmatmul.mubr.f32.gmra.mrb[90].mxu0 %v167_v61  ;;  %3765 = vmatmul.mubr.f32.gmra.mrb[90].mxu1 %v211_v62  ;;  %v4875_v62 = vpop.permute.xlu0 %1721 }
 0x10a   :  { %573 = vmatprep.mubr.f32.mxu0 %v171_v0  ;;  %3767 = vmatprep.mubr.f32.mxu1 %v214_v1  ;;  %6437 = vst [vmem:[#allocation25_spill] sm:$0xff] %v4875_v62 }
 0x10d   :  { %574 = vmatmul.mubr.f32.gmra.mrb[92].mxu0 %v170_v3  ;;  %3768 = vmatmul.mubr.f32.gmra.mrb[92].mxu1 %v217_v4  ;;  %v4881_v3 = vpop.permute.xlu1 %1727 }
 0x10e   :  { %578 = vmatprep.mubr.f32.mxu0 %v174_v5  ;;  %3770 = vmatprep.mubr.f32.mxu1 %v220_v6  ;;  %6438 = vst [vmem:[#allocation26_spill] sm:$0xff] %v4881_v3 }
 0x111   :  { %579 = vmatmul.mubr.f32.gmra.mrb[94].mxu0 %v173_v7  ;;  %3771 = vmatmul.mubr.f32.gmra.mrb[94].mxu1 %v223_v8  ;;  %v4887_v8 = vpop.permute.xlu0 %1725 }
 0x112   :  { %6439 = vst [vmem:[#allocation27_spill] sm:$0xff] %v4887_v8 }
 0x128   :  { %v4823_v18 = vpop.f32.mrb[0].mxu0  ;;  %v4825_v19 = vpop.f32.mrb[0].mxu1 }
 0x129   :  { %v347_v20 = vpop.f32.mrb[1].mxu0  ;;  %v587_v21 = vpop.f32.mrb[1].mxu1 }
 0x12c   :  { %v4829_v23 = vpop.f32.mrb[2].mxu0  ;;  %v4831_v24 = vpop.f32.mrb[2].mxu1 }
 0x12d   :  { %v352_v25 = vpop.f32.mrb[3].mxu0  ;;  %v592_v26 = vpop.f32.mrb[3].mxu1 }
 0x130   :  { %v4835_v28 = vpop.f32.mrb[4].mxu0  ;;  %v4837_v29 = vpop.f32.mrb[4].mxu1 }
 0x131   :  { %v357_v30 = vpop.f32.mrb[5].mxu0  ;;  %v597_v31 = vpop.f32.mrb[5].mxu1 }
 0x132   :  { %v4893_v30 = vpop.permute.xlu1 %1731 }
 0x133   :  { %6440 = vst [vmem:[#allocation28_spill] sm:$0xff] %v4893_v30 }
 0x134   :  { %v4841_v33 = vpop.f32.mrb[6].mxu0  ;;  %v4843_v34 = vpop.f32.mrb[6].mxu1 }
 0x135   :  { %v362_v35 = vpop.f32.mrb[7].mxu0  ;;  %v602_v36 = vpop.f32.mrb[7].mxu1 }
 0x138   :  { %v4847_v38 = vpop.f32.mrb[8].mxu0  ;;  %v4849_v39 = vpop.f32.mrb[8].mxu1 }
 0x139   :  { %v367_v40 = vpop.f32.mrb[9].mxu0  ;;  %v607_v41 = vpop.f32.mrb[9].mxu1 }
 0x13a   :  { %v4899_v41 = vpop.permute.xlu0 %1729 }
 0x13b   :  { %6441 = vst [vmem:[#allocation29_spill] sm:$0xff] %v4899_v41 }
 0x13c   :  { %v4853_v43 = vpop.f32.mrb[10].mxu0  ;;  %v4855_v44 = vpop.f32.mrb[10].mxu1 }
 0x13d   :  { %v372_v45 = vpop.f32.mrb[11].mxu0  ;;  %v612_v46 = vpop.f32.mrb[11].mxu1 }
 0x140   :  { %v4859_v48 = vpop.f32.mrb[12].mxu0  ;;  %v4861_v49 = vpop.f32.mrb[12].mxu1 }
 0x141   :  { %v377_v50 = vpop.f32.mrb[13].mxu0  ;;  %v617_v51 = vpop.f32.mrb[13].mxu1 }
 0x144   :  { %v4865_v53 = vpop.f32.mrb[14].mxu0  ;;  %v4867_v54 = vpop.f32.mrb[14].mxu1 }
 0x145   :  { %v382_v55 = vpop.f32.mrb[15].mxu0  ;;  %v622_v56 = vpop.f32.mrb[15].mxu1 }
 0x146   :  { %v4905_v55 = vpop.permute.xlu1 %1735 }
 0x147   :  { %6442 = vst [vmem:[#allocation30_spill] sm:$0xff] %v4905_v55 }
 0x148   :  { %v4871_v58 = vpop.f32.mrb[16].mxu0  ;;  %v4873_v59 = vpop.f32.mrb[16].mxu1 }
 0x149   :  { %v387_v60 = vpop.f32.mrb[17].mxu0  ;;  %v627_v61 = vpop.f32.mrb[17].mxu1 }
 0x14c   :  { %v4877_v63 = vpop.f32.mrb[18].mxu0  ;;  %v4879_v0 = vpop.f32.mrb[18].mxu1 }
 0x14d   :  { %v392_v1 = vpop.f32.mrb[19].mxu0  ;;  %v632_v2 = vpop.f32.mrb[19].mxu1 }
 0x14e   :  { %v4911_v2 = vpop.permute.xlu0 %1733 }
 0x14f   :  { %6443 = vst [vmem:[#allocation31_spill] sm:$0xff] %v4911_v2 }
 0x150   :  { %v4883_v4 = vpop.f32.mrb[20].mxu0  ;;  %v4885_v5 = vpop.f32.mrb[20].mxu1 }
 0x151   :  { %v397_v6 = vpop.f32.mrb[21].mxu0  ;;  %v637_v7 = vpop.f32.mrb[21].mxu1 }
 0x154   :  { %v4889_v20 = vpop.f32.mrb[22].mxu0  ;;  %v4891_v21 = vpop.f32.mrb[22].mxu1 }
 0x155   :  { %v402_v25 = vpop.f32.mrb[23].mxu0  ;;  %v642_v26 = vpop.f32.mrb[23].mxu1 }
 0x156   :  { %v4920_v25 = vld [vmem:[%s6293_s3] ss:$0 sm:$0xff] }
 0x157   :  { %v361_v3 = vadd.f32 %v4920_v25, %v4841_v33 }
 0x158   :  { %v4895_v31 = vpop.f32.mrb[24].mxu0  ;;  %v4897_v35 = vpop.f32.mrb[24].mxu1 }
 0x159   :  { %v407_v36 = vpop.f32.mrb[25].mxu0  ;;  %v647_v40 = vpop.f32.mrb[25].mxu1 }
 0x15a   :  { %v351_v40 = vadd.f32 %v4920_v25, %v4829_v23  ;;  %v356_v23 = vadd.f32 %v4920_v25, %v4835_v28 }
 0x15c   :  { %v4901_v45 = vpop.f32.mrb[26].mxu0  ;;  %v4903_v46 = vpop.f32.mrb[26].mxu1 }
 0x15d   :  { %v412_v50 = vpop.f32.mrb[27].mxu0  ;;  %v652_v51 = vpop.f32.mrb[27].mxu1 }
 0x15e   :  { %v4924_v50 = vpop.permute.xlu1 %1739  ;;  %v346_v51 = vadd.f32 %v4920_v25, %v4823_v18 }
 0x15f   :  { %6444 = vst [vmem:[#allocation32_spill] sm:$0xff] %v4924_v50 }
 0x160   :  { %v4907_v56 = vpop.f32.mrb[28].mxu0  ;;  %v4909_v60 = vpop.f32.mrb[28].mxu1 }
 0x161   :  { %v417_v61 = vpop.f32.mrb[29].mxu0  ;;  %v657_v1 = vpop.f32.mrb[29].mxu1 }
 0x164   :  { %v4913_v6 = vpop.f32.mrb[30].mxu0  ;;  %v4915_v7 = vpop.f32.mrb[30].mxu1 }
 0x165   :  { %v422_v26 = vpop.f32.mrb[31].mxu0  ;;  %v662_v36 = vpop.f32.mrb[31].mxu1 }
 0x166   :  { %v4932_v36 = vpop.permute.xlu0 %1737 }
 0x167   :  { %6445 = vst [vmem:[#allocation33_spill] sm:$0xff] %v4932_v36 }
 0x168   :  { %v4928_v61 = vpop.f32.mrb[32].mxu0  ;;  %v3679_v1 = vpop.f32.mrb[32].mxu1 }
 0x169   :  { %v736_v55 = vadd.f32 %v3679_v1, %v351_v40  ;;  %v427_v2 = vpop.f32.mrb[33].mxu0  ;;  %v730_v30 = vpop.f32.mrb[33].mxu1 }
 0x16a   :  { %v731_v41 = vadd.f32 %v730_v30, %v346_v51  ;;  %v371_v30 = vadd.f32 %v4920_v25, %v4853_v43  ;;  %v366_v51 = vadd.f32 %v4920_v25, %v4847_v38 }
 0x16b   :  { %v3438_v26 = vmul.f32 -1.442695, %v736_v55  ;;  %v4940_v55 = vpop.permute.xlu1 %1743 }
 0x16c   :  { %v3437_v50 = vmul.f32 -1.442695, %v731_v41  ;;  %v4936_v8 = vpop.f32.mrb[34].mxu0  ;;  %v3682_v18 = vpop.f32.mrb[34].mxu1  ;;  %6446 = vst [vmem:[#allocation34_spill] sm:$0xff] %v4940_v55 }
 0x16d   :  { %3894 = vpow2.f32 %v3438_v26  ;;  %v746_v57 = vadd.f32 %v3682_v18, %v361_v3  ;;  %v432_v62 = vpop.f32.mrb[35].mxu0  ;;  %v740_v40 = vpop.f32.mrb[35].mxu1  ;;  %v376_v18 = vadd.f32 %v4920_v25, %v4859_v48  ;;  %v386_v48 = vadd.f32 %v4920_v25, %v4871_v58 }
 0x16e   :  { %3896 = vpow2.f32 %v3437_v50  ;;  %v741_v2 = vadd.f32 %v740_v40, %v356_v23  ;;  %v381_v23 = vadd.f32 %v4920_v25, %v4865_v53  ;;  %v391_v53 = vadd.f32 %v4920_v25, %v4877_v63 }
 0x16f   :  { %v3440_v33 = vmul.f32 -1.442695, %v746_v57  ;;  %v4948_v57 = vpop.permute.xlu0 %1741 }
 0x170   :  { %v3439_v28 = vmul.f32 -1.442695, %v741_v2  ;;  %v4944_v41 = vpop.f32.mrb[36].mxu0  ;;  %v3685_v1 = vpop.f32.mrb[36].mxu1  ;;  %6447 = vst [vmem:[#allocation35_spill] sm:$0xff] %v4948_v57 }
 0x171   :  { %3898 = vpow2.f32 %v3440_v33  ;;  %v756_v26 = vadd.f32 %v3685_v1, %v371_v30  ;;  %v437_v3 = vpop.f32.mrb[37].mxu0  ;;  %v750_v62 = vpop.f32.mrb[37].mxu1 }
 0x172   :  { %3900 = vpow2.f32 %v3439_v28  ;;  %v751_v50 = vadd.f32 %v750_v62, %v366_v51  ;;  %v4956_v3 = vpop.permute.xlu1 %1747 }
 0x173   :  { %v3442_v43 = vmul.f32 -1.442695, %v756_v26  ;;  %6448 = vst [vmem:[#allocation36_spill] sm:$0xff] %v4956_v3  ;;  %v4964_v3 = vpop.permute.xlu0 %1745 }
 0x174   :  { %v3441_v38 = vmul.f32 -1.442695, %v751_v50  ;;  %v4952_v40 = vpop.f32.mrb[38].mxu0  ;;  %v3688_v2 = vpop.f32.mrb[38].mxu1  ;;  %6449 = vst [vmem:[#allocation37_spill] sm:$0xff] %v4964_v3 }
 0x175   :  { %3902 = vpow2.f32 %v3442_v43  ;;  %v766_v33 = vadd.f32 %v3688_v2, %v381_v23  ;;  %v442_v30 = vpop.f32.mrb[39].mxu0  ;;  %v760_v1 = vpop.f32.mrb[39].mxu1  ;;  %v441_v3 = vadd.f32 %v4920_v25, %v4952_v40 }
 0x176   :  { %3904 = vpow2.f32 %v3441_v38  ;;  %v761_v28 = vadd.f32 %v760_v1, %v376_v18 }
 0x177   :  { %v3895_v51 = vpop.eup %3894  ;;  %v3444_v26 = vmul.f32 -1.442695, %v766_v33  ;;  %v401_v33 = vadd.f32 %v4920_v25, %v4889_v20 }
 0x178   :  { %v3897_v62 = vpop.eup %3896  ;;  %v1242_v50 = vadd.f32 1.0, %v3895_v51  ;;  %v3443_v55 = vmul.f32 -1.442695, %v761_v28  ;;  %v4960_v57 = vpop.f32.mrb[40].mxu0  ;;  %v396_v28 = vadd.f32 %v4920_v25, %v4883_v4 }
 0x179   :  { %v3691_v23 = vpop.f32.mrb[40].mxu1  ;;  %v1241_v43 = vadd.f32 1.0, %v3897_v62  ;;  %3906 = vpow2.f32 %v3444_v26  ;;  %v447_v18 = vpop.f32.mrb[41].mxu0 }
 0x17a   :  { %v776_v38 = vadd.f32 %v3691_v23, %v391_v53  ;;  %v770_v2 = vpop.f32.mrb[41].mxu1  ;;  %3908 = vrcp.f32 %v1242_v50  ;;  %v4972_v4 = vpop.permute.xlu1 %1751 }
 0x17b   :  { %v771_v30 = vadd.f32 %v770_v2, %v386_v48  ;;  %v3899_v63 = vpop.eup %3898  ;;  %3910 = vrcp.f32 %v1241_v43  ;;  %6450 = vst [vmem:[#allocation38_spill] sm:$0xff] %v4972_v4 }
 0x17c   :  { %v3446_v1 = vmul.f32 -1.442695, %v776_v38  ;;  %v3901_v58 = vpop.eup %3900  ;;  %v1244_v51 = vadd.f32 1.0, %v3899_v63  ;;  %3912 = vpow2.f32 %v3443_v55  ;;  %v4968_v53 = vpop.f32.mrb[42].mxu0  ;;  %v411_v38 = vadd.f32 %v4920_v25, %v4901_v45 }
 0x17d   :  { %v3445_v26 = vmul.f32 -1.442695, %v771_v30  ;;  %v3694_v62 = vpop.f32.mrb[42].mxu1  ;;  %v1243_v50 = vadd.f32 1.0, %v3901_v58  ;;  %v452_v23 = vpop.f32.mrb[43].mxu0  ;;  %v406_v30 = vadd.f32 %v4920_v25, %v4895_v31 }
 0x17e   :  { %3914 = vpow2.f32 %v3446_v1  ;;  %v786_v48 = vadd.f32 %v3694_v62, %v401_v33  ;;  %v780_v18 = vpop.f32.mrb[43].mxu1  ;;  %v4980_v31 = vpop.permute.xlu0 %1749 }
 0x17f   :  { %3916 = vrcp.f32 %v1244_v51  ;;  %v781_v20 = vadd.f32 %v780_v18, %v396_v28  ;;  %v3903_v43 = vpop.eup %3902  ;;  %6451 = vst [vmem:[#allocation39_spill] sm:$0xff] %v4980_v31  ;;  %v4994_v4 = vpop.permute.xlu1 %1755 }
 0x180   :  { %3918 = vrcp.f32 %v1243_v50  ;;  %v3448_v2 = vmul.f32 -1.442695, %v786_v48  ;;  %v3905_v55 = vpop.eup %3904  ;;  %v1246_v63 = vadd.f32 1.0, %v3903_v43  ;;  %v4976_v33 = vpop.f32.mrb[44].mxu0  ;;  %v421_v48 = vadd.f32 %v4920_v25, %v4913_v6  ;;  %6454 = vst [vmem:[#allocation42_spill] sm:$0xff] %v4994_v4 }
 0x181   :  { %3920 = vpow2.f32 %v3445_v26  ;;  %v3447_v1 = vmul.f32 -1.442695, %v781_v20  ;;  %v3697_v58 = vpop.f32.mrb[44].mxu1  ;;  %v1245_v51 = vadd.f32 1.0, %v3905_v55  ;;  %v457_v62 = vpop.f32.mrb[45].mxu0  ;;  %v416_v20 = vadd.f32 %v4920_v25, %v4907_v56 }
 0x182   :  { %3922 = vpow2.f32 %v3448_v2  ;;  %v796_v28 = vadd.f32 %v3697_v58, %v411_v38  ;;  %v790_v23 = vpop.f32.mrb[45].mxu1 }
 0x183   :  { %3924 = vrcp.f32 %v1246_v63  ;;  %v791_v45 = vadd.f32 %v790_v23, %v406_v30  ;;  %v3907_v50 = vpop.eup %3906  ;;  %v5020_v52 = vpop.permute.xlu1 %1759 }
 0x184   :  { %3926 = vrcp.f32 %v1245_v51  ;;  %v3450_v18 = vmul.f32 -1.442695, %v796_v28  ;;  %v4982_v26 = vpop.eup %3908  ;;  %v1248_v43 = vadd.f32 1.0, %v3907_v50  ;;  %v4986_v2 = vpop.f32.mrb[46].mxu0  ;;  %v431_v28 = vadd.f32 %v4920_v25, %v4936_v8  ;;  %6457 = vst [vmem:[#allocation45_spill] sm:$0xff] %v5020_v52 }
 0x185   :  { %6452 = vst [vmem:[#allocation40_spill] sm:$0xff] %v4982_v26  ;;  %3928 = vpow2.f32 %v3447_v1  ;;  %v3449_v38 = vmul.f32 -1.442695, %v791_v45  ;;  %v3700_v55 = vpop.f32.mrb[46].mxu1  ;;  %v4988_v30 = vpop.eup %3910  ;;  %v1434_v56 = vmul.f32 2.0, %v4982_v26 }
 0x186   :  { %6453 = vst [vmem:[#allocation41_spill] sm:$0xff] %v4988_v30  ;;  %3930 = vpow2.f32 %v3450_v18  ;;  %v806_v63 = vadd.f32 %v3700_v55, %v421_v48  ;;  %v462_v6 = vpop.f32.mrb[47].mxu0  ;;  %v800_v58 = vpop.f32.mrb[47].mxu1  ;;  %v1433_v50 = vmul.f32 2.0, %v4988_v30  ;;  %v426_v48 = vadd.f32 %v4920_v25, %v4928_v61 }
 0x187   :  { %v3913_v51 = vpop.eup %3912  ;;  %3932 = vrcp.f32 %v1248_v43  ;;  %v801_v62 = vadd.f32 %v800_v58, %v416_v20  ;;  %v3502_v43 = vadd.f32 -1.0, %v1434_v56  ;;  %v5047_v27 = vpop.permute.xlu1 %1763 }
 0x188   :  { %v3915_v23 = vpop.eup %3914  ;;  %v1247_v1 = vadd.f32 1.0, %v3913_v51  ;;  %3934 = vpow2.f32 %v3449_v38  ;;  %v3452_v45 = vmul.f32 -1.442695, %v806_v63  ;;  %v5000_v8 = vpop.f32.mrb[48].mxu0  ;;  %v436_v38 = vadd.f32 %v4920_v25, %v4944_v41  ;;  %6459 = vst [vmem:[#allocation47_spill] sm:$0xff] %v5047_v27 }
 0x189   :  { %v4996_v18 = vpop.eup %3916  ;;  %v1250_v55 = vadd.f32 1.0, %v3915_v23  ;;  %v3451_v6 = vmul.f32 -1.442695, %v801_v62  ;;  %v3703_v20 = vpop.f32.mrb[48].mxu1  ;;  %2011 = vrot.lane.b32.xlu1 %v3502_v43, %s4331_s18  ;;  %v3501_v62 = vadd.f32 -1.0, %v1433_v50 }
 0x18a   :  { %6455 = vst [vmem:[#allocation43_spill] sm:$0xff] %v4996_v18  ;;  %v5002_v58 = vpop.eup %3918  ;;  %3936 = vrcp.f32 %v1247_v1  ;;  %v816_v63 = vadd.f32 %v3703_v20, %v431_v28  ;;  %v467_v51 = vpop.f32.mrb[49].mxu0  ;;  %v1436_v47 = vmul.f32 2.0, %v4996_v18 }
 0x18b   :  { %v810_v4 = vpop.f32.mrb[49].mxu1  ;;  %v3921_v31 = vpop.eup %3920  ;;  %3938 = vrcp.f32 %v1250_v55  ;;  %2009 = vrot.lane.b32.xlu0 %v3501_v62, %s4331_s18 }
 0x18c   :  { %v811_v61 = vadd.f32 %v810_v4, %v426_v48  ;;  %v3923_v23 = vpop.eup %3922  ;;  %v1249_v56 = vadd.f32 1.0, %v3921_v31  ;;  %3940 = vpow2.f32 %v3452_v45  ;;  %v3454_v36 = vmul.f32 -1.442695, %v816_v63  ;;  %v5010_v41 = vpop.permute.xlu0 %1753 }
 0x18d   :  { %6456 = vst [vmem:[#allocation44_spill] sm:$0xff] %v5010_v41  ;;  %v5012_v28 = vpop.eup %3924  ;;  %v1252_v1 = vadd.f32 1.0, %v3923_v23  ;;  %3942 = vpow2.f32 %v3451_v6  ;;  %v470_v40 = vpop.f32.mrb[50].mxu0  ;;  %v1435_v48 = vmul.f32 2.0, %v5002_v58  ;;  %v451_v63 = vadd.f32 %v4920_v25, %v4968_v53 }
 0x18e   :  { %v3453_v20 = vmul.f32 -1.442695, %v811_v61  ;;  %v3706_v4 = vpop.f32.mrb[50].mxu1  ;;  %v5016_v50 = vpop.eup %3926  ;;  %3944 = vrcp.f32 %v1249_v56  ;;  %v3504_v6 = vadd.f32 -1.0, %v1436_v47  ;;  %v1438_v47 = vmul.f32 2.0, %v5012_v28 }
 0x18f   :  { %v826_v31 = vadd.f32 %v3706_v4, %v441_v3  ;;  %v472_v45 = vpop.f32.mrb[51].mxu0  ;;  %v820_v55 = vpop.f32.mrb[51].mxu1  ;;  %3946 = vrcp.f32 %v1252_v1  ;;  %v3503_v41 = vadd.f32 -1.0, %v1435_v48  ;;  %v446_v3 = vadd.f32 %v4920_v25, %v4960_v57 }
 0x190   :  { %v3929_v43 = vpop.eup %3928  ;;  %v821_v51 = vadd.f32 %v820_v55, %v436_v38  ;;  %3948 = vpow2.f32 %v3454_v36  ;;  %2015 = vrot.lane.b32.xlu1 %v3504_v6, %s4331_s18  ;;  %v475_v53 = vpop.f32.mrb[52].mxu0  ;;  %v456_v36 = vadd.f32 %v4920_v25, %v4976_v33  ;;  %v3506_v55 = vadd.f32 -1.0, %v1438_v47 }
 0x191   :  { %v3931_v61 = vpop.eup %3930  ;;  %v1251_v23 = vadd.f32 1.0, %v3929_v43  ;;  %v3456_v62 = vmul.f32 -1.442695, %v826_v31  ;;  %3950 = vpow2.f32 %v3453_v20  ;;  %v3709_v1 = vpop.f32.mrb[52].mxu1  ;;  %2013 = vrot.lane.b32.xlu0 %v3503_v41, %s4331_s18  ;;  %v461_v41 = vadd.f32 %v4920_v25, %v4986_v2 }
 0x192   :  { %v5022_v37 = vpop.eup %3932  ;;  %v1254_v56 = vadd.f32 1.0, %v3931_v61  ;;  %v3455_v4 = vmul.f32 -1.442695, %v821_v51  ;;  %v836_v48 = vadd.f32 %v3709_v1, %v451_v63  ;;  %v477_v31 = vpop.f32.mrb[53].mxu0  ;;  %v1437_v61 = vmul.f32 2.0, %v5016_v50 }
 0x193   :  { %v3935_v38 = vpop.eup %3934  ;;  %3952 = vrcp.f32 %v1251_v23  ;;  %v830_v45 = vpop.f32.mrb[53].mxu1  ;;  %v1440_v23 = vmul.f32 2.0, %v5022_v37  ;;  %v471_v1 = vadd.f32 %v4920_v25, %v470_v40 }
 0x194   :  { %3954 = vrcp.f32 %v1254_v56  ;;  %v1253_v57 = vadd.f32 1.0, %v3935_v38  ;;  %v831_v20 = vadd.f32 %v830_v45, %v446_v3  ;;  %v5031_v43 = vpop.eup %3936  ;;  %v3458_v6 = vmul.f32 -1.442695, %v836_v48  ;;  %v5035_v52 = vpop.permute.xlu0 %1757  ;;  %2019 = vrot.lane.b32.xlu1 %v3506_v55, %s4331_s18 }
 0x195   :  { %3956 = vpow2.f32 %v3456_v62  ;;  %6458 = vst [vmem:[#allocation46_spill] sm:$0xff] %v5035_v52  ;;  %v5037_v33 = vpop.eup %3938  ;;  %v480_v51 = vpop.f32.mrb[54].mxu0  ;;  %v1439_v62 = vmul.f32 2.0, %v5031_v43  ;;  %v3505_v47 = vadd.f32 -1.0, %v1437_v61  ;;  %v3508_v55 = vadd.f32 -1.0, %v1440_v23 }
 0x196   :  { %3958 = vrcp.f32 %v1253_v57  ;;  %v3457_v63 = vmul.f32 -1.442695, %v831_v20  ;;  %v3712_v3 = vpop.f32.mrb[54].mxu1  ;;  %v3941_v56 = vpop.eup %3940 }
 0x197   :  { %3960 = vpow2.f32 %v3455_v4  ;;  %v482_v38 = vpop.f32.mrb[55].mxu0  ;;  %v840_v48 = vpop.f32.mrb[55].mxu1  ;;  %v1256_v45 = vadd.f32 1.0, %v3941_v56  ;;  %v846_v57 = vadd.f32 %v3712_v3, %v461_v41  ;;  %2017 = vrot.lane.b32.xlu0 %v3505_v47, %s4331_s18  ;;  %v3507_v42 = vadd.f32 -1.0, %v1439_v62 }
 0x198   :  { %v3943_v31 = vpop.eup %3942  ;;  %3962 = vpow2.f32 %v3458_v6  ;;  %v841_v52 = vadd.f32 %v840_v48, %v456_v36  ;;  %v466_v4 = vadd.f32 %v4920_v25, %v5000_v8  ;;  %v485_v41 = vpop.f32.mrb[56].mxu0  ;;  %2023 = vrot.lane.b32.xlu1 %v3508_v55, %s4331_s18 }
 0x199   :  { %v5044_v2 = vpop.eup %3944  ;;  %v1255_v20 = vadd.f32 1.0, %v3943_v31  ;;  %3964 = vpow2.f32 %v3457_v63  ;;  %v3460_v61 = vmul.f32 -1.442695, %v846_v57  ;;  %v3715_v36 = vpop.f32.mrb[56].mxu1  ;;  %v476_v63 = vadd.f32 %v4920_v25, %v475_v53 }
 0x19a   :  { %v5049_v40 = vpop.eup %3946  ;;  %3966 = vrcp.f32 %v1256_v45  ;;  %v3459_v6 = vmul.f32 -1.442695, %v841_v52  ;;  %v856_v23 = vadd.f32 %v3715_v36, %v471_v1  ;;  %v487_v62 = vpop.f32.mrb[57].mxu0  ;;  %v1442_v31 = vmul.f32 2.0, %v5037_v33 }
 0x19b   :  { %v3949_v3 = vpop.eup %3948  ;;  %3968 = vrcp.f32 %v1255_v20  ;;  %v850_v56 = vpop.f32.mrb[57].mxu1  ;;  %2021 = vrot.lane.b32.xlu0 %v3507_v42, %s4331_s18  ;;  %v1441_v57 = vmul.f32 2.0, %v5044_v2  ;;  %v481_v20 = vadd.f32 %v4920_v25, %v480_v51 }
 0x19c   :  { %v3951_v47 = vpop.eup %3950  ;;  %v1258_v38 = vadd.f32 1.0, %v3949_v3  ;;  %3970 = vpow2.f32 %v3460_v61  ;;  %v851_v48 = vadd.f32 %v850_v56, %v466_v4  ;;  %v5056_v8 = vpop.permute.xlu0 %1761  ;;  %v3462_v53 = vmul.f32 -1.442695, %v856_v23 }
 0x19d   :  { %6460 = vst [vmem:[#allocation48_spill] sm:$0xff] %v5056_v8  ;;  %v5058_v52 = vpop.eup %3952  ;;  %v1257_v45 = vadd.f32 1.0, %v3951_v47  ;;  %3972 = vpow2.f32 %v3459_v6  ;;  %v3510_v4 = vadd.f32 -1.0, %v1442_v31  ;;  %v490_v61 = vpop.f32.mrb[58].mxu0  ;;  %v3509_v62 = vadd.f32 -1.0, %v1441_v57 }
 0x19e   :  { %v5062_v1 = vpop.eup %3954  ;;  %3974 = vrcp.f32 %v1258_v38  ;;  %v3461_v55 = vmul.f32 -1.442695, %v851_v48  ;;  %v3718_v36 = vpop.f32.mrb[58].mxu1  ;;  %v491_v51 = vadd.f32 %v4920_v25, %v490_v61  ;;  %v1444_v48 = vmul.f32 2.0, %v5049_v40 }
 0x19f   :  { %v3957_v3 = vpop.eup %3956  ;;  %3976 = vrcp.f32 %v1257_v45  ;;  %v492_v56 = vpop.f32.mrb[59].mxu0  ;;  %2027 = vrot.lane.b32.xlu1 %v3510_v4, %s4331_s18  ;;  %v866_v23 = vadd.f32 %v3718_v36, %v481_v20  ;;  %2025 = vrot.lane.b32.xlu0 %v3509_v62, %s4331_s18  ;;  %v1443_v31 = vmul.f32 2.0, %v5058_v52  ;;  %v486_v36 = vadd.f32 %v4920_v25, %v485_v41 }
 0x1a0   :  { %v860_v47 = vpop.f32.mrb[59].mxu1  ;;  %v5065_v6 = vpop.eup %3958  ;;  %v1260_v42 = vadd.f32 1.0, %v3957_v3  ;;  %3978 = vpow2.f32 %v3462_v53  ;;  %v3512_v62 = vadd.f32 -1.0, %v1444_v48 }
 0x1a1   :  { %v861_v27 = vadd.f32 %v860_v47, %v476_v63  ;;  %v3961_v38 = vpop.eup %3960  ;;  %3980 = vpow2.f32 %v3461_v55  ;;  %v5072_v45 = vpop.permute.xlu1 %1767  ;;  %v3464_v53 = vmul.f32 -1.442695, %v866_v23  ;;  %v3511_v61 = vadd.f32 -1.0, %v1443_v31 }
 0x1a2   :  { %6461 = vst [vmem:[#allocation49_spill] sm:$0xff] %v5072_v45  ;;  %v3963_v57 = vpop.eup %3962  ;;  %3982 = vrcp.f32 %v1260_v42  ;;  %v1259_v3 = vadd.f32 1.0, %v3961_v38  ;;  %v495_v4 = vpop.f32.mrb[60].mxu0  ;;  %v1446_v23 = vmul.f32 2.0, %v5062_v1  ;;  %v1445_v38 = vmul.f32 2.0, %v5065_v6 }
 0x1a3   :  { %v3463_v56 = vmul.f32 -1.442695, %v861_v27  ;;  %v5074_v20 = vpop.permute.xlu0 %1765  ;;  %v3965_v63 = vpop.eup %3964  ;;  %v1262_v55 = vadd.f32 1.0, %v3963_v57  ;;  %2031 = vrot.lane.b32.xlu1 %v3512_v62, %s4331_s18  ;;  %2029 = vrot.lane.b32.xlu0 %v3511_v61, %s4331_s18 }
 0x1a4   :  { %6462 = vst [vmem:[#allocation50_spill] sm:$0xff] %v5074_v20  ;;  %v3721_v47 = vpop.f32.mrb[60].mxu1  ;;  %v497_v8 = vpop.f32.mrb[61].mxu0  ;;  %3984 = vrcp.f32 %v1259_v3  ;;  %v1261_v45 = vadd.f32 1.0, %v3965_v63  ;;  %v3514_v57 = vadd.f32 -1.0, %v1446_v23 }
 0x1a5   :  { %v5077_v32 = vpop.eup %3966  ;;  %v876_v17 = vadd.f32 %v3721_v47, %v491_v51  ;;  %v870_v42 = vpop.f32.mrb[61].mxu1  ;;  %3986 = vrcp.f32 %v1262_v55  ;;  %v496_v8 = vadd.f32 %v4920_v25, %v495_v4  ;;  %v3513_v55 = vadd.f32 -1.0, %v1445_v38 }
 0x1a6   :  { %v5080_v27 = vpop.eup %3968  ;;  %v871_v41 = vadd.f32 %v870_v42, %v486_v36  ;;  %3988 = vrcp.f32 %v1261_v45  ;;  %v500_v51 = vpop.f32.mrb[62].mxu0 }
 0x1a7   :  { %v3971_v48 = vpop.eup %3970  ;;  %v3466_v31 = vmul.f32 -1.442695, %v876_v17  ;;  %v3724_v3 = vpop.f32.mrb[62].mxu1  ;;  %3990 = vpow2.f32 %v3464_v53  ;;  %v501_v61 = vadd.f32 %v4920_v25, %v500_v51  ;;  %2035 = vrot.lane.b32.xlu1 %v3514_v57, %s4331_s18  ;;  %2033 = vrot.lane.b32.xlu0 %v3513_v55, %s4331_s18  ;;  %v1448_v17 = vmul.f32 2.0, %v5077_v32 }
 0x1a8   :  { %v3973_v63 = vpop.eup %3972  ;;  %v1264_v47 = vadd.f32 1.0, %v3971_v48  ;;  %v3465_v20 = vmul.f32 -1.442695, %v871_v41  ;;  %v502_v22 = vpop.f32.mrb[63].mxu0  ;;  %3992 = vpow2.f32 %v3463_v56  ;;  %v1447_v53 = vmul.f32 2.0, %v5080_v27 }
 0x1a9   :  { %v880_v62 = vpop.f32.mrb[63].mxu1  ;;  %v5086_v15 = vpop.eup %3974  ;;  %v1263_v36 = vadd.f32 1.0, %v3973_v63  ;;  %v886_v56 = vadd.f32 %v3724_v3, %v501_v61  ;;  %v3516_v57 = vadd.f32 -1.0, %v1448_v17 }
 0x1aa   :  { %v881_v45 = vadd.f32 %v880_v62, %v496_v8  ;;  %v5089_v42 = vpop.eup %3976  ;;  %3994 = vrcp.f32 %v1264_v47  ;;  %v5095_v22 = vpop.permute.xlu1 %1771  ;;  %v3515_v63 = vadd.f32 -1.0, %v1447_v53  ;;  %v1450_v3 = vmul.f32 2.0, %v5086_v15 }
 0x1ab   :  { %6463 = vst [vmem:[#allocation51_spill] sm:$0xff] %v5095_v22  ;;  %v5097_v4 = vpop.permute.xlu0 %1769  ;;  %v3979_v23 = vpop.eup %3978  ;;  %3996 = vrcp.f32 %v1263_v36  ;;  %v3468_v22 = vmul.f32 -1.442695, %v886_v56  ;;  %2039 = vrot.lane.b32.xlu1 %v3516_v57, %s4331_s18 }
 0x1ac   :  { %6464 = vst [vmem:[#allocation52_spill] sm:$0xff] %v5097_v4  ;;  %v3467_v41 = vmul.f32 -1.442695, %v881_v45  ;;  %v505_v38 = vpop.f32.mrb[64].mxu0  ;;  %v3727_v48 = vpop.f32.mrb[64].mxu1  ;;  %v1266_v51 = vadd.f32 1.0, %v3979_v23  ;;  %3998 = vpow2.f32 %v3466_v31  ;;  %2037 = vrot.lane.b32.xlu0 %v3515_v63, %s4331_s18 }
 0x1ad   :  { %v3981_v8 = vpop.eup %3980  ;;  %v507_v47 = vpop.f32.mrb[65].mxu0  ;;  %4000 = vpow2.f32 %v3465_v20  ;;  %v506_v4 = vadd.f32 %v4920_v25, %v505_v38  ;;  %v1449_v31 = vmul.f32 2.0, %v5089_v42  ;;  %v3518_v23 = vadd.f32 -1.0, %v1450_v3 }
 0x1ae   :  { %v890_v55 = vpop.f32.mrb[65].mxu1  ;;  %v5099_v62 = vpop.eup %3982  ;;  %v1265_v16 = vadd.f32 1.0, %v3981_v8  ;;  %4002 = vrcp.f32 %v1266_v51 }
 0x1af   :  { %6465 = vst [vmem:[#allocation53_spill] sm:$0xff] %v5099_v62  ;;  %v5106_v36 = vpop.eup %3984  ;;  %v891_v61 = vadd.f32 %v890_v55, %v506_v4  ;;  %v510_v45 = vpop.f32.mrb[66].mxu0  ;;  %v1452_v20 = vmul.f32 2.0, %v5099_v62  ;;  %v3517_v56 = vadd.f32 -1.0, %v1449_v31  ;;  %2043 = vrot.lane.b32.xlu1 %v3518_v23, %s4331_s18 }
 0x1b0   :  { %4004 = vrcp.f32 %v1265_v16  ;;  %v5108_v17 = vpop.f32.mrb[66].mxu1  ;;  %v5111_v53 = vpop.eup %3986  ;;  %v511_v63 = vadd.f32 %v4920_v25, %v510_v45  ;;  %v1451_v47 = vmul.f32 2.0, %v5106_v36 }
 0x1b1   :  { %6466 = vst [vmem:[#allocation54_spill] sm:$0xff] %v5111_v53  ;;  %4006 = vpow2.f32 %v3468_v22  ;;  %v512_v38 = vpop.f32.mrb[67].mxu0  ;;  %v900_v8 = vpop.f32.mrb[67].mxu1  ;;  %v3469_v57 = vmul.f32 -1.442695, %v891_v61  ;;  %2041 = vrot.lane.b32.xlu0 %v3517_v56, %s4331_s18  ;;  %v3520_v4 = vadd.f32 -1.0, %v1452_v20 }
 0x1b2   :  { %v5113_v51 = vpop.eup %3988  ;;  %4008 = vpow2.f32 %v3467_v41  ;;  %v1454_v22 = vmul.f32 2.0, %v5111_v53  ;;  %v5120_v55 = vpop.permute.xlu1 %1775  ;;  %v896_v41 = vadd.f32 %v3727_v48, %v511_v63  ;;  %v3519_v56 = vadd.f32 -1.0, %v1451_v47 }
 0x1b3   :  { %6467 = vst [vmem:[#allocation55_spill] sm:$0xff] %v5113_v51  ;;  %v3991_v16 = vpop.eup %3990  ;;  %6468 = vst [vmem:[#allocation56_spill] sm:$0xff] %v5120_v55  ;;  %v5122_v3 = vpop.permute.xlu0 %1773  ;;  %4010 = vpow2.f32 %v3469_v57  ;;  %v1453_v23 = vmul.f32 2.0, %v5113_v51  ;;  %2047 = vrot.lane.b32.xlu1 %v3520_v4, %s4331_s18 }
 0x1b4   :  { %6469 = vst [vmem:[#allocation57_spill] sm:$0xff] %v5122_v3  ;;  %v3993_v31 = vpop.eup %3992  ;;  %v1268_v38 = vadd.f32 1.0, %v3991_v16  ;;  %v515_v61 = vpop.f32.mrb[68].mxu0  ;;  %v3470_v3 = vmul.f32 -1.442695, %v896_v41  ;;  %v3522_v16 = vadd.f32 -1.0, %v1454_v22 }
 0x1b5   :  { %v5124_v45 = vpop.f32.mrb[68].mxu1  ;;  %v5127_v14 = vpop.eup %3994  ;;  %v1267_v20 = vadd.f32 1.0, %v3993_v31  ;;  %v516_v13 = vadd.f32 %v4920_v25, %v515_v61  ;;  %2045 = vrot.lane.b32.xlu0 %v3519_v56, %s4331_s18  ;;  %v3521_v63 = vadd.f32 -1.0, %v1453_v23 }
 0x1b6   :  { %6470 = vst [vmem:[#allocation58_spill] sm:$0xff] %v5127_v14  ;;  %v517_v11 = vpop.f32.mrb[69].mxu0  ;;  %v910_v9 = vpop.f32.mrb[69].mxu1  ;;  %4012 = vrcp.f32 %v1268_v38  ;;  %v1456_v31 = vmul.f32 2.0, %v5127_v14 }
 0x1b7   :  { %v5130_v55 = vpop.eup %3996  ;;  %4014 = vrcp.f32 %v1267_v20  ;;  %v901_v48 = vadd.f32 %v900_v8, %v516_v13  ;;  %v520_v11 = vpop.f32.mrb[70].mxu0  ;;  %2051 = vrot.lane.b32.xlu1 %v3522_v16, %s4331_s18 }
 0x1b8   :  { %6471 = vst [vmem:[#allocation59_spill] sm:$0xff] %v5130_v55  ;;  %v3999_v57 = vpop.eup %3998  ;;  %4016 = vpow2.f32 %v3470_v3  ;;  %v5135_v61 = vpop.f32.mrb[70].mxu1  ;;  %v1455_v38 = vmul.f32 2.0, %v5130_v55  ;;  %v521_v4 = vadd.f32 %v4920_v25, %v520_v11  ;;  %v3524_v8 = vadd.f32 -1.0, %v1456_v31 }
 0x1b9   :  { %v4001_v47 = vpop.eup %4000  ;;  %v1270_v12 = vadd.f32 1.0, %v3999_v57  ;;  %v3471_v20 = vmul.f32 -1.442695, %v901_v48  ;;  %v522_v10 = vpop.f32.mrb[71].mxu0  ;;  %2049 = vrot.lane.b32.xlu0 %v3521_v63, %s4331_s18 }
 0x1ba   :  { %v5138_v41 = vpop.eup %4002  ;;  %v1269_v22 = vadd.f32 1.0, %v4001_v47  ;;  %v5141_v56 = vpop.f32.mrb[71].mxu1  ;;  %v906_v57 = vadd.f32 %v5108_v17, %v521_v4  ;;  %v3523_v48 = vadd.f32 -1.0, %v1455_v38 }
 0x1bb   :  { %6472 = vst [vmem:[#allocation60_spill] sm:$0xff] %v5138_v41  ;;  %v5143_v13 = vpop.eup %4004  ;;  %4018 = vrcp.f32 %v1270_v12  ;;  %v1458_v3 = vmul.f32 2.0, %v5138_v41  ;;  %v5150_v10 = vpop.permute.xlu1 %1779  ;;  %2055 = vrot.lane.b32.xlu1 %v3524_v8, %s4331_s18 }
 0x1bc   :  { %6473 = vst [vmem:[#allocation61_spill] sm:$0xff] %v5143_v13  ;;  %v4007_v23 = vpop.eup %4006  ;;  %4020 = vrcp.f32 %v1269_v22  ;;  %v1457_v47 = vmul.f32 2.0, %v5143_v13  ;;  %6474 = vst [vmem:[#allocation62_spill] sm:$0xff] %v5150_v10  ;;  %v5152_v11 = vpop.permute.xlu0 %1777  ;;  %v3472_v55 = vmul.f32 -1.442695, %v906_v57 }
 0x1bd   :  { %6475 = vst [vmem:[#allocation63_spill] sm:$0xff] %v5152_v11  ;;  %v4009_v14 = vpop.eup %4008  ;;  %v1272_v12 = vadd.f32 1.0, %v4007_v23  ;;  %4022 = vpow2.f32 %v3471_v20  ;;  %v525_v31 = vpop.f32.mrb[72].mxu0  ;;  %v3526_v38 = vadd.f32 -1.0, %v1458_v3  ;;  %2053 = vrot.lane.b32.xlu0 %v3523_v48, %s4331_s18 }
 0x1be   :  { %v5154_v41 = vpop.f32.mrb[72].mxu1  ;;  %v1271_v22 = vadd.f32 1.0, %v4009_v14  ;;  %v526_v16 = vadd.f32 %v4920_v25, %v525_v31  ;;  %v527_v63 = vpop.f32.mrb[73].mxu0  ;;  %v3525_v23 = vadd.f32 -1.0, %v1457_v47 }
 0x1bf   :  { %v5157_v53 = vpop.f32.mrb[73].mxu1  ;;  %v4011_v17 = vpop.eup %4010  ;;  %4024 = vrcp.f32 %v1272_v12  ;;  %2059 = vrot.lane.b32.xlu1 %v3526_v38, %s4331_s18 }
 0x1c0   :  { %4026 = vrcp.f32 %v1271_v22  ;;  %v1273_v4 = vadd.f32 1.0, %v4011_v17  ;;  %v911_v20 = vadd.f32 %v910_v9, %v526_v16  ;;  %v5161_v10 = vpop.eup %4012  ;;  %v530_v14 = vpop.f32.mrb[74].mxu0 }
 0x1c1   :  { %6476 = vst [vmem:[#allocation64_spill] sm:$0xff] %v5161_v10  ;;  %4028 = vpow2.f32 %v3472_v55  ;;  %v5163_v57 = vpop.f32.mrb[74].mxu1  ;;  %v5165_v31 = vpop.eup %4014  ;;  %v531_v3 = vadd.f32 %v4920_v25, %v530_v14  ;;  %v1460_v48 = vmul.f32 2.0, %v5161_v10  ;;  %2057 = vrot.lane.b32.xlu0 %v3525_v23, %s4331_s18 }
 0x1c2   :  { %6477 = vst [vmem:[#allocation65_spill] sm:$0xff] %v5165_v31  ;;  %4030 = vrcp.f32 %v1273_v4  ;;  %v3473_v63 = vmul.f32 -1.442695, %v911_v20  ;;  %v532_v12 = vpop.f32.mrb[75].mxu0  ;;  %v5168_v22 = vpop.f32.mrb[75].mxu1  ;;  %v1459_v9 = vmul.f32 2.0, %v5165_v31 }
 0x1c3   :  { %v4017_v8 = vpop.eup %4016  ;;  %v916_v55 = vadd.f32 %v5124_v45, %v531_v3  ;;  %v5175_v16 = vpop.permute.xlu1 %1783  ;;  %v3528_v20 = vadd.f32 -1.0, %v1460_v48 }
 0x1c4   :  { %v1274_v47 = vadd.f32 1.0, %v4017_v8  ;;  %4032 = vpow2.f32 %v3473_v63  ;;  %6478 = vst [vmem:[#allocation66_spill] sm:$0xff] %v5175_v16  ;;  %v5177_v17 = vpop.permute.xlu0 %1781  ;;  %v3527_v14 = vadd.f32 -1.0, %v1459_v9  ;;  %v535_v12 = vpop.f32.mrb[76].mxu0 }
 0x1c5   :  { %6479 = vst [vmem:[#allocation67_spill] sm:$0xff] %v5177_v17  ;;  %v5179_v4 = vpop.eup %4018  ;;  %v5181_v11 = vpop.f32.mrb[76].mxu1  ;;  %v3474_v63 = vmul.f32 -1.442695, %v916_v55  ;;  %v536_v38 = vadd.f32 %v4920_v25, %v535_v12  ;;  %2063 = vrot.lane.b32.xlu1 %v3528_v20, %s4331_s18 }
 0x1c6   :  { %6480 = vst [vmem:[#allocation68_spill] sm:$0xff] %v5179_v4  ;;  %v5183_v10 = vpop.eup %4020  ;;  %4034 = vrcp.f32 %v1274_v47  ;;  %v537_v23 = vpop.f32.mrb[77].mxu0  ;;  %v1462_v3 = vmul.f32 2.0, %v5179_v4  ;;  %2061 = vrot.lane.b32.xlu0 %v3527_v14, %s4331_s18 }
 0x1c7   :  { %6481 = vst [vmem:[#allocation69_spill] sm:$0xff] %v5183_v10  ;;  %v5186_v8 = vpop.f32.mrb[77].mxu1  ;;  %v4023_v45 = vpop.eup %4022  ;;  %v1461_v16 = vmul.f32 2.0, %v5183_v10  ;;  %4036 = vpow2.f32 %v3474_v63  ;;  %v921_v48 = vadd.f32 %v5141_v56, %v536_v38 }
 0x1c8   :  { %v1275_v17 = vadd.f32 1.0, %v4023_v45  ;;  %v3530_v47 = vadd.f32 -1.0, %v1462_v3  ;;  %v540_v12 = vpop.f32.mrb[78].mxu0  ;;  %v5195_v23 = vpop.f32.mrb[78].mxu1 }
 0x1c9   :  { %v5193_v9 = vpop.eup %4024  ;;  %v3529_v55 = vadd.f32 -1.0, %v1461_v16  ;;  %v3475_v4 = vmul.f32 -1.442695, %v921_v48  ;;  %v541_v45 = vadd.f32 %v4920_v25, %v540_v12  ;;  %v542_v63 = vpop.f32.mrb[79].mxu0  ;;  %v591_v16 = vadd.f32 %v4920_v25, %v4831_v24 }
 0x1ca   :  { %6482 = vst [vmem:[#allocation70_spill] sm:$0xff] %v5193_v9  ;;  %v5197_v31 = vpop.eup %4026  ;;  %4038 = vrcp.f32 %v1275_v17  ;;  %v5200_v10 = vpop.f32.mrb[79].mxu1  ;;  %v1464_v56 = vmul.f32 2.0, %v5193_v9  ;;  %2067 = vrot.lane.b32.xlu1 %v3530_v47, %s4331_s18  ;;  %v5218_v63 = vld [vmem:[%s6293_s3] ss:$0 sm:$0xff]  ;;  %s4332_s3 = smov 64  }
 0x1cb   :  { %6483 = vst [vmem:[#allocation71_spill] sm:$0xff] %v5197_v31  ;;  %v4029_v20 = vpop.eup %4028  ;;  %v1463_v14 = vmul.f32 2.0, %v5197_v31  ;;  %4040 = vpow2.f32 %v3475_v4  ;;  %2065 = vrot.lane.b32.xlu0 %v3529_v55, %s4331_s18  ;;  %v926_v17 = vadd.f32 %v5135_v61, %v541_v45  ;;  %v5211_v48 = vpop.permute.xlu1 %1787  ;;  %v586_v24 = vadd.f32 %v5218_v63, %v4825_v19 }
 0x1cc   :  { %v5204_v38 = vpop.eup %4030  ;;  %v1276_v3 = vadd.f32 1.0, %v4029_v20  ;;  %6484 = vst [vmem:[#allocation72_spill] sm:$0xff] %v5211_v48  ;;  %v5213_v12 = vpop.permute.xlu0 %1785  ;;  %v3532_v4 = vadd.f32 -1.0, %v1464_v56  ;;  %v601_v13 = vadd.f32 %v5218_v63, %v4843_v34 }
 0x1cd   :  { %6485 = vst [vmem:[#allocation73_spill] sm:$0xff] %v5213_v12  ;;  %v3531_v25 = vadd.f32 -1.0, %v1463_v14  ;;  %v545_v20 = vpop.f32.mrb[80].mxu0  ;;  %v3751_v47 = vpop.f32.mrb[80].mxu1  ;;  %v1465_v55 = vmul.f32 2.0, %v5204_v38 }
 0x1ce   :  { %v4033_v9 = vpop.eup %4032  ;;  %4042 = vrcp.f32 %v1276_v3  ;;  %v3476_v61 = vmul.f32 -1.442695, %v926_v17  ;;  %v546_v45 = vadd.f32 %v5218_v63, %v545_v20  ;;  %v976_v48 = vadd.f32 %v3751_v47, %v591_v16  ;;  %v970_v12 = vpop.f32.mrb[81].mxu1  ;;  %2071 = vrot.lane.b32.xlu1 %v3532_v4, %s4331_s18 }
 0x1cf   :  { %v547_v31 = vpop.f32.mrb[81].mxu0  ;;  %v1277_v51 = vadd.f32 1.0, %v4033_v9  ;;  %v971_v62 = vadd.f32 %v970_v12, %v586_v24  ;;  %2069 = vrot.lane.b32.xlu0 %v3531_v25, %s4331_s18  ;;  %v3533_v3 = vadd.f32 -1.0, %v1465_v55  ;;  %v596_v16 = vadd.f32 %v5218_v63, %v4837_v29  ;;  %v3754_v34 = vpop.f32.mrb[82].mxu1 }
 0x1d0   :  { %v5226_v19 = vpop.eup %4034  ;;  %4044 = vpow2.f32 %v3476_v61  ;;  %v931_v14 = vadd.f32 %v5157_v53, %v546_v45  ;;  %v3486_v56 = vmul.f32 -1.442695, %v976_v48  ;;  %v550_v17 = vpop.f32.mrb[82].mxu0  ;;  %v986_v20 = vadd.f32 %v3754_v34, %v601_v13 }
 0x1d1   :  { %4046 = vrcp.f32 %v1277_v51  ;;  %v3485_v31 = vmul.f32 -1.442695, %v971_v62  ;;  %v1466_v9 = vmul.f32 2.0, %v5226_v19  ;;  %v4037_v12 = vpop.eup %4036  ;;  %v551_v25 = vadd.f32 %v5218_v63, %v550_v17  ;;  %v980_v4 = vpop.f32.mrb[83].mxu1 }
 0x1d2   :  { %v3477_v24 = vmul.f32 -1.442695, %v931_v14  ;;  %4048 = vpow2.f32 %v3486_v56  ;;  %v552_v47 = vpop.f32.mrb[83].mxu0  ;;  %v1278_v53 = vadd.f32 1.0, %v4037_v12  ;;  %v981_v48 = vadd.f32 %v980_v4, %v596_v16  ;;  %v5241_v45 = vpop.permute.xlu1 %1791 }
 0x1d3   :  { %4050 = vpow2.f32 %v3485_v31  ;;  %v3534_v55 = vadd.f32 -1.0, %v1466_v9  ;;  %v611_v29 = vadd.f32 %v5218_v63, %v4855_v44  ;;  %2073 = vrot.lane.b32.xlu0 %v3533_v3, %s4331_s18  ;;  %v936_v62 = vadd.f32 %v5154_v41, %v551_v25  ;;  %6486 = vst [vmem:[#allocation74_spill] sm:$0xff] %v5241_v45  ;;  %v5243_v13 = vpop.permute.xlu0 %1789  ;;  %v555_v16 = vpop.f32.mrb[84].mxu0 }
 0x1d4   :  { %v5235_v61 = vpop.eup %4038  ;;  %4052 = vpow2.f32 %v3477_v24  ;;  %v3488_v51 = vmul.f32 -1.442695, %v986_v20  ;;  %6487 = vst [vmem:[#allocation75_spill] sm:$0xff] %v5243_v13  ;;  %v606_v14 = vadd.f32 %v5218_v63, %v4849_v39  ;;  %v3487_v56 = vmul.f32 -1.442695, %v981_v48  ;;  %v3757_v31 = vpop.f32.mrb[84].mxu1 }
 0x1d5   :  { %4054 = vrcp.f32 %v1278_v53  ;;  %2075 = vrot.lane.b32.xlu1 %v3534_v55, %s4331_s18  ;;  %v1467_v44 = vmul.f32 2.0, %v5235_v61  ;;  %v4041_v17 = vpop.eup %4040  ;;  %v3478_v3 = vmul.f32 -1.442695, %v936_v62  ;;  %v556_v41 = vadd.f32 %v5218_v63, %v555_v16  ;;  %v990_v9 = vpop.f32.mrb[85].mxu1 }
 0x1d6   :  { %4056 = vpow2.f32 %v3488_v51  ;;  %v996_v34 = vadd.f32 %v3757_v31, %v611_v29  ;;  %v557_v12 = vpop.f32.mrb[85].mxu0  ;;  %v1279_v24 = vadd.f32 1.0, %v4041_v17  ;;  %v991_v25 = vadd.f32 %v990_v9, %v606_v14  ;;  %v3760_v62 = vpop.f32.mrb[86].mxu1 }
 0x1d7   :  { %4058 = vpow2.f32 %v3487_v56  ;;  %v3535_v39 = vadd.f32 -1.0, %v1467_v44  ;;  %v621_v4 = vadd.f32 %v5218_v63, %v4867_v54  ;;  %v941_v47 = vadd.f32 %v5168_v22, %v556_v41  ;;  %v560_v29 = vpop.f32.mrb[86].mxu0  ;;  %v1000_v31 = vpop.f32.mrb[87].mxu1 }
 0x1d8   :  { %v5250_v20 = vpop.eup %4042  ;;  %4060 = vpow2.f32 %v3478_v3  ;;  %v3490_v53 = vmul.f32 -1.442695, %v996_v34  ;;  %v616_v48 = vadd.f32 %v5218_v63, %v4861_v49  ;;  %v3489_v55 = vmul.f32 -1.442695, %v991_v25  ;;  %v562_v44 = vpop.f32.mrb[87].mxu0 }
 0x1d9   :  { %2077 = vrot.lane.b32.xlu0 %v3535_v39, %s4331_s18  ;;  %v1468_v51 = vmul.f32 2.0, %v5250_v20  ;;  %4062 = vrcp.f32 %v1279_v24  ;;  %v3479_v56 = vmul.f32 -1.442695, %v941_v47  ;;  %v561_v16 = vadd.f32 %v5218_v63, %v560_v29  ;;  %v5262_v41 = vpop.permute.xlu1 %1795  ;;  %v5267_v25 = vpop.permute.xlu0 %1793 }
 0x1da   :  { %v4045_v14 = vpop.eup %4044  ;;  %v1006_v54 = vadd.f32 %v3760_v62, %v621_v4  ;;  %4064 = vpow2.f32 %v3489_v55  ;;  %v1001_v49 = vadd.f32 %v1000_v31, %v616_v48  ;;  %6488 = vst [vmem:[#allocation76_spill] sm:$0xff] %v5262_v41  ;;  %v626_v9 = vadd.f32 %v5218_v63, %v4873_v59  ;;  %6489 = vst [vmem:[#allocation77_spill] sm:$0xff] %v5267_v25  ;;  %v565_v48 = vpop.f32.mrb[88].mxu0 }
 0x1db   :  { %v5260_v22 = vpop.eup %4046  ;;  %v1280_v17 = vadd.f32 1.0, %v4045_v14  ;;  %v3536_v3 = vadd.f32 -1.0, %v1468_v51  ;;  %v946_v12 = vadd.f32 %v5163_v57, %v561_v16  ;;  %v631_v4 = vadd.f32 %v5218_v63, %v4879_v0  ;;  %v3763_v55 = vpop.f32.mrb[88].mxu1 }
 0x1dc   :  { %v4049_v34 = vpop.eup %4048  ;;  %v3492_v24 = vmul.f32 -1.442695, %v1006_v54  ;;  %4066 = vpow2.f32 %v3490_v53  ;;  %v1469_v29 = vmul.f32 2.0, %v5260_v22  ;;  %v566_v59 = vadd.f32 %v5218_v63, %v565_v48  ;;  %v1010_v57 = vpop.f32.mrb[89].mxu1 }
 0x1dd   :  { %v4051_v39 = vpop.eup %4050  ;;  %v1290_v47 = vadd.f32 1.0, %v4049_v34  ;;  %2079 = vrot.lane.b32.xlu1 %v3536_v3, %s4331_s18  ;;  %4068 = vpow2.f32 %v3479_v56  ;;  %v567_v14 = vpop.f32.mrb[89].mxu0  ;;  %v1016_v0 = vadd.f32 %v3763_v55, %v631_v4  ;;  %v1011_v31 = vadd.f32 %v1010_v57, %v626_v9 }
 0x1de   :  { %v4053_v62 = vpop.eup %4052  ;;  %v1289_v51 = vadd.f32 1.0, %v4051_v39  ;;  %4070 = vrcp.f32 %v1280_v17  ;;  %v3480_v44 = vmul.f32 -1.442695, %v946_v12  ;;  %v951_v3 = vadd.f32 %v5186_v8, %v566_v59  ;;  %v570_v48 = vpop.f32.mrb[90].mxu0 }
 0x1df   :  { %v5274_v16 = vpop.eup %4054  ;;  %v1281_v54 = vadd.f32 1.0, %v4053_v62  ;;  %4072 = vpow2.f32 %v3492_v24  ;;  %v3537_v34 = vadd.f32 -1.0, %v1469_v29  ;;  %v641_v56 = vadd.f32 %v5218_v63, %v4891_v21  ;;  %v5279_v14 = vpop.permute.xlu1 %1799 }
 0x1e0   :  { %v4057_v53 = vpop.eup %4056  ;;  %4074 = vrcp.f32 %v1290_v47  ;;  %6490 = vst [vmem:[#allocation78_spill] sm:$0xff] %v5279_v14  ;;  %v636_v17 = vadd.f32 %v5218_v63, %v4885_v5  ;;  %v3491_v9 = vmul.f32 -1.442695, %v1001_v49  ;;  %v571_v8 = vadd.f32 %v5218_v63, %v570_v48  ;;  %v3766_v12 = vpop.f32.mrb[90].mxu1 }
 0x1e1   :  { %v4059_v41 = vpop.eup %4058  ;;  %v1292_v39 = vadd.f32 1.0, %v4057_v53  ;;  %4076 = vrcp.f32 %v1289_v51  ;;  %2081 = vrot.lane.b32.xlu0 %v3537_v34, %s4331_s18  ;;  %v572_v24 = vpop.f32.mrb[91].mxu0  ;;  %v1026_v4 = vadd.f32 %v3766_v12, %v641_v56  ;;  %v1470_v47 = vmul.f32 2.0, %v5274_v16 }
 0x1e2   :  { %v4061_v25 = vpop.eup %4060  ;;  %4078 = vrcp.f32 %v1281_v54  ;;  %v1020_v21 = vpop.f32.mrb[91].mxu1  ;;  %v1291_v29 = vadd.f32 1.0, %v4059_v41  ;;  %v5289_v62 = vadd.f32 %v5181_v11, %v571_v8  ;;  %v651_v59 = vadd.f32 %v5218_v63, %v4903_v46 }
 0x1e3   :  { %v5286_v55 = vpop.eup %4062  ;;  %4080 = vpow2.f32 %v3480_v44  ;;  %v1021_v5 = vadd.f32 %v1020_v21, %v636_v17  ;;  %v5291_v49 = vpop.permute.xlu0 %1797  ;;  %v1282_v57 = vadd.f32 1.0, %v4061_v25  ;;  %v3538_v54 = vadd.f32 -1.0, %v1470_v47 }
 0x1e4   :  { %6491 = vst [vmem:[#allocation79_spill] sm:$0xff] %v5291_v49  ;;  %v4065_v51 = vpop.eup %4064  ;;  %4082 = vrcp.f32 %v1292_v39  ;;  %v575_v53 = vpop.f32.mrb[92].mxu0  ;;  %v646_v56 = vadd.f32 %v5218_v63, %v4897_v35  ;;  %v3481_v48 = vmul.f32 -1.442695, %v951_v3  ;;  %v3494_v25 = vmul.f32 -1.442695, %v1016_v0 }
 0x1e5   :  { %v3769_v34 = vpop.f32.mrb[92].mxu1  ;;  %v1293_v41 = vadd.f32 1.0, %v4065_v51  ;;  %4084 = vpow2.f32 %v3491_v9  ;;  %2083 = vrot.lane.b32.xlu1 %v3538_v54, %s4331_s18  ;;  %v576_v17 = vadd.f32 %v5218_v63, %v575_v53  ;;  %v577_v12 = vpop.f32.mrb[93].mxu0  ;;  %v1471_v24 = vmul.f32 2.0, %v5286_v55 }
 0x1e6   :  { %v1030_v44 = vpop.f32.mrb[93].mxu1  ;;  %v4067_v11 = vpop.eup %4066  ;;  %v1036_v8 = vadd.f32 %v3769_v34, %v651_v59  ;;  %4086 = vrcp.f32 %v1291_v29  ;;  %v656_v9 = vadd.f32 %v5218_v63, %v4909_v60  ;;  %v3493_v3 = vmul.f32 -1.442695, %v1011_v31 }
 0x1e7   :  { %v4069_v46 = vpop.eup %4068  ;;  %v1031_v39 = vadd.f32 %v1030_v44, %v646_v56  ;;  %v5300_v21 = vpop.permute.xlu1 %1803  ;;  %4088 = vrcp.f32 %v1282_v57  ;;  %v5307_v47 = vadd.f32 %v5200_v10, %v576_v17  ;;  %v661_v0 = vadd.f32 %v5218_v63, %v4915_v7 }
 0x1e8   :  { %6492 = vst [vmem:[#allocation80_spill] sm:$0xff] %v5300_v21  ;;  %v5302_v35 = vpop.eup %4070  ;;  %v580_v51 = vpop.f32.mrb[94].mxu0  ;;  %v1294_v29 = vadd.f32 1.0, %v4067_v11  ;;  %4090 = vrcp.f32 %v1293_v41  ;;  %v3539_v53 = vadd.f32 -1.0, %v1471_v24  ;;  %v1283_v12 = vadd.f32 1.0, %v4069_v46 }
 0x1e9   :  { %v3772_v59 = vpop.f32.mrb[94].mxu1  ;;  %v4073_v54 = vpop.eup %4072  ;;  %4092 = vpow2.f32 %v3481_v48  ;;  %v581_v60 = vadd.f32 %v5218_v63, %v580_v51  ;;  %v3496_v57 = vmul.f32 -1.442695, %v1026_v4  ;;  %v3495_v17 = vmul.f32 -1.442695, %v1021_v5 }
 0x1ea   :  { %v1040_v34 = vpop.f32.mrb[95].mxu1  ;;  %v582_v56 = vpop.f32.mrb[95].mxu0  ;;  %4094 = vpow2.f32 %v3494_v25  ;;  %2085 = vrot.lane.b32.xlu0 %v3539_v53, %s4331_s18  ;;  %v5319_v7 = vadd.f32 %v3772_v59, %v661_v0  ;;  %v1472_v63 = vmul.f32 2.0, %v5302_v35  ;;  %v1296_v24 = vadd.f32 1.0, %v4073_v54 }
 0x1eb   :  { %v5311_v44 = vpop.eup %4074  ;;  %v5314_v31 = vpop.permute.xlu0 %1801  ;;  %v5321_v41 = vadd.f32 %v1040_v34, %v656_v9  ;;  %4096 = vpow2.f32 %v3493_v3  ;;  %v5326_v48 = vadd.f32 %v5195_v23, %v581_v60  ;;  %v3482_v59 = vmul.f32 -1.442695, %v5289_v62 }
 0x1ec   :  { %6493 = vst [vmem:[#allocation81_spill] sm:$0xff] %v5314_v31  ;;  %v5316_v10 = vpop.eup %4076  ;;  %4098 = vrcp.f32 %v1294_v29  ;;  %v3540_v4 = vadd.f32 -1.0, %v1472_v63  ;;  %v5331_v51 = vpop.permute.xlu1 %1807  ;;  %v1482_v23 = vmul.f32 2.0, %v5311_v44  ;;  %v3498_v62 = vmul.f32 -1.442695, %v1036_v8 }
 0x1ed   :  { %v5323_v11 = vpop.eup %4078  ;;  %4100 = vrcp.f32 %v1283_v12  ;;  %6494 = vst [vmem:[#allocation82_spill] sm:$0xff] %v5331_v51  ;;  %v1481_v5 = vmul.f32 2.0, %v5316_v10 }
 0x1ee   :  { %v4081_v46 = vpop.eup %4080  ;;  %4102 = vpow2.f32 %v3496_v57  ;;  %2087 = vrot.lane.b32.xlu1 %v3540_v4, %s4331_s18  ;;  %v1473_v34 = vmul.f32 2.0, %v5323_v11  ;;  %v3550_v12 = vadd.f32 -1.0, %v1482_v23 }
 0x1ef   :  { %v5329_v25 = vpop.eup %4082  ;;  %4104 = vpow2.f32 %v3495_v17  ;;  %v5337_v0 = vpop.permute.xlu0 %1805  ;;  %v1284_v29 = vadd.f32 1.0, %v4081_v46  ;;  %v3549_v53 = vadd.f32 -1.0, %v1481_v5  ;;  %v3497_v17 = vmul.f32 -1.442695, %v1031_v39 }
 0x1f0   :  { %v4085_v9 = vpop.eup %4084  ;;  %6495 = vst [vmem:[#allocation83_spill] sm:$0xff] %v5337_v0  ;;  %4106 = vrcp.f32 %v1296_v24  ;;  %v1484_v60 = vmul.f32 2.0, %v5329_v25  ;;  %v5349_v46 = vpop.permute.xlu1 %1811  ;;  %v3541_v4 = vadd.f32 -1.0, %v1473_v34 }
 0x1f1   :  { %v1295_v3 = vadd.f32 1.0, %v4085_v9  ;;  %v5339_v54 = vpop.eup %4086  ;;  %4108 = vpow2.f32 %v3482_v59  ;;  %2105 = vrot.lane.b32.xlu0 %v3549_v53, %s4331_s18  ;;  %6498 = vst [vmem:[#allocation86_spill] sm:$0xff] %v5349_v46 }
 0x1f2   :  { %v5342_v56 = vpop.eup %4088  ;;  %2107 = vrot.lane.b32.xlu1 %v3550_v12, %s4331_s18  ;;  %v1483_v8 = vmul.f32 2.0, %v5339_v54  ;;  %v3552_v23 = vadd.f32 -1.0, %v1484_v60  ;;  %v3483_v12 = vmul.f32 -1.442695, %v5307_v47 }
 0x1f3   :  { %6496 = vst [vmem:[#allocation84_spill] sm:$0xff] %v5342_v56  ;;  %v5345_v57 = vpop.eup %4090  ;;  %4110 = vrcp.f32 %v1295_v3  ;;  %v1474_v59 = vmul.f32 2.0, %v5342_v56  ;;  %v5353_v39 = vpop.permute.xlu0 %1809 }
 0x1f4   :  { %6497 = vst [vmem:[#allocation85_spill] sm:$0xff] %v5345_v57  ;;  %v4093_v63 = vpop.eup %4092  ;;  %4112 = vrcp.f32 %v1284_v29  ;;  %6499 = vst [vmem:[#allocation87_spill] sm:$0xff] %v5353_v39  ;;  %v3551_v60 = vadd.f32 -1.0, %v1483_v8 }
 0x1f5   :  { %v4095_v24 = vpop.eup %4094  ;;  %4114 = vpow2.f32 %v3498_v62  ;;  %2089 = vrot.lane.b32.xlu0 %v3541_v4, %s4331_s18  ;;  %v1285_v34 = vadd.f32 1.0, %v4093_v63  ;;  %v3542_v0 = vadd.f32 -1.0, %v1474_v59  ;;  %v3500_v63 = vmul.f32 -1.442695, %v5319_v7 }
 0x1f6   :  { %v4097_v9 = vpop.eup %4096  ;;  %v1298_v5 = vadd.f32 1.0, %v4095_v24  ;;  %4116 = vpow2.f32 %v3497_v17  ;;  %2111 = vrot.lane.b32.xlu1 %v3552_v23, %s4331_s18  ;;  %v1485_v24 = vmul.f32 2.0, %v5345_v57  ;;  %v3499_v7 = vmul.f32 -1.442695, %v5321_v41 }
 0x1f7   :  { %v5355_v53 = vpop.eup %4098  ;;  %v1297_v3 = vadd.f32 1.0, %v4097_v9  ;;  %v5363_v9 = vpop.permute.xlu1 %1815  ;;  %v3484_v41 = vmul.f32 -1.442695, %v5326_v48 }
 0x1f8   :  { %6500 = vst [vmem:[#allocation88_spill] sm:$0xff] %v5355_v53  ;;  %v5359_v29 = vpop.eup %4100  ;;  %4118 = vrcp.f32 %v1298_v5  ;;  %6502 = vst [vmem:[#allocation90_spill] sm:$0xff] %v5363_v9  ;;  %v1486_v47 = vmul.f32 2.0, %v5355_v53  ;;  %v5371_v8 = vpop.permute.xlu0 %1813  ;;  %v3553_v23 = vadd.f32 -1.0, %v1485_v24 }
 0x1f9   :  { %6501 = vst [vmem:[#allocation89_spill] sm:$0xff] %v5359_v29  ;;  %v4103_v62 = vpop.eup %4102  ;;  %4120 = vrcp.f32 %v1297_v3  ;;  %2109 = vrot.lane.b32.xlu0 %v3551_v60, %s4331_s18  ;;  %6504 = vst [vmem:[#allocation92_spill] sm:$0xff] %v5371_v8  ;;  %v1475_v59 = vmul.f32 2.0, %v5359_v29 }
 0x1fa   :  { %v4105_v46 = vpop.eup %4104  ;;  %v1300_v39 = vadd.f32 1.0, %v4103_v62  ;;  %4122 = vpow2.f32 %v3483_v12  ;;  %2091 = vrot.lane.b32.xlu1 %v3542_v0, %s4331_s18  ;;  %v3554_v62 = vadd.f32 -1.0, %v1486_v47 }
 0x1fb   :  { %v5366_v17 = vpop.eup %4106  ;;  %4124 = vrcp.f32 %v1285_v34  ;;  %v1299_v4 = vadd.f32 1.0, %v4105_v46  ;;  %v2012_v46 = vpop.permute.xlu1 %2011  ;;  %v3543_v60 = vadd.f32 -1.0, %v1475_v59 }
 0x1fc   :  { %6503 = vst [vmem:[#allocation91_spill] sm:$0xff] %v5366_v17  ;;  %v4109_v5 = vpop.eup %4108  ;;  %4126 = vrcp.f32 %v1300_v39  ;;  %v1488_v12 = vmul.f32 2.0, %v5366_v17 }
 0x1fd   :  { %v5374_v3 = vpop.eup %4110  ;;  %4128 = vpow2.f32 %v3500_v63  ;;  %2113 = vrot.lane.b32.xlu0 %v3553_v23, %s4331_s18  ;;  %v1286_v34 = vadd.f32 1.0, %v4109_v5  ;;  %v2010_v51 = vpop.permute.xlu0 %2009 }
 0x1fe   :  { %6505 = vst [vmem:[#allocation93_spill] sm:$0xff] %v5374_v3  ;;  %v5377_v9 = vpop.eup %4112  ;;  %4130 = vrcp.f32 %v1299_v4  ;;  %2115 = vrot.lane.b32.xlu1 %v3554_v62, %s4331_s18  ;;  %v1487_v24 = vmul.f32 2.0, %v5374_v3  ;;  %v3556_v8 = vadd.f32 -1.0, %v1488_v12 }
 0x1ff   :  { %6506 = vst [vmem:[#allocation94_spill] sm:$0xff] %v5377_v9  ;;  %v4115_v0 = vpop.eup %4114  ;;  %v1476_v63 = vmul.f32 2.0, %v5377_v9  ;;  %4132 = vpow2.f32 %v3499_v7 }
 0x200   :  { %v4117_v39 = vpop.eup %4116  ;;  %4134 = vrcp.f32 %v1286_v34  ;;  %v1302_v23 = vadd.f32 1.0, %v4115_v0  ;;  %v3555_v59 = vadd.f32 -1.0, %v1487_v24 }
 0x201   :  { %2093 = vrot.lane.b32.xlu0 %v3543_v60, %s4331_s18  ;;  %v1301_v4 = vadd.f32 1.0, %v4117_v39  ;;  %v3544_v31 = vadd.f32 -1.0, %v1476_v63  ;;  %4136 = vpow2.f32 %v3484_v41 }
 0x202   :  { %v5383_v47 = vpop.eup %4118  ;;  %2119 = vrot.lane.b32.xlu1 %v3556_v8, %s4331_s18  ;;  %v5394_v49 = vpop.permute.xlu1 %2015 }
 0x203   :  { %6507 = vst [vmem:[#allocation95_spill] sm:$0xff] %v5383_v47  ;;  %v5386_v21 = vpop.eup %4120  ;;  %v1490_v14 = vmul.f32 2.0, %v5383_v47  ;;  %v5400_v7 = vpop.permute.xlu0 %2013  ;;  %4138 = vrcp.f32 %v1301_v4 }
 0x204   :  { %6508 = vst [vmem:[#allocation96_spill] sm:$0xff] %v5386_v21  ;;  %v4123_v5 = vpop.eup %4122  ;;  %v1489_v62 = vmul.f32 2.0, %v5386_v21  ;;  %4140 = vrcp.f32 %v1302_v23 }
 0x205   :  { %v5392_v12 = vpop.eup %4124  ;;  %2117 = vrot.lane.b32.xlu0 %v3555_v59, %s4331_s18  ;;  %v1287_v8 = vadd.f32 1.0, %v4123_v5  ;;  %v3558_v24 = vadd.f32 -1.0, %v1490_v14 }
 0x206   :  { %6509 = vst [vmem:[#allocation97_spill] sm:$0xff] %v5392_v12  ;;  %v5397_v48 = vpop.eup %4126  ;;  %2095 = vrot.lane.b32.xlu1 %v3544_v31, %s4331_s18  ;;  %v3557_v39 = vadd.f32 -1.0, %v1489_v62  ;;  %v1477_v34 = vmul.f32 2.0, %v5392_v12  ;;  %v5406_v63 = vpop.permute.xlu1 %2019 }
 0x207   :  { %6510 = vst [vmem:[#allocation98_spill] sm:$0xff] %v5397_v48  ;;  %v4129_v0 = vpop.eup %4128  ;;  %v1492_v41 = vmul.f32 2.0, %v5397_v48  ;;  %4142 = vrcp.f32 %v1287_v8 }
 0x208   :  { %v5404_v60 = vpop.eup %4130  ;;  %v1304_v5 = vadd.f32 1.0, %v4129_v0  ;;  %v3545_v59 = vadd.f32 -1.0, %v1477_v34  ;;  %v2202_v0 = vmul.f32 %v4982_v26, %v2012_v46 }
 0x209   :  { %6511 = vst [vmem:[#allocation99_spill] sm:$0xff] %v5404_v60  ;;  %2121 = vrot.lane.b32.xlu0 %v3557_v39, %s4331_s18  ;;  %v4133_v4 = vpop.eup %4132  ;;  %v2018_v31 = vpop.permute.xlu0 %2017  ;;  %v1491_v23 = vmul.f32 2.0, %v5404_v60  ;;  %v3560_v62 = vadd.f32 -1.0, %v1492_v41 }
 0x20a   :  { %2123 = vrot.lane.b32.xlu1 %v3558_v24, %s4331_s18  ;;  %v5412_v13 = vpop.eup %4134  ;;  %v2024_v14 = vpop.permute.xlu1 %2023  ;;  %v1303_v45 = vadd.f32 1.0, %v4133_v4  ;;  %4144 = vrcp.f32 %v1304_v5 }
 0x20b   :  { %6512 = vst [vmem:[#allocation100_spill] sm:$0xff] %v5412_v13  ;;  %v4137_v48 = vpop.eup %4136  ;;  %v3559_v39 = vadd.f32 -1.0, %v1491_v23  ;;  %v1478_v34 = vmul.f32 2.0, %v5412_v13 }
 0x20c   :  { %4146 = vrcp.f32 %v1303_v45  ;;  %v1288_v4 = vadd.f32 1.0, %v4137_v48 }
 0x20d   :  { %2097 = vrot.lane.b32.xlu0 %v3545_v59, %s4331_s18  ;;  %v2022_v8 = vpop.permute.xlu0 %2021  ;;  %v5416_v24 = vpop.eup %4138  ;;  %v2201_v59 = vmul.f32 %v4988_v30, %v2010_v51  ;;  %v3546_v12 = vadd.f32 -1.0, %v1478_v34 }
 0x20e   :  { %2127 = vrot.lane.b32.xlu1 %v3560_v62, %s4331_s18  ;;  %6513 = vst [vmem:[#allocation101_spill] sm:$0xff] %v5416_v24  ;;  %v5420_v60 = vpop.eup %4140  ;;  %v1493_v23 = vmul.f32 2.0, %v5416_v24  ;;  %4148 = vrcp.f32 %v1288_v4 }
 0x20f   :  { %6514 = vst [vmem:[#allocation102_spill] sm:$0xff] %v5420_v60  ;;  %v1494_v46 = vmul.f32 2.0, %v5420_v60 }
 0x211   :  { %2125 = vrot.lane.b32.xlu0 %v3559_v39, %s4331_s18  ;;  %v2028_v41 = vpop.permute.xlu1 %2027  ;;  %v2026_v5 = vpop.permute.xlu0 %2025  ;;  %v3562_v26 = vadd.f32 -1.0, %v1494_v46 }
 0x212   :  { %2331 = vrot.lane.b32.xlu1 %v2202_v0, %s4331_s18  ;;  %v5426_v62 = vpop.eup %4142  ;;  %v3561_v0 = vadd.f32 -1.0, %v1493_v23  ;;  %v2203_v23 = vmul.f32 %v5002_v58, %v5400_v7  ;;  %v2205_v7 = vmul.f32 %v5016_v50, %v2018_v31  ;;  %v2210_v31 = vmul.f32 %v5037_v33, %v2028_v41 }
 0x213   :  { %6515 = vst [vmem:[#allocation103_spill] sm:$0xff] %v5426_v62  ;;  %v1479_v48 = vmul.f32 2.0, %v5426_v62 }
 0x214   :  { %v5432_v51 = vpop.eup %4144 }
 0x215   :  { %2329 = vrot.lane.b32.xlu0 %v2201_v59, %s4331_s18  ;;  %v2032_v45 = vpop.permute.xlu1 %2031  ;;  %v2030_v39 = vpop.permute.xlu0 %2029  ;;  %6516 = vst [vmem:[#allocation104_spill] sm:$0xff] %v5432_v51  ;;  %v3547_v24 = vadd.f32 -1.0, %v1479_v48  ;;  %v1496_v59 = vmul.f32 2.0, %v5432_v51 }
 0x216   :  { %2099 = vrot.lane.b32.xlu1 %v3546_v12, %s4331_s18  ;;  %v5436_v60 = vpop.eup %4146  ;;  %v2204_v12 = vmul.f32 %v4996_v18, %v5394_v49 }
 0x217   :  { %6517 = vst [vmem:[#allocation105_spill] sm:$0xff] %v5436_v60 }
 0x218   :  { %v5446_v48 = vpop.eup %4148 }
 0x219   :  { %2129 = vrot.lane.b32.xlu0 %v3561_v0, %s4331_s18  ;;  %v2034_v34 = vpop.permute.xlu0 %2033  ;;  %v2036_v4 = vpop.permute.xlu1 %2035  ;;  %v3564_v0 = vadd.f32 -1.0, %v1496_v59 }
 0x21a   :  { %2131 = vrot.lane.b32.xlu1 %v3562_v26, %s4331_s18  ;;  %v1495_v26 = vmul.f32 2.0, %v5436_v60 }
 0x21c   :  { %v3563_v51 = vadd.f32 -1.0, %v1495_v26  ;;  %v2208_v26 = vmul.f32 %v5022_v37, %v2024_v14 }
 0x21d   :  { %2101 = vrot.lane.b32.xlu0 %v3547_v24, %s4331_s18  ;;  %v2040_v62 = vpop.permute.xlu1 %2039  ;;  %v2206_v24 = vmul.f32 %v5012_v28, %v5406_v63 }
 0x21e   :  { %2335 = vrot.lane.b32.xlu1 %v2204_v12, %s4331_s18  ;;  %v2038_v46 = vpop.permute.xlu0 %2037  ;;  %v1480_v12 = vmul.f32 2.0, %v5446_v48 }
 0x220   :  { %v3548_v60 = vadd.f32 -1.0, %v1480_v12  ;;  %v2213_v12 = vmul.f32 %v5065_v6, %v2034_v34 }
 0x221   :  { %2333 = vrot.lane.b32.xlu0 %v2203_v23, %s4331_s18  ;;  %v2044_v59 = vpop.permute.xlu1 %2043  ;;  %v2207_v23 = vmul.f32 %v5031_v43, %v2022_v8  ;;  %v2212_v8 = vmul.f32 %v5049_v40, %v2032_v45  ;;  %v2216_v45 = vmul.f32 %v5077_v32, %v2040_v62 }
 0x222   :  { %2135 = vrot.lane.b32.xlu1 %v3564_v0, %s4331_s18  ;;  %v2218_v34 = vmul.f32 %v5086_v15, %v2044_v59 }
 0x223   :  { %v2042_v49 = vpop.permute.xlu0 %2041 }
 0x225   :  { %2133 = vrot.lane.b32.xlu0 %v3563_v51, %s4331_s18  ;;  %v2048_v63 = vpop.permute.xlu1 %2047  ;;  %v2209_v51 = vmul.f32 %v5044_v2, %v2026_v5  ;;  %v2214_v5 = vmul.f32 %v5062_v1, %v2036_v4 }
 0x226   :  { %2339 = vrot.lane.b32.xlu1 %v2206_v24, %s4331_s18 }
 0x227   :  { %v2046_v18 = vpop.permute.xlu0 %2045 }
 0x229   :  { %2337 = vrot.lane.b32.xlu0 %v2205_v7, %s4331_s18  ;;  %v2052_v24 = vpop.permute.xlu1 %2051  ;;  %v2215_v7 = vmul.f32 %v5080_v27, %v2038_v46  ;;  %v6518_v46 = vld [vmem:[#allocation53_spill] sm:$0xff] }
 0x22a   :  { %2103 = vrot.lane.b32.xlu1 %v3548_v60, %s4331_s18  ;;  %v2211_v60 = vmul.f32 %v5058_v52, %v2030_v39 }
 0x22b   :  { %v2050_v0 = vpop.permute.xlu0 %2049 }
 0x22d   :  { %2341 = vrot.lane.b32.xlu0 %v2207_v23, %s4331_s18  ;;  %v2056_v41 = vpop.permute.xlu1 %2055  ;;  %v2217_v23 = vmul.f32 %v5089_v42, %v2042_v49 }
 0x22e   :  { %2343 = vrot.lane.b32.xlu1 %v2208_v26, %s4331_s18 }
 0x22f   :  { %v2054_v14 = vpop.permute.xlu0 %2053 }
 0x231   :  { %2345 = vrot.lane.b32.xlu0 %v2209_v51, %s4331_s18  ;;  %v2060_v26 = vpop.permute.xlu1 %2059  ;;  %v2219_v51 = vmul.f32 %v5106_v36, %v2046_v18 }
 0x232   :  { %2347 = vrot.lane.b32.xlu1 %v2210_v31, %s4331_s18  ;;  %v2220_v31 = vmul.f32 %v6518_v46, %v2048_v63 }
 0x233   :  { %v2058_v39 = vpop.permute.xlu0 %2057 }
 0x235   :  { %2349 = vrot.lane.b32.xlu0 %v2211_v60, %s4331_s18  ;;  %v6519_v60 = vld [vmem:[#allocation55_spill] sm:$0xff] }
 0x236   :  { %2351 = vrot.lane.b32.xlu1 %v2212_v8, %s4331_s18  ;;  %v2221_v8 = vmul.f32 %v6519_v60, %v2050_v0  ;;  %v6524_v0 = vld [vmem:[#allocation60_spill] sm:$0xff] }
 0x237   :  { %v2064_v62 = vpop.permute.xlu1 %2063 }
 0x238   :  { %v2062_v4 = vpop.permute.xlu0 %2061 }
 0x239   :  { %2353 = vrot.lane.b32.xlu0 %v2213_v12, %s4331_s18  ;;  %v6520_v12 = vld [vmem:[#allocation54_spill] sm:$0xff] }
 0x23a   :  { %2355 = vrot.lane.b32.xlu1 %v2214_v5, %s4331_s18  ;;  %v2222_v59 = vmul.f32 %v6520_v12, %v2052_v24  ;;  %v6521_v5 = vld [vmem:[#allocation59_spill] sm:$0xff]  ;;  %v6525_v24 = vld [vmem:[#allocation65_spill] sm:$0xff] }
 0x23d   :  { %2357 = vrot.lane.b32.xlu0 %v2215_v7, %s4331_s18  ;;  %v2066_v49 = vpop.permute.xlu0 %2065  ;;  %v2223_v7 = vmul.f32 %v6521_v5, %v2054_v14 }
 0x23e   :  { %2359 = vrot.lane.b32.xlu1 %v2216_v45, %s4331_s18  ;;  %v6522_v45 = vld [vmem:[#allocation58_spill] sm:$0xff] }
 0x23f   :  { %v2224_v18 = vmul.f32 %v6522_v45, %v2056_v41 }
 0x241   :  { %2361 = vrot.lane.b32.xlu0 %v2217_v23, %s4331_s18  ;;  %v2068_v23 = vpop.permute.xlu1 %2067  ;;  %v2070_v63 = vpop.permute.xlu0 %2069 }
 0x242   :  { %2363 = vrot.lane.b32.xlu1 %v2218_v34, %s4331_s18  ;;  %v6523_v34 = vld [vmem:[#allocation61_spill] sm:$0xff] }
 0x245   :  { %2365 = vrot.lane.b32.xlu0 %v2219_v51, %s4331_s18  ;;  %v2225_v51 = vmul.f32 %v6523_v34, %v2058_v39  ;;  %v2072_v60 = vpop.permute.xlu1 %2071  ;;  %v2074_v14 = vpop.permute.xlu0 %2073  ;;  %v6528_v34 = vld [vmem:[#allocation68_spill] sm:$0xff] }
 0x246   :  { %2367 = vrot.lane.b32.xlu1 %v2220_v31, %s4331_s18  ;;  %v2226_v31 = vmul.f32 %v6524_v0, %v2060_v26  ;;  %v2230_v26 = vmul.f32 %v6528_v34, %v2068_v23 }
 0x249   :  { %2369 = vrot.lane.b32.xlu0 %v2221_v8, %s4331_s18  ;;  %v2227_v8 = vmul.f32 %v6525_v24, %v2062_v4  ;;  %v2076_v45 = vpop.permute.xlu1 %2075  ;;  %v6530_v24 = vld [vmem:[#allocation70_spill] sm:$0xff] }
 0x24a   :  { %2371 = vrot.lane.b32.xlu1 %v2222_v59, %s4331_s18  ;;  %v6526_v59 = vld [vmem:[#allocation64_spill] sm:$0xff]  ;;  %v2234_v23 = vmul.f32 %v5226_v19, %v2076_v45 }
 0x24b   :  { %v2228_v41 = vmul.f32 %v6526_v59, %v2064_v62  ;;  %v2078_v39 = vpop.permute.xlu0 %2077  ;;  %v2232_v62 = vmul.f32 %v6530_v24, %v2072_v60 }
 0x24d   :  { %2373 = vrot.lane.b32.xlu0 %v2223_v7, %s4331_s18  ;;  %v6527_v7 = vld [vmem:[#allocation69_spill] sm:$0xff] }
 0x24e   :  { %2375 = vrot.lane.b32.xlu1 %v2224_v18, %s4331_s18  ;;  %v2229_v18 = vmul.f32 %v6527_v7, %v2066_v49  ;;  %v2233_v49 = vmul.f32 %v5204_v38, %v2074_v14 }
 0x24f   :  { %v2080_v0 = vpop.permute.xlu1 %2079 }
 0x250   :  { %v2236_v60 = vmul.f32 %v5250_v20, %v2080_v0 }
 0x251   :  { %2377 = vrot.lane.b32.xlu0 %v2225_v51, %s4331_s18  ;;  %v6529_v51 = vld [vmem:[#allocation71_spill] sm:$0xff] }
 0x252   :  { %2379 = vrot.lane.b32.xlu1 %v2226_v31, %s4331_s18  ;;  %v2231_v4 = vmul.f32 %v6529_v51, %v2070_v63  ;;  %v2235_v63 = vmul.f32 %v5235_v61, %v2078_v39 }
 0x253   :  { %v2082_v31 = vpop.permute.xlu0 %2081 }
 0x254   :  { %v2237_v14 = vmul.f32 %v5260_v22, %v2082_v31 }
 0x255   :  { %2381 = vrot.lane.b32.xlu0 %v2227_v8, %s4331_s18 }
 0x256   :  { %2383 = vrot.lane.b32.xlu1 %v2228_v41, %s4331_s18 }
 0x257   :  { %v2084_v59 = vpop.permute.xlu1 %2083 }
 0x258   :  { %v2238_v45 = vmul.f32 %v5274_v16, %v2084_v59 }
 0x259   :  { %2385 = vrot.lane.b32.xlu0 %v2229_v18, %s4331_s18 }
 0x25a   :  { %2387 = vrot.lane.b32.xlu1 %v2230_v26, %s4331_s18 }
 0x25c   :  { %v2086_v8 = vpop.permute.xlu0 %2085 }
 0x25d   :  { %2389 = vrot.lane.b32.xlu0 %v2231_v4, %s4331_s18  ;;  %v2239_v39 = vmul.f32 %v5286_v55, %v2086_v8 }
 0x25e   :  { %2391 = vrot.lane.b32.xlu1 %v2232_v62, %s4331_s18 }
 0x260   :  { %v2088_v41 = vpop.permute.xlu1 %2087 }
 0x261   :  { %2393 = vrot.lane.b32.xlu0 %v2233_v49, %s4331_s18  ;;  %v2240_v0 = vmul.f32 %v5302_v35, %v2088_v41 }
 0x262   :  { %2395 = vrot.lane.b32.xlu1 %v2234_v23, %s4331_s18 }
 0x263   :  { %v2106_v18 = vpop.permute.xlu0 %2105 }
 0x264   :  { %v2108_v26 = vpop.permute.xlu1 %2107  ;;  %v2249_v31 = vmul.f32 %v5316_v10, %v2106_v18 }
 0x265   :  { %2397 = vrot.lane.b32.xlu0 %v2235_v63, %s4331_s18  ;;  %v2250_v59 = vmul.f32 %v5311_v44, %v2108_v26 }
 0x266   :  { %2399 = vrot.lane.b32.xlu1 %v2236_v60, %s4331_s18 }
 0x267   :  { %v2090_v4 = vpop.permute.xlu0 %2089 }
 0x268   :  { %v2112_v62 = vpop.permute.xlu1 %2111  ;;  %v2241_v8 = vmul.f32 %v5323_v11, %v2090_v4 }
 0x269   :  { %2401 = vrot.lane.b32.xlu0 %v2237_v14, %s4331_s18  ;;  %v2252_v41 = vmul.f32 %v5329_v25, %v2112_v62 }
 0x26a   :  { %2403 = vrot.lane.b32.xlu1 %v2238_v45, %s4331_s18 }
 0x26b   :  { %v2110_v49 = vpop.permute.xlu0 %2109 }
 0x26c   :  { %v2092_v23 = vpop.permute.xlu1 %2091  ;;  %v2251_v18 = vmul.f32 %v5339_v54, %v2110_v49 }
 0x26d   :  { %2405 = vrot.lane.b32.xlu0 %v2239_v39, %s4331_s18  ;;  %v2242_v26 = vmul.f32 %v5342_v56, %v2092_v23 }
 0x26e   :  { %2407 = vrot.lane.b32.xlu1 %v2240_v0, %s4331_s18 }
 0x26f   :  { %v2114_v63 = vpop.permute.xlu0 %2113 }
 0x270   :  { %v2116_v60 = vpop.permute.xlu1 %2115  ;;  %v2253_v4 = vmul.f32 %v5345_v57, %v2114_v63 }
 0x271   :  { %2425 = vrot.lane.b32.xlu0 %v2249_v31, %s4331_s18  ;;  %v2254_v62 = vmul.f32 %v5355_v53, %v2116_v60 }
 0x272   :  { %2427 = vrot.lane.b32.xlu1 %v2250_v59, %s4331_s18 }
 0x273   :  { %v2094_v14 = vpop.permute.xlu0 %2093 }
 0x274   :  { %v2120_v45 = vpop.permute.xlu1 %2119  ;;  %v2243_v49 = vmul.f32 %v5359_v29, %v2094_v14 }
 0x275   :  { %2409 = vrot.lane.b32.xlu0 %v2241_v8, %s4331_s18  ;;  %v2256_v23 = vmul.f32 %v5366_v17, %v2120_v45 }
 0x276   :  { %2431 = vrot.lane.b32.xlu1 %v2252_v41, %s4331_s18 }
 0x277   :  { %v2118_v39 = vpop.permute.xlu0 %2117 }
 0x278   :  { %v2096_v0 = vpop.permute.xlu1 %2095  ;;  %v2255_v63 = vmul.f32 %v5374_v3, %v2118_v39  ;;  %v6532_v3 = vld [vmem:[#allocation98_spill] sm:$0xff] }
 0x279   :  { %2429 = vrot.lane.b32.xlu0 %v2251_v18, %s4331_s18  ;;  %v2244_v60 = vmul.f32 %v5377_v9, %v2096_v0 }
 0x27a   :  { %2411 = vrot.lane.b32.xlu1 %v2242_v26, %s4331_s18 }
 0x27b   :  { %v2122_v31 = vpop.permute.xlu0 %2121 }
 0x27c   :  { %v2124_v59 = vpop.permute.xlu1 %2123  ;;  %v2257_v14 = vmul.f32 %v5386_v21, %v2122_v31  ;;  %v6534_v21 = vld [vmem:[#allocation9_spill] sm:$0xff] }
 0x27d   :  { %2433 = vrot.lane.b32.xlu0 %v2253_v4, %s4331_s18  ;;  %v2258_v45 = vmul.f32 %v5383_v47, %v2124_v59  ;;  %v1881_v59 = vmul.f32 %v4988_v30, %v6534_v21  ;;  %v6541_v21 = vld [vmem:[#allocation102_spill] sm:$0xff] }
 0x27e   :  { %2435 = vrot.lane.b32.xlu1 %v2254_v62, %s4331_s18 }
 0x27f   :  { %v2098_v8 = vpop.permute.xlu0 %2097 }
 0x280   :  { %v2128_v41 = vpop.permute.xlu1 %2127 }
 0x281   :  { %2413 = vrot.lane.b32.xlu0 %v2243_v49, %s4331_s18  ;;  %v6531_v49 = vld [vmem:[#allocation97_spill] sm:$0xff]  ;;  %v2260_v0 = vmul.f32 %v6532_v3, %v2128_v41 }
 0x282   :  { %2439 = vrot.lane.b32.xlu1 %v2256_v23, %s4331_s18  ;;  %v2245_v39 = vmul.f32 %v6531_v49, %v2098_v8  ;;  %v6535_v8 = vld [vmem:[#allocation11_spill] sm:$0xff] }
 0x283   :  { %v2126_v18 = vpop.permute.xlu0 %2125 }
 0x284   :  { %v2332_v26 = vpop.permute.xlu1 %2331 }
 0x285   :  { %2437 = vrot.lane.b32.xlu0 %v2255_v63, %s4331_s18  ;;  %v6533_v63 = vld [vmem:[#allocation99_spill] sm:$0xff] }
 0x286   :  { %2415 = vrot.lane.b32.xlu1 %v2244_v60, %s4331_s18  ;;  %v2259_v31 = vmul.f32 %v6533_v63, %v2126_v18  ;;  %v6539_v18 = vld [vmem:[#allocation8_spill] sm:$0xff] }
 0x287   :  { %v2330_v4 = vpop.permute.xlu0 %2329  ;;  %v1883_v63 = vmul.f32 %v5002_v58, %v6539_v18 }
 0x288   :  { %v2100_v62 = vpop.permute.xlu1 %2099  ;;  %v5565_v41 = vadd.f32 %v2330_v4, %v1881_v59 }
 0x289   :  { %2441 = vrot.lane.b32.xlu0 %v2257_v14, %s4331_s18  ;;  %v2246_v14 = vmul.f32 %v5412_v13, %v2100_v62  ;;  %v6543_v13 = vld [vmem:[#allocation43_spill] sm:$0xff] }
 0x28a   :  { %2443 = vrot.lane.b32.xlu1 %v2258_v45, %s4331_s18  ;;  %v6536_v45 = vld [vmem:[#allocation40_spill] sm:$0xff]  ;;  %6537 = vst [vmem:[#allocation53_spill] sm:$0xff] %v5565_v41  ;;  %4150 = vtanh.f32 %v5565_v41  ;;  %v6549_v41 = vld [vmem:[#allocation13_spill] sm:$0xff] }
 0x28b   :  { %v2130_v23 = vpop.permute.xlu0 %2129  ;;  %v1882_v49 = vmul.f32 %v6536_v45, %v6535_v8 }
 0x28c   :  { %v2132_v9 = vpop.permute.xlu1 %2131 }
 0x28d   :  { %2417 = vrot.lane.b32.xlu0 %v2245_v39, %s4331_s18  ;;  %v6538_v39 = vld [vmem:[#allocation101_spill] sm:$0xff]  ;;  %v5571_v17 = vadd.f32 %v2332_v26, %v1882_v49  ;;  %v2262_v62 = vmul.f32 %v6541_v21, %v2132_v9  ;;  %v6547_v9 = vld [vmem:[#allocation104_spill] sm:$0xff] }
 0x28e   :  { %2447 = vrot.lane.b32.xlu1 %v2260_v0, %s4331_s18  ;;  %v2261_v0 = vmul.f32 %v6538_v39, %v2130_v23  ;;  %v6545_v23 = vld [vmem:[#allocation103_spill] sm:$0xff] }
 0x28f   :  { %v2102_v60 = vpop.permute.xlu0 %2101  ;;  %6540 = vst [vmem:[#allocation59_spill] sm:$0xff] %v5571_v17  ;;  %4152 = vtanh.f32 %v5571_v17 }
 0x290   :  { %v2336_v47 = vpop.permute.xlu1 %2335  ;;  %v2247_v59 = vmul.f32 %v6545_v23, %v2102_v60 }
 0x291   :  { %2445 = vrot.lane.b32.xlu0 %v2259_v31, %s4331_s18  ;;  %v6542_v31 = vld [vmem:[#allocation10_spill] sm:$0xff] }
 0x292   :  { %2419 = vrot.lane.b32.xlu1 %v2246_v14, %s4331_s18  ;;  %v1884_v8 = vmul.f32 %v6543_v13, %v6542_v31 }
 0x293   :  { %v2334_v3 = vpop.permute.xlu0 %2333 }
 0x294   :  { %v2136_v30 = vpop.permute.xlu1 %2135  ;;  %v5578_v4 = vadd.f32 %v2334_v3, %v1883_v63  ;;  %v5583_v26 = vadd.f32 %v2336_v47, %v1884_v8  ;;  %v1885_v3 = vmul.f32 %v5016_v50, %v6549_v41  ;;  %v6550_v63 = vld [vmem:[#allocation105_spill] sm:$0xff] }
 0x295   :  { %2449 = vrot.lane.b32.xlu0 %v2261_v0, %s4331_s18  ;;  %v2264_v49 = vmul.f32 %v6547_v9, %v2136_v30  ;;  %v6548_v0 = vld [vmem:[#allocation12_spill] sm:$0xff] }
 0x296   :  { %6544 = vst [vmem:[#allocation69_spill] sm:$0xff] %v5578_v4  ;;  %2451 = vrot.lane.b32.xlu1 %v2262_v62, %s4331_s18  ;;  %6546 = vst [vmem:[#allocation68_spill] sm:$0xff] %v5583_v26  ;;  %v1886_v31 = vmul.f32 %v5012_v28, %v6548_v0  ;;  %4154 = vtanh.f32 %v5578_v4  ;;  %v6553_v0 = vld [vmem:[#allocation15_spill] sm:$0xff] }
 0x297   :  { %v2134_v14 = vpop.permute.xlu0 %2133  ;;  %4156 = vtanh.f32 %v5583_v26  ;;  %v1887_v41 = vmul.f32 %v5031_v43, %v6553_v0 }
 0x298   :  { %v2340_v18 = vpop.permute.xlu1 %2339  ;;  %v2263_v60 = vmul.f32 %v6550_v63, %v2134_v14 }
 0x299   :  { %2421 = vrot.lane.b32.xlu0 %v2247_v59, %s4331_s18  ;;  %v5595_v47 = vadd.f32 %v2340_v18, %v1886_v31  ;;  %v4151_v18 = vpop.eup %4150 }
 0x29a   :  { %2455 = vrot.lane.b32.xlu1 %v2264_v49, %s4331_s18  ;;  %v6554_v49 = vld [vmem:[#allocation14_spill] sm:$0xff] }
 0x29b   :  { %v2338_v62 = vpop.permute.xlu0 %2337  ;;  %6551 = vst [vmem:[#allocation71_spill] sm:$0xff] %v5595_v47  ;;  %v1888_v14 = vmul.f32 %v5022_v37, %v6554_v49  ;;  %v6558_v49 = vld [vmem:[#allocation16_spill] sm:$0xff] }
 0x29c   :  { %v5597_v30 = vadd.f32 %v2338_v62, %v1885_v3  ;;  %v2104_v8 = vpop.permute.xlu1 %2103 }
 0x29d   :  { %v2248_v59 = vmul.f32 %v5446_v48, %v2104_v8  ;;  %2453 = vrot.lane.b32.xlu0 %v2263_v60, %s4331_s18  ;;  %v4153_v60 = vpop.eup %4152  ;;  %v6557_v8 = vld [vmem:[#allocation17_spill] sm:$0xff] }
 0x29e   :  { %6552 = vst [vmem:[#allocation70_spill] sm:$0xff] %v5597_v30  ;;  %4158 = vtanh.f32 %v5597_v30  ;;  %v1889_v0 = vmul.f32 %v5044_v2, %v6557_v8  ;;  %v6561_v8 = vld [vmem:[#allocation19_spill] sm:$0xff] }
 0x29f   :  { %2423 = vrot.lane.b32.xlu1 %v2248_v59, %s4331_s18  ;;  %v2342_v26 = vpop.permute.xlu0 %2341  ;;  %4160 = vtanh.f32 %v5595_v47  ;;  %v1890_v59 = vmul.f32 %v5037_v33, %v6558_v49  ;;  %v6562_v49 = vld [vmem:[#allocation18_spill] sm:$0xff] }
 0x2a0   :  { %v5608_v31 = vadd.f32 %v2342_v26, %v1887_v41  ;;  %v2344_v3 = vpop.permute.xlu1 %2343  ;;  %v4155_v41 = vpop.eup %4154 }
 0x2a1   :  { %v5610_v62 = vadd.f32 %v2344_v3, %v1888_v14  ;;  %2713 = vrot.lane.b32.xlu0 %v4151_v18, %s4331_s18  ;;  %v4157_v18 = vpop.eup %4156 }
 0x2a2   :  { %6555 = vst [vmem:[#allocation9_spill] sm:$0xff] %v5608_v31  ;;  %4162 = vtanh.f32 %v5608_v31  ;;  %v1891_v31 = vmul.f32 %v5058_v52, %v6561_v8  ;;  %v6565_v8 = vld [vmem:[#allocation21_spill] sm:$0xff] }
 0x2a3   :  { %6556 = vst [vmem:[#allocation11_spill] sm:$0xff] %v5610_v62  ;;  %4164 = vtanh.f32 %v5610_v62  ;;  %2715 = vrot.lane.b32.xlu1 %v4153_v60, %s4331_s18  ;;  %v2346_v26 = vpop.permute.xlu0 %2345  ;;  %v1892_v62 = vmul.f32 %v5049_v40, %v6562_v49  ;;  %v6566_v49 = vld [vmem:[#allocation20_spill] sm:$0xff] }
 0x2a4   :  { %v5620_v47 = vadd.f32 %v2346_v26, %v1889_v0  ;;  %v2348_v14 = vpop.permute.xlu1 %2347 }
 0x2a5   :  { %v5622_v3 = vadd.f32 %v2348_v14, %v1890_v59  ;;  %2717 = vrot.lane.b32.xlu0 %v4155_v41, %s4331_s18 }
 0x2a6   :  { %6559 = vst [vmem:[#allocation40_spill] sm:$0xff] %v5620_v47  ;;  %4166 = vtanh.f32 %v5620_v47  ;;  %v1893_v47 = vmul.f32 %v5065_v6, %v6565_v8  ;;  %v6569_v8 = vld [vmem:[#allocation23_spill] sm:$0xff] }
 0x2a7   :  { %6560 = vst [vmem:[#allocation101_spill] sm:$0xff] %v5622_v3  ;;  %4168 = vtanh.f32 %v5622_v3  ;;  %2719 = vrot.lane.b32.xlu1 %v4157_v18, %s4331_s18  ;;  %v2350_v60 = vpop.permute.xlu0 %2349  ;;  %v1894_v3 = vmul.f32 %v5062_v1, %v6566_v49  ;;  %v6570_v49 = vld [vmem:[#allocation22_spill] sm:$0xff] }
 0x2a8   :  { %v4159_v0 = vpop.eup %4158  ;;  %v5632_v26 = vadd.f32 %v2350_v60, %v1891_v31  ;;  %v2352_v59 = vpop.permute.xlu1 %2351 }
 0x2a9   :  { %v5634_v14 = vadd.f32 %v2352_v59, %v1892_v62  ;;  %2721 = vrot.lane.b32.xlu0 %v4159_v0, %s4331_s18  ;;  %v4161_v41 = vpop.eup %4160 }
 0x2aa   :  { %6563 = vst [vmem:[#allocation8_spill] sm:$0xff] %v5632_v26  ;;  %4170 = vtanh.f32 %v5632_v26  ;;  %v1895_v26 = vmul.f32 %v5080_v27, %v6569_v8 }
 0x2ab   :  { %6564 = vst [vmem:[#allocation102_spill] sm:$0xff] %v5634_v14  ;;  %4172 = vtanh.f32 %v5634_v14  ;;  %2723 = vrot.lane.b32.xlu1 %v4161_v41, %s4331_s18  ;;  %v2354_v31 = vpop.permute.xlu0 %2353  ;;  %v1896_v14 = vmul.f32 %v5077_v32, %v6570_v49  ;;  %v6574_v49 = vld [vmem:[#allocation24_spill] sm:$0xff] }
 0x2ac   :  { %v4163_v18 = vpop.eup %4162  ;;  %v5644_v60 = vadd.f32 %v2354_v31, %v1893_v47  ;;  %v2356_v62 = vpop.permute.xlu1 %2355 }
 0x2ad   :  { %v4165_v59 = vpop.eup %4164  ;;  %v5646_v0 = vadd.f32 %v2356_v62, %v1894_v3  ;;  %2725 = vrot.lane.b32.xlu0 %v4163_v18, %s4331_s18  ;;  %v6573_v18 = vld [vmem:[#allocation25_spill] sm:$0xff] }
 0x2ae   :  { %6567 = vst [vmem:[#allocation10_spill] sm:$0xff] %v5644_v60  ;;  %4174 = vtanh.f32 %v5644_v60  ;;  %v1897_v8 = vmul.f32 %v5089_v42, %v6573_v18 }
 0x2af   :  { %6568 = vst [vmem:[#allocation43_spill] sm:$0xff] %v5646_v0  ;;  %4176 = vtanh.f32 %v5646_v0  ;;  %2727 = vrot.lane.b32.xlu1 %v4165_v59, %s4331_s18  ;;  %v2358_v47 = vpop.permute.xlu0 %2357  ;;  %v1898_v0 = vmul.f32 %v5086_v15, %v6574_v49  ;;  %v6578_v49 = vld [vmem:[#allocation26_spill] sm:$0xff] }
 0x2b0   :  { %v4167_v41 = vpop.eup %4166  ;;  %v5656_v31 = vadd.f32 %v2358_v47, %v1895_v26  ;;  %v2360_v3 = vpop.permute.xlu1 %2359 }
 0x2b1   :  { %v4169_v62 = vpop.eup %4168  ;;  %v5658_v30 = vadd.f32 %v2360_v3, %v1896_v14  ;;  %2729 = vrot.lane.b32.xlu0 %v4167_v41, %s4331_s18  ;;  %v6577_v41 = vld [vmem:[#allocation27_spill] sm:$0xff] }
 0x2b2   :  { %6571 = vst [vmem:[#allocation103_spill] sm:$0xff] %v5656_v31  ;;  %4178 = vtanh.f32 %v5656_v31  ;;  %v1899_v18 = vmul.f32 %v5106_v36, %v6577_v41  ;;  %v6582_v41 = vld [vmem:[#allocation55_spill] sm:$0xff] }
 0x2b3   :  { %6572 = vst [vmem:[#allocation104_spill] sm:$0xff] %v5658_v30  ;;  %4180 = vtanh.f32 %v5658_v30  ;;  %2731 = vrot.lane.b32.xlu1 %v4169_v62, %s4331_s18  ;;  %v2362_v26 = vpop.permute.xlu0 %2361  ;;  %v1900_v30 = vmul.f32 %v6518_v46, %v6578_v49  ;;  %v6583_v49 = vld [vmem:[#allocation28_spill] sm:$0xff] }
 0x2b4   :  { %v4171_v59 = vpop.eup %4170  ;;  %v5668_v47 = vadd.f32 %v2362_v26, %v1897_v8  ;;  %v2364_v14 = vpop.permute.xlu1 %2363 }
 0x2b5   :  { %v4173_v3 = vpop.eup %4172  ;;  %v5670_v60 = vadd.f32 %v2364_v14, %v1898_v0  ;;  %2733 = vrot.lane.b32.xlu0 %v4171_v59, %s4331_s18  ;;  %v6581_v59 = vld [vmem:[#allocation29_spill] sm:$0xff] }
 0x2b6   :  { %6575 = vst [vmem:[#allocation12_spill] sm:$0xff] %v5668_v47  ;;  %4182 = vtanh.f32 %v5668_v47  ;;  %v1901_v47 = vmul.f32 %v6582_v41, %v6581_v59 }
 0x2b7   :  { %6576 = vst [vmem:[#allocation13_spill] sm:$0xff] %v5670_v60  ;;  %4184 = vtanh.f32 %v5670_v60  ;;  %2735 = vrot.lane.b32.xlu1 %v4173_v3, %s4331_s18  ;;  %v2366_v62 = vpop.permute.xlu0 %2365  ;;  %v1902_v60 = vmul.f32 %v6520_v12, %v6583_v49  ;;  %v6587_v49 = vld [vmem:[#allocation30_spill] sm:$0xff] }
 0x2b8   :  { %v4175_v8 = vpop.eup %4174  ;;  %v5680_v26 = vadd.f32 %v2366_v62, %v1899_v18  ;;  %v2368_v0 = vpop.permute.xlu1 %2367 }
 0x2b9   :  { %v4177_v14 = vpop.eup %4176  ;;  %v5682_v31 = vadd.f32 %v2368_v0, %v1900_v30  ;;  %2737 = vrot.lane.b32.xlu0 %v4175_v8, %s4331_s18  ;;  %v6586_v8 = vld [vmem:[#allocation31_spill] sm:$0xff] }
 0x2ba   :  { %6579 = vst [vmem:[#allocation105_spill] sm:$0xff] %v5680_v26  ;;  %4186 = vtanh.f32 %v5680_v26  ;;  %v1903_v59 = vmul.f32 %v6521_v5, %v6586_v8  ;;  %v6588_v26 = vld [vmem:[#allocation58_spill] sm:$0xff]  ;;  %v6592_v8 = vld [vmem:[#allocation61_spill] sm:$0xff] }
 0x2bb   :  { %6580 = vst [vmem:[#allocation15_spill] sm:$0xff] %v5682_v31  ;;  %4188 = vtanh.f32 %v5682_v31  ;;  %2739 = vrot.lane.b32.xlu1 %v4177_v14, %s4331_s18  ;;  %v2370_v3 = vpop.permute.xlu0 %2369  ;;  %v1904_v31 = vmul.f32 %v6588_v26, %v6587_v49  ;;  %v6593_v49 = vld [vmem:[#allocation32_spill] sm:$0xff] }
 0x2bc   :  { %v4179_v18 = vpop.eup %4178  ;;  %v5692_v62 = vadd.f32 %v2370_v3, %v1901_v47  ;;  %v2372_v30 = vpop.permute.xlu1 %2371  ;;  %v6594_v26 = vld [vmem:[#allocation60_spill] sm:$0xff] }
 0x2bd   :  { %v4181_v0 = vpop.eup %4180  ;;  %v5694_v4 = vadd.f32 %v2372_v30, %v1902_v60  ;;  %2741 = vrot.lane.b32.xlu0 %v4179_v18, %s4331_s18  ;;  %v6591_v18 = vld [vmem:[#allocation33_spill] sm:$0xff] }
 0x2be   :  { %6584 = vst [vmem:[#allocation14_spill] sm:$0xff] %v5692_v62  ;;  %4190 = vtanh.f32 %v5692_v62  ;;  %v1905_v62 = vmul.f32 %v6592_v8, %v6591_v18  ;;  %v6598_v18 = vld [vmem:[#allocation65_spill] sm:$0xff] }
 0x2bf   :  { %6585 = vst [vmem:[#allocation17_spill] sm:$0xff] %v5694_v4  ;;  %4192 = vtanh.f32 %v5694_v4  ;;  %2743 = vrot.lane.b32.xlu1 %v4181_v0, %s4331_s18  ;;  %v2374_v47 = vpop.permute.xlu0 %2373  ;;  %v1906_v4 = vmul.f32 %v6594_v26, %v6593_v49  ;;  %v6599_v49 = vld [vmem:[#allocation34_spill] sm:$0xff]  ;;  %v6600_v26 = vld [vmem:[#allocation64_spill] sm:$0xff] }
 0x2c0   :  { %v4183_v14 = vpop.eup %4182  ;;  %v5704_v3 = vadd.f32 %v2374_v47, %v1903_v59  ;;  %v2376_v60 = vpop.permute.xlu1 %2375 }
 0x2c1   :  { %v4185_v30 = vpop.eup %4184  ;;  %v5706_v17 = vadd.f32 %v2376_v60, %v1904_v31  ;;  %2745 = vrot.lane.b32.xlu0 %v4183_v14, %s4331_s18  ;;  %v6597_v14 = vld [vmem:[#allocation35_spill] sm:$0xff] }
 0x2c2   :  { %6589 = vst [vmem:[#allocation16_spill] sm:$0xff] %v5704_v3  ;;  %4194 = vtanh.f32 %v5704_v3  ;;  %v1907_v3 = vmul.f32 %v6598_v18, %v6597_v14 }
 0x2c3   :  { %6590 = vst [vmem:[#allocation19_spill] sm:$0xff] %v5706_v17  ;;  %4196 = vtanh.f32 %v5706_v17  ;;  %2747 = vrot.lane.b32.xlu1 %v4185_v30, %s4331_s18  ;;  %v2378_v0 = vpop.permute.xlu0 %2377  ;;  %v1908_v17 = vmul.f32 %v6600_v26, %v6599_v49  ;;  %v6604_v49 = vld [vmem:[#allocation36_spill] sm:$0xff] }
 0x2c4   :  { %v4187_v59 = vpop.eup %4186  ;;  %v5716_v47 = vadd.f32 %v2378_v0, %v1905_v62  ;;  %v2380_v31 = vpop.permute.xlu1 %2379 }
 0x2c5   :  { %v4189_v60 = vpop.eup %4188  ;;  %v5718_v12 = vadd.f32 %v2380_v31, %v1906_v4  ;;  %2749 = vrot.lane.b32.xlu0 %v4187_v59, %s4331_s18  ;;  %v6603_v59 = vld [vmem:[#allocation37_spill] sm:$0xff] }
 0x2c6   :  { %6595 = vst [vmem:[#allocation18_spill] sm:$0xff] %v5716_v47  ;;  %4198 = vtanh.f32 %v5716_v47  ;;  %v1909_v14 = vmul.f32 %v6527_v7, %v6603_v59 }
 0x2c7   :  { %6596 = vst [vmem:[#allocation21_spill] sm:$0xff] %v5718_v12  ;;  %4200 = vtanh.f32 %v5718_v12  ;;  %2751 = vrot.lane.b32.xlu1 %v4189_v60, %s4331_s18  ;;  %v2382_v62 = vpop.permute.xlu0 %2381  ;;  %v1910_v12 = vmul.f32 %v6528_v34, %v6604_v49  ;;  %v6608_v49 = vld [vmem:[#allocation38_spill] sm:$0xff] }
 0x2c8   :  { %v4191_v30 = vpop.eup %4190  ;;  %v5728_v0 = vadd.f32 %v2382_v62, %v1907_v3  ;;  %v2384_v4 = vpop.permute.xlu1 %2383 }
 0x2c9   :  { %v4193_v31 = vpop.eup %4192  ;;  %v5730_v8 = vadd.f32 %v2384_v4, %v1908_v17  ;;  %2753 = vrot.lane.b32.xlu0 %v4191_v30, %s4331_s18  ;;  %v6607_v30 = vld [vmem:[#allocation39_spill] sm:$0xff] }
 0x2ca   :  { %6601 = vst [vmem:[#allocation20_spill] sm:$0xff] %v5728_v0  ;;  %4202 = vtanh.f32 %v5728_v0  ;;  %v1911_v59 = vmul.f32 %v6529_v51, %v6607_v30 }
 0x2cb   :  { %6602 = vst [vmem:[#allocation23_spill] sm:$0xff] %v5730_v8  ;;  %4204 = vtanh.f32 %v5730_v8  ;;  %2755 = vrot.lane.b32.xlu1 %v4193_v31, %s4331_s18  ;;  %v2386_v3 = vpop.permute.xlu0 %2385  ;;  %v1912_v8 = vmul.f32 %v6530_v24, %v6608_v49  ;;  %v6612_v49 = vld [vmem:[#allocation42_spill] sm:$0xff] }
 0x2cc   :  { %v4195_v60 = vpop.eup %4194  ;;  %v5740_v62 = vadd.f32 %v2386_v3, %v1909_v14  ;;  %v2388_v17 = vpop.permute.xlu1 %2387 }
 0x2cd   :  { %v4197_v4 = vpop.eup %4196  ;;  %v5742_v47 = vadd.f32 %v2388_v17, %v1910_v12  ;;  %2757 = vrot.lane.b32.xlu0 %v4195_v60, %s4331_s18  ;;  %v6611_v60 = vld [vmem:[#allocation44_spill] sm:$0xff] }
 0x2ce   :  { %6605 = vst [vmem:[#allocation22_spill] sm:$0xff] %v5740_v62  ;;  %4206 = vtanh.f32 %v5740_v62  ;;  %v1913_v30 = vmul.f32 %v5204_v38, %v6611_v60 }
 0x2cf   :  { %6606 = vst [vmem:[#allocation25_spill] sm:$0xff] %v5742_v47  ;;  %4208 = vtanh.f32 %v5742_v47  ;;  %2759 = vrot.lane.b32.xlu1 %v4197_v4, %s4331_s18  ;;  %v2390_v31 = vpop.permute.xlu0 %2389  ;;  %v1914_v47 = vmul.f32 %v5226_v19, %v6612_v49  ;;  %v6616_v49 = vld [vmem:[#allocation45_spill] sm:$0xff] }
 0x2d0   :  { %v4199_v14 = vpop.eup %4198  ;;  %v5752_v3 = vadd.f32 %v2390_v31, %v1911_v59  ;;  %v2392_v12 = vpop.permute.xlu1 %2391 }
 0x2d1   :  { %v4201_v17 = vpop.eup %4200  ;;  %v5754_v0 = vadd.f32 %v2392_v12, %v1912_v8  ;;  %2761 = vrot.lane.b32.xlu0 %v4199_v14, %s4331_s18  ;;  %v6615_v14 = vld [vmem:[#allocation46_spill] sm:$0xff] }
 0x2d2   :  { %6609 = vst [vmem:[#allocation24_spill] sm:$0xff] %v5752_v3  ;;  %4210 = vtanh.f32 %v5752_v3  ;;  %v1915_v60 = vmul.f32 %v5235_v61, %v6615_v14 }
 0x2d3   :  { %6610 = vst [vmem:[#allocation27_spill] sm:$0xff] %v5754_v0  ;;  %4212 = vtanh.f32 %v5754_v0  ;;  %2763 = vrot.lane.b32.xlu1 %v4201_v17, %s4331_s18  ;;  %v2394_v4 = vpop.permute.xlu0 %2393  ;;  %v1916_v0 = vmul.f32 %v5250_v20, %v6616_v49  ;;  %v6620_v49 = vld [vmem:[#allocation47_spill] sm:$0xff] }
 0x2d4   :  { %v4203_v59 = vpop.eup %4202  ;;  %v5764_v31 = vadd.f32 %v2394_v4, %v1913_v30  ;;  %v2396_v8 = vpop.permute.xlu1 %2395 }
 0x2d5   :  { %v4205_v12 = vpop.eup %4204  ;;  %v5766_v62 = vadd.f32 %v2396_v8, %v1914_v47  ;;  %2765 = vrot.lane.b32.xlu0 %v4203_v59, %s4331_s18  ;;  %v6619_v59 = vld [vmem:[#allocation48_spill] sm:$0xff] }
 0x2d6   :  { %6613 = vst [vmem:[#allocation26_spill] sm:$0xff] %v5764_v31  ;;  %4214 = vtanh.f32 %v5764_v31  ;;  %v1917_v14 = vmul.f32 %v5260_v22, %v6619_v59 }
 0x2d7   :  { %6614 = vst [vmem:[#allocation29_spill] sm:$0xff] %v5766_v62  ;;  %4216 = vtanh.f32 %v5766_v62  ;;  %2767 = vrot.lane.b32.xlu1 %v4205_v12, %s4331_s18  ;;  %v2398_v17 = vpop.permute.xlu0 %2397  ;;  %v1918_v62 = vmul.f32 %v5274_v16, %v6620_v49  ;;  %v6624_v49 = vld [vmem:[#allocation49_spill] sm:$0xff] }
 0x2d8   :  { %v4207_v30 = vpop.eup %4206  ;;  %v5776_v4 = vadd.f32 %v2398_v17, %v1915_v60  ;;  %v2400_v47 = vpop.permute.xlu1 %2399 }
 0x2d9   :  { %v4209_v8 = vpop.eup %4208  ;;  %v5778_v3 = vadd.f32 %v2400_v47, %v1916_v0  ;;  %2769 = vrot.lane.b32.xlu0 %v4207_v30, %s4331_s18  ;;  %v6623_v30 = vld [vmem:[#allocation50_spill] sm:$0xff] }
 0x2da   :  { %6617 = vst [vmem:[#allocation55_spill] sm:$0xff] %v5776_v4  ;;  %4218 = vtanh.f32 %v5776_v4  ;;  %v1919_v59 = vmul.f32 %v5286_v55, %v6623_v30 }
 0x2db   :  { %6618 = vst [vmem:[#allocation28_spill] sm:$0xff] %v5778_v3  ;;  %4220 = vtanh.f32 %v5778_v3  ;;  %2771 = vrot.lane.b32.xlu1 %v4209_v8, %s4331_s18  ;;  %v2402_v12 = vpop.permute.xlu0 %2401  ;;  %v1920_v3 = vmul.f32 %v5302_v35, %v6624_v49  ;;  %v6628_v49 = vld [vmem:[#allocation72_spill] sm:$0xff] }
 0x2dc   :  { %v4211_v60 = vpop.eup %4210  ;;  %v5788_v17 = vadd.f32 %v2402_v12, %v1917_v14  ;;  %v2404_v0 = vpop.permute.xlu1 %2403 }
 0x2dd   :  { %v4213_v47 = vpop.eup %4212  ;;  %v5790_v31 = vadd.f32 %v2404_v0, %v1918_v62  ;;  %2773 = vrot.lane.b32.xlu0 %v4211_v60, %s4331_s18  ;;  %v6627_v60 = vld [vmem:[#allocation73_spill] sm:$0xff] }
 0x2de   :  { %6621 = vst [vmem:[#allocation31_spill] sm:$0xff] %v5788_v17  ;;  %4222 = vtanh.f32 %v5788_v17  ;;  %v1929_v30 = vmul.f32 %v5316_v10, %v6627_v60 }
 0x2df   :  { %6622 = vst [vmem:[#allocation30_spill] sm:$0xff] %v5790_v31  ;;  %4224 = vtanh.f32 %v5790_v31  ;;  %2775 = vrot.lane.b32.xlu1 %v4213_v47, %s4331_s18  ;;  %v2406_v8 = vpop.permute.xlu0 %2405  ;;  %v1930_v31 = vmul.f32 %v5311_v44, %v6628_v49  ;;  %v6632_v49 = vld [vmem:[#allocation74_spill] sm:$0xff] }
 0x2e0   :  { %v4215_v14 = vpop.eup %4214  ;;  %v5800_v12 = vadd.f32 %v2406_v8, %v1919_v59  ;;  %v2408_v62 = vpop.permute.xlu1 %2407 }
 0x2e1   :  { %v4217_v0 = vpop.eup %4216  ;;  %v5802_v4 = vadd.f32 %v2408_v62, %v1920_v3  ;;  %2777 = vrot.lane.b32.xlu0 %v4215_v14, %s4331_s18  ;;  %v6631_v14 = vld [vmem:[#allocation52_spill] sm:$0xff] }
 0x2e2   :  { %6625 = vst [vmem:[#allocation33_spill] sm:$0xff] %v5800_v12  ;;  %4226 = vtanh.f32 %v5800_v12  ;;  %v1921_v60 = vmul.f32 %v5323_v11, %v6631_v14 }
 0x2e3   :  { %6626 = vst [vmem:[#allocation32_spill] sm:$0xff] %v5802_v4  ;;  %4228 = vtanh.f32 %v5802_v4  ;;  %2779 = vrot.lane.b32.xlu1 %v4217_v0, %s4331_s18  ;;  %v2426_v47 = vpop.permute.xlu0 %2425  ;;  %v1932_v4 = vmul.f32 %v5329_v25, %v6632_v49  ;;  %v6636_v49 = vld [vmem:[#allocation51_spill] sm:$0xff] }
 0x2e4   :  { %v4219_v59 = vpop.eup %4218  ;;  %v5812_v8 = vadd.f32 %v2426_v47, %v1929_v30  ;;  %v2428_v3 = vpop.permute.xlu1 %2427 }
 0x2e5   :  { %v4221_v62 = vpop.eup %4220  ;;  %v5814_v17 = vadd.f32 %v2428_v3, %v1930_v31  ;;  %2781 = vrot.lane.b32.xlu0 %v4219_v59, %s4331_s18  ;;  %v6635_v59 = vld [vmem:[#allocation75_spill] sm:$0xff] }
 0x2e6   :  { %6629 = vst [vmem:[#allocation35_spill] sm:$0xff] %v5812_v8  ;;  %4230 = vtanh.f32 %v5812_v8  ;;  %v1931_v14 = vmul.f32 %v5339_v54, %v6635_v59 }
 0x2e7   :  { %6630 = vst [vmem:[#allocation65_spill] sm:$0xff] %v5814_v17  ;;  %4232 = vtanh.f32 %v5814_v17  ;;  %2783 = vrot.lane.b32.xlu1 %v4221_v62, %s4331_s18  ;;  %v2410_v0 = vpop.permute.xlu0 %2409 }
 0x2e8   :  { %v4223_v30 = vpop.eup %4222  ;;  %v5824_v47 = vadd.f32 %v2410_v0, %v1921_v60  ;;  %v2432_v31 = vpop.permute.xlu1 %2431  ;;  %v1922_v60 = vmul.f32 %v5342_v56, %v6636_v49  ;;  %v6672_v56 = vld [vmem:[#allocation67_spill] sm:$0xff] }
 0x2e9   :  { %v4225_v3 = vpop.eup %4224  ;;  %v5826_v12 = vadd.f32 %v2432_v31, %v1932_v4  ;;  %2785 = vrot.lane.b32.xlu0 %v4223_v30, %s4331_s18  ;;  %v6639_v30 = vld [vmem:[#allocation77_spill] sm:$0xff] }
 0x2ea   :  { %6633 = vst [vmem:[#allocation34_spill] sm:$0xff] %v5824_v47  ;;  %4234 = vtanh.f32 %v5824_v47  ;;  %v1933_v59 = vmul.f32 %v5345_v57, %v6639_v30  ;;  %v1927_v57 = vmul.f32 %v6545_v23, %v6672_v56 }
 0x2eb   :  { %6634 = vst [vmem:[#allocation64_spill] sm:$0xff] %v5826_v12  ;;  %4236 = vtanh.f32 %v5826_v12  ;;  %2787 = vrot.lane.b32.xlu1 %v4225_v3, %s4331_s18  ;;  %v2430_v62 = vpop.permute.xlu0 %2429  ;;  %v6640_v12 = vld [vmem:[#allocation76_spill] sm:$0xff] }
 0x2ec   :  { %v4227_v0 = vpop.eup %4226  ;;  %v5836_v17 = vadd.f32 %v2430_v62, %v1931_v14  ;;  %v2412_v4 = vpop.permute.xlu1 %2411  ;;  %v1934_v3 = vmul.f32 %v5355_v53, %v6640_v12  ;;  %v6644_v12 = vld [vmem:[#allocation78_spill] sm:$0xff] }
 0x2ed   :  { %v4229_v31 = vpop.eup %4228  ;;  %v5838_v8 = vadd.f32 %v2412_v4, %v1922_v60  ;;  %2789 = vrot.lane.b32.xlu0 %v4227_v0, %s4331_s18  ;;  %v6643_v0 = vld [vmem:[#allocation57_spill] sm:$0xff] }
 0x2ee   :  { %6637 = vst [vmem:[#allocation37_spill] sm:$0xff] %v5836_v17  ;;  %4238 = vtanh.f32 %v5836_v17  ;;  %v1923_v30 = vmul.f32 %v5359_v29, %v6643_v0  ;;  %v6645_v17 = vld [vmem:[#allocation91_spill] sm:$0xff] }
 0x2ef   :  { %6638 = vst [vmem:[#allocation36_spill] sm:$0xff] %v5838_v8  ;;  %4240 = vtanh.f32 %v5838_v8  ;;  %2791 = vrot.lane.b32.xlu1 %v4229_v31, %s4331_s18  ;;  %v2434_v14 = vpop.permute.xlu0 %2433  ;;  %v1936_v8 = vmul.f32 %v6645_v17, %v6644_v12  ;;  %v6650_v12 = vld [vmem:[#allocation56_spill] sm:$0xff] }
 0x2f0   :  { %v4231_v62 = vpop.eup %4230  ;;  %v5848_v49 = vadd.f32 %v2434_v14, %v1933_v59  ;;  %v2436_v60 = vpop.permute.xlu1 %2435 }
 0x2f1   :  { %v4233_v4 = vpop.eup %4232  ;;  %v5850_v47 = vadd.f32 %v2436_v60, %v1934_v3  ;;  %2809 = vrot.lane.b32.xlu0 %v4231_v62, %s4331_s18  ;;  %v6648_v62 = vld [vmem:[#allocation79_spill] sm:$0xff] }
 0x2f2   :  { %6641 = vst [vmem:[#allocation39_spill] sm:$0xff] %v5848_v49  ;;  %4242 = vtanh.f32 %v5848_v49  ;;  %v6649_v49 = vld [vmem:[#allocation93_spill] sm:$0xff] }
 0x2f3   :  { %6642 = vst [vmem:[#allocation38_spill] sm:$0xff] %v5850_v47  ;;  %4244 = vtanh.f32 %v5850_v47  ;;  %2811 = vrot.lane.b32.xlu1 %v4233_v4, %s4331_s18  ;;  %v2414_v31 = vpop.permute.xlu0 %2413  ;;  %v1935_v0 = vmul.f32 %v6649_v49, %v6648_v62  ;;  %v6651_v47 = vld [vmem:[#allocation94_spill] sm:$0xff]  ;;  %v6655_v62 = vld [vmem:[#allocation96_spill] sm:$0xff] }
 0x2f4   :  { %v4235_v59 = vpop.eup %4234  ;;  %v5860_v14 = vadd.f32 %v2414_v31, %v1923_v30  ;;  %v2440_v3 = vpop.permute.xlu1 %2439  ;;  %v1924_v30 = vmul.f32 %v6651_v47, %v6650_v12 }
 0x2f5   :  { %v4237_v60 = vpop.eup %4236  ;;  %v5862_v53 = vadd.f32 %v2440_v3, %v1936_v8  ;;  %2793 = vrot.lane.b32.xlu0 %v4235_v59, %s4331_s18  ;;  %v6654_v59 = vld [vmem:[#allocation81_spill] sm:$0xff] }
 0x2f6   :  { %6646 = vst [vmem:[#allocation44_spill] sm:$0xff] %v5860_v14  ;;  %4246 = vtanh.f32 %v5860_v14  ;;  %v1937_v14 = vmul.f32 %v6655_v62, %v6654_v59  ;;  %v6661_v59 = vld [vmem:[#allocation97_spill] sm:$0xff] }
 0x2f7   :  { %6647 = vst [vmem:[#allocation42_spill] sm:$0xff] %v5862_v53  ;;  %4248 = vtanh.f32 %v5862_v53  ;;  %2815 = vrot.lane.b32.xlu1 %v4237_v60, %s4331_s18  ;;  %v2438_v4 = vpop.permute.xlu0 %2437  ;;  %v6656_v53 = vld [vmem:[#allocation80_spill] sm:$0xff]  ;;  %v6657_v60 = vld [vmem:[#allocation95_spill] sm:$0xff] }
 0x2f8   :  { %v4239_v31 = vpop.eup %4238  ;;  %v5872_v17 = vadd.f32 %v2438_v4, %v1935_v0  ;;  %v2416_v8 = vpop.permute.xlu1 %2415  ;;  %v1938_v49 = vmul.f32 %v6657_v60, %v6656_v53  ;;  %v6662_v53 = vld [vmem:[#allocation82_spill] sm:$0xff] }
 0x2f9   :  { %v4241_v3 = vpop.eup %4240  ;;  %v5874_v29 = vadd.f32 %v2416_v8, %v1924_v30  ;;  %2813 = vrot.lane.b32.xlu0 %v4239_v31, %s4331_s18  ;;  %v6660_v31 = vld [vmem:[#allocation63_spill] sm:$0xff]  ;;  %v6663_v60 = vld [vmem:[#allocation98_spill] sm:$0xff] }
 0x2fa   :  { %6652 = vst [vmem:[#allocation46_spill] sm:$0xff] %v5872_v17  ;;  %4250 = vtanh.f32 %v5872_v17  ;;  %v1925_v17 = vmul.f32 %v6661_v59, %v6660_v31 }
 0x2fb   :  { %6653 = vst [vmem:[#allocation45_spill] sm:$0xff] %v5874_v29  ;;  %4252 = vtanh.f32 %v5874_v29  ;;  %2795 = vrot.lane.b32.xlu1 %v4241_v3, %s4331_s18  ;;  %v2442_v0 = vpop.permute.xlu0 %2441  ;;  %v1940_v29 = vmul.f32 %v6663_v60, %v6662_v53 }
 0x2fc   :  { %v4243_v4 = vpop.eup %4242  ;;  %v5884_v12 = vadd.f32 %v2442_v0, %v1937_v14  ;;  %v2444_v30 = vpop.permute.xlu1 %2443 }
 0x2fd   :  { %v4245_v8 = vpop.eup %4244  ;;  %v5886_v47 = vadd.f32 %v2444_v30, %v1938_v49  ;;  %2817 = vrot.lane.b32.xlu0 %v4243_v4, %s4331_s18  ;;  %v6666_v4 = vld [vmem:[#allocation83_spill] sm:$0xff] }
 0x2fe   :  { %6658 = vst [vmem:[#allocation48_spill] sm:$0xff] %v5884_v12  ;;  %4254 = vtanh.f32 %v5884_v12  ;;  %v6667_v12 = vld [vmem:[#allocation99_spill] sm:$0xff] }
 0x2ff   :  { %6659 = vst [vmem:[#allocation47_spill] sm:$0xff] %v5886_v47  ;;  %4256 = vtanh.f32 %v5886_v47  ;;  %2819 = vrot.lane.b32.xlu1 %v4245_v8, %s4331_s18  ;;  %v2418_v14 = vpop.permute.xlu0 %2417  ;;  %v1939_v31 = vmul.f32 %v6667_v12, %v6666_v4 }
 0x300   :  { %v4247_v3 = vpop.eup %4246  ;;  %v5896_v0 = vadd.f32 %v2418_v14, %v1925_v17  ;;  %v2448_v49 = vpop.permute.xlu1 %2447 }
 0x301   :  { %v4249_v30 = vpop.eup %4248  ;;  %v5898_v62 = vadd.f32 %v2448_v49, %v1940_v29  ;;  %2797 = vrot.lane.b32.xlu0 %v4247_v3, %s4331_s18 }
 0x302   :  { %6664 = vst [vmem:[#allocation50_spill] sm:$0xff] %v5896_v0  ;;  %4258 = vtanh.f32 %v5896_v0  ;;  %v6669_v0 = vld [vmem:[#allocation87_spill] sm:$0xff] }
 0x303   :  { %6665 = vst [vmem:[#allocation49_spill] sm:$0xff] %v5898_v62  ;;  %4260 = vtanh.f32 %v5898_v62  ;;  %2823 = vrot.lane.b32.xlu1 %v4249_v30, %s4331_s18  ;;  %v2446_v8 = vpop.permute.xlu0 %2445  ;;  %v1941_v62 = vmul.f32 %v6538_v39, %v6669_v0  ;;  %v6670_v30 = vld [vmem:[#allocation62_spill] sm:$0xff] }
 0x304   :  { %v4251_v53 = vpop.eup %4250  ;;  %v5906_v47 = vadd.f32 %v2446_v8, %v1939_v31  ;;  %v2420_v17 = vpop.permute.xlu1 %2419  ;;  %v6671_v31 = vld [vmem:[#allocation100_spill] sm:$0xff]  ;;  %v6673_v0 = vld [vmem:[#allocation86_spill] sm:$0xff] }
 0x305   :  { %v4253_v14 = vpop.eup %4252  ;;  %2821 = vrot.lane.b32.xlu0 %v4251_v53, %s4331_s18  ;;  %v1926_v8 = vmul.f32 %v6671_v31, %v6670_v30 }
 0x306   :  { %6668 = vst [vmem:[#allocation73_spill] sm:$0xff] %v5906_v47  ;;  %4262 = vtanh.f32 %v5906_v47 }
 0x307   :  { %2799 = vrot.lane.b32.xlu1 %v4253_v14, %s4331_s18  ;;  %v2450_v29 = vpop.permute.xlu0 %2449  ;;  %v5919_v59 = vadd.f32 %v2420_v17, %v1926_v8 }
 0x308   :  { %v4255_v3 = vpop.eup %4254  ;;  %v2452_v49 = vpop.permute.xlu1 %2451  ;;  %v5916_v60 = vadd.f32 %v2450_v29, %v1941_v62 }
 0x309   :  { %v4257_v4 = vpop.eup %4256  ;;  %2825 = vrot.lane.b32.xlu0 %v4255_v3, %s4331_s18  ;;  %v1942_v3 = vmul.f32 %v6541_v21, %v6673_v0  ;;  %v6677_v0 = vld [vmem:[#allocation92_spill] sm:$0xff] }
 0x30a   :  { %4264 = vtanh.f32 %v5916_v60 }
 0x30b   :  { %2827 = vrot.lane.b32.xlu1 %v4257_v4, %s4331_s18  ;;  %v2422_v53 = vpop.permute.xlu0 %2421  ;;  %4266 = vtanh.f32 %v5919_v59  ;;  %v5931_v17 = vadd.f32 %v2452_v49, %v1942_v3  ;;  %v6678_v49 = vld [vmem:[#allocation90_spill] sm:$0xff] }
 0x30c   :  { %v4259_v47 = vpop.eup %4258  ;;  %v2456_v12 = vpop.permute.xlu1 %2455  ;;  %v5927_v62 = vadd.f32 %v2422_v53, %v1927_v57  ;;  %v1943_v57 = vmul.f32 %v6550_v63, %v6677_v0  ;;  %v1944_v3 = vmul.f32 %v6547_v9, %v6678_v49 }
 0x30d   :  { %v4261_v14 = vpop.eup %4260  ;;  %2801 = vrot.lane.b32.xlu0 %v4259_v47, %s4331_s18  ;;  %6675 = vst [vmem:[#allocation52_spill] sm:$0xff] %v5931_v17  ;;  %v6676_v47 = vld [vmem:[#allocation41_spill] sm:$0xff] }
 0x30e   :  { %6674 = vst [vmem:[#allocation72_spill] sm:$0xff] %v5927_v62  ;;  %4268 = vtanh.f32 %v5927_v62 }
 0x30f   :  { %2831 = vrot.lane.b32.xlu1 %v4261_v14, %s4331_s18  ;;  %v2454_v29 = vpop.permute.xlu0 %2453  ;;  %4270 = vtanh.f32 %v5931_v17 }
 0x310   :  { %v4263_v4 = vpop.eup %4262 }
 0x311   :  { %v2424_v30 = vpop.permute.xlu1 %2423  ;;  %2829 = vrot.lane.b32.xlu0 %v4263_v4, %s4331_s18  ;;  %v5943_v4 = vadd.f32 %v2454_v29, %v1943_v57 }
 0x313   :  { %v2714_v56 = vpop.permute.xlu0 %2713  ;;  %6679 = vst [vmem:[#allocation74_spill] sm:$0xff] %v5943_v4  ;;  %4272 = vtanh.f32 %v5943_v4 }
 0x314   :  { %v2905_v8 = vmul.f32 %v6676_v47, %v2714_v56  ;;  %v4265_v56 = vpop.eup %4264  ;;  %v5946_v47 = vadd.f32 %v2456_v12, %v1944_v3 }
 0x315   :  { %v2716_v53 = vpop.permute.xlu1 %2715  ;;  %v4267_v17 = vpop.eup %4266 }
 0x316   :  { %v2906_v14 = vmul.f32 %v6536_v45, %v2716_v53  ;;  %3033 = vrot.lane.b32.xlu0 %v2905_v8, %s4332_s3  ;;  %6680 = vst [vmem:[#allocation75_spill] sm:$0xff] %v5946_v47  ;;  %4274 = vtanh.f32 %v5946_v47  ;;  %v6681_v53 = vld [vmem:[#allocation66_spill] sm:$0xff] }
 0x317   :  { %v2718_v62 = vpop.permute.xlu0 %2717  ;;  %v1928_v12 = vmul.f32 %v5446_v48, %v6681_v53 }
 0x318   :  { %3035 = vrot.lane.b32.xlu1 %v2906_v14, %s4332_s3  ;;  %v4269_v8 = vpop.eup %4268  ;;  %v2907_v49 = vmul.f32 %v5002_v58, %v2718_v62 }
 0x319   :  { %v2720_v0 = vpop.permute.xlu1 %2719  ;;  %v4271_v57 = vpop.eup %4270  ;;  %v5957_v3 = vadd.f32 %v2424_v30, %v1928_v12 }
 0x31a   :  { %2833 = vrot.lane.b32.xlu0 %v4265_v56, %s4331_s18 }
 0x31b   :  { %v2722_v45 = vpop.permute.xlu0 %2721  ;;  %4276 = vtanh.f32 %v5957_v3 }
 0x31c   :  { %2803 = vrot.lane.b32.xlu1 %v4267_v17, %s4331_s18  ;;  %v2908_v17 = vmul.f32 %v6543_v13, %v2720_v0  ;;  %v2909_v62 = vmul.f32 %v5016_v50, %v2722_v45 }
 0x31d   :  { %v2724_v29 = vpop.permute.xlu1 %2723 }
 0x31e   :  { %2805 = vrot.lane.b32.xlu0 %v4269_v8, %s4331_s18  ;;  %v4273_v8 = vpop.eup %4272  ;;  %v2910_v13 = vmul.f32 %v5012_v28, %v2724_v29 }
 0x31f   :  { %v2726_v14 = vpop.permute.xlu0 %2725 }
 0x320   :  { %2835 = vrot.lane.b32.xlu1 %v4271_v57, %s4331_s18  ;;  %v4275_v53 = vpop.eup %4274  ;;  %v2911_v57 = vmul.f32 %v5031_v43, %v2726_v14 }
 0x321   :  { %v2728_v56 = vpop.permute.xlu1 %2727 }
 0x322   :  { %3037 = vrot.lane.b32.xlu0 %v2907_v49, %s4332_s3  ;;  %v2912_v45 = vmul.f32 %v5022_v37, %v2728_v56 }
 0x323   :  { %v2730_v47 = vpop.permute.xlu0 %2729 }
 0x324   :  { %3039 = vrot.lane.b32.xlu1 %v2908_v17, %s4332_s3 }
 0x325   :  { %v2732_v4 = vpop.permute.xlu1 %2731  ;;  %v4277_v49 = vpop.eup %4276 }
 0x326   :  { %2837 = vrot.lane.b32.xlu0 %v4273_v8, %s4331_s18  ;;  %v2913_v8 = vmul.f32 %v5044_v2, %v2730_v47  ;;  %v2914_v14 = vmul.f32 %v5037_v33, %v2732_v4 }
 0x327   :  { %v2734_v58 = vpop.permute.xlu0 %2733 }
 0x328   :  { %2839 = vrot.lane.b32.xlu1 %v4275_v53, %s4331_s18  ;;  %v2915_v29 = vmul.f32 %v5058_v52, %v2734_v58 }
 0x329   :  { %v2736_v30 = vpop.permute.xlu1 %2735 }
 0x32a   :  { %3041 = vrot.lane.b32.xlu0 %v2909_v62, %s4332_s3  ;;  %v2916_v37 = vmul.f32 %v5049_v40, %v2736_v30 }
 0x32b   :  { %v2738_v0 = vpop.permute.xlu0 %2737 }
 0x32c   :  { %3043 = vrot.lane.b32.xlu1 %v2910_v13, %s4332_s3  ;;  %v2917_v2 = vmul.f32 %v5065_v6, %v2738_v0 }
 0x32d   :  { %v2740_v12 = vpop.permute.xlu1 %2739 }
 0x32e   :  { %3045 = vrot.lane.b32.xlu0 %v2911_v57, %s4332_s3  ;;  %v2918_v33 = vmul.f32 %v5062_v1, %v2740_v12 }
 0x32f   :  { %v2742_v17 = vpop.permute.xlu0 %2741 }
 0x330   :  { %2807 = vrot.lane.b32.xlu1 %v4277_v49, %s4331_s18  ;;  %v2919_v52 = vmul.f32 %v5080_v27, %v2742_v17  ;;  %v6682_v17 = vld [vmem:[#allocation54_spill] sm:$0xff]  ;;  %s4333_s18 = smov [#allocation5]  }
 0x331   :  { %v2744_v50 = vpop.permute.xlu1 %2743  ;;  %s3424_s13 = sshll.u32 %s4333_s18, 4  ;;  %s3425_s13 = int_to_ptr.vmem [resolvable:$true] %s3424_s13 }
 0x332   :  { %3049 = vrot.lane.b32.xlu0 %v2913_v8, %s4332_s3  ;;  %v2920_v40 = vmul.f32 %v5077_v32, %v2744_v50  ;;  %v6683_v50 = vld [vmem:[#allocation61_spill] sm:$0xff]  ;;  %s4301_s14 = scalar_lea.vmem %s3425_s13, 8192  ;;  %p4306_p9 = scmp.lt.s32.totalorder %s3425_s13, %s3425_s13 }
 0x333   :  { %v2746_v28 = vpop.permute.xlu0 %2745  ;;  %p4302_p8 = scmp.ne.s32.totalorder %s3425_s13, %s4301_s14  ;;  %p4307_p10 = scmp.lt.s32.totalorder %s4301_s14, %s4301_s14 }
 0x334   :  { %3047 = vrot.lane.b32.xlu1 %v2912_v45, %s4332_s3  ;;  %v2921_v6 = vmul.f32 %v5089_v42, %v2746_v28  ;;  %v6684_v28 = vld [vmem:[#allocation58_spill] sm:$0xff] }
 0x335   :  { %v2748_v43 = vpop.permute.xlu1 %2747  ;;  %p4308_p11 = por %p4307_p10, %p4306_p9 }
 0x336   :  { %3053 = vrot.lane.b32.xlu0 %v2915_v29, %s4332_s3  ;;  %v2922_v1 = vmul.f32 %v5086_v15, %v2748_v43 }
 0x337   :  { %v2750_v53 = vpop.permute.xlu0 %2749  ;;  %p4309_p12 = pnand %p4308_p11, %p4302_p8 }
 0x338   :  { %3051 = vrot.lane.b32.xlu1 %v2914_v14, %s4332_s3  ;;  %v2923_v27 = vmul.f32 %v5106_v36, %v2750_v53  ;;  %v6685_v14 = vld [vmem:[#allocation60_spill] sm:$0xff] }
 0x339   :  { %v2752_v47 = vpop.permute.xlu1 %2751 }
 0x33a   :  { %3057 = vrot.lane.b32.xlu0 %v2917_v2, %s4332_s3  ;;  %v2924_v32 = vmul.f32 %v6518_v46, %v2752_v47 }
 0x33b   :  { %v2754_v56 = vpop.permute.xlu0 %2753 }
 0x33c   :  { %3055 = vrot.lane.b32.xlu1 %v2916_v37, %s4332_s3  ;;  %v2925_v42 = vmul.f32 %v6582_v41, %v2754_v56 }
 0x33d   :  { %v2756_v58 = vpop.permute.xlu1 %2755 }
 0x33e   :  { %3061 = vrot.lane.b32.xlu0 %v2919_v52, %s4332_s3  ;;  %v2926_v15 = vmul.f32 %v6682_v17, %v2756_v58  ;;  %v6686_v17 = vld [vmem:[#allocation85_spill] sm:$0xff] }
 0x33f   :  { %v2758_v4 = vpop.permute.xlu0 %2757 }
 0x340   :  { %3059 = vrot.lane.b32.xlu1 %v2918_v33, %s4332_s3  ;;  %v2927_v36 = vmul.f32 %v6521_v5, %v2758_v4 }
 0x341   :  { %v2760_v62 = vpop.permute.xlu1 %2759 }
 0x342   :  { %3065 = vrot.lane.b32.xlu0 %v2921_v6, %s4332_s3  ;;  %v2928_v46 = vmul.f32 %v6684_v28, %v2760_v62 }
 0x343   :  { %v2762_v30 = vpop.permute.xlu0 %2761 }
 0x344   :  { %3063 = vrot.lane.b32.xlu1 %v2920_v40, %s4332_s3  ;;  %v2929_v41 = vmul.f32 %v6683_v50, %v2762_v30  ;;  %v6688_v50 = vld [vmem:[#allocation89_spill] sm:$0xff] }
 0x345   :  { %v2764_v13 = vpop.permute.xlu1 %2763 }
 0x346   :  { %3069 = vrot.lane.b32.xlu0 %v2923_v27, %s4332_s3  ;;  %v2930_v53 = vmul.f32 %v6685_v14, %v2764_v13 }
 0x347   :  { %v2766_v0 = vpop.permute.xlu0 %2765 }
 0x348   :  { %3067 = vrot.lane.b32.xlu1 %v2922_v1, %s4332_s3  ;;  %v2931_v5 = vmul.f32 %v6598_v18, %v2766_v0 }
 0x349   :  { %v2768_v57 = vpop.permute.xlu1 %2767 }
 0x34a   :  { %3073 = vrot.lane.b32.xlu0 %v2925_v42, %s4332_s3  ;;  %v2932_v56 = vmul.f32 %v6600_v26, %v2768_v57 }
 0x34b   :  { %v2770_v12 = vpop.permute.xlu0 %2769 }
 0x34c   :  { %3071 = vrot.lane.b32.xlu1 %v2924_v32, %s4332_s3  ;;  %v2933_v47 = vmul.f32 %v6527_v7, %v2770_v12 }
 0x34d   :  { %v2772_v49 = vpop.permute.xlu1 %2771 }
 0x34e   :  { %3077 = vrot.lane.b32.xlu0 %v2927_v36, %s4332_s3  ;;  %v2934_v33 = vmul.f32 %v6528_v34, %v2772_v49 }
 0x34f   :  { %v2774_v8 = vpop.permute.xlu0 %2773 }
 0x350   :  { %3075 = vrot.lane.b32.xlu1 %v2926_v15, %s4332_s3  ;;  %v2935_v18 = vmul.f32 %v6529_v51, %v2774_v8  ;;  %v6687_v15 = vld [vmem:[#allocation84_spill] sm:$0xff] }
 0x351   :  { %v2776_v45 = vpop.permute.xlu1 %2775 }
 0x352   :  { %3081 = vrot.lane.b32.xlu0 %v2929_v41, %s4332_s3  ;;  %v2936_v26 = vmul.f32 %v6530_v24, %v2776_v45  ;;  %v6689_v45 = vld [vmem:[#allocation88_spill] sm:$0xff] }
 0x353   :  { %v2778_v29 = vpop.permute.xlu0 %2777 }
 0x354   :  { %3079 = vrot.lane.b32.xlu1 %v2928_v46, %s4332_s3  ;;  %v2937_v7 = vmul.f32 %v5204_v38, %v2778_v29  ;;  %v6690_v46 = vld [vmem:[#allocation93_spill] sm:$0xff] }
 0x355   :  { %v2780_v43 = vpop.permute.xlu1 %2779 }
 0x356   :  { %3085 = vrot.lane.b32.xlu0 %v2931_v5, %s4332_s3  ;;  %v2938_v34 = vmul.f32 %v5226_v19, %v2780_v43  ;;  %v6691_v5 = vld [vmem:[#allocation91_spill] sm:$0xff] }
 0x357   :  { %v2782_v2 = vpop.permute.xlu0 %2781 }
 0x358   :  { %3083 = vrot.lane.b32.xlu1 %v2930_v53, %s4332_s3  ;;  %v2939_v51 = vmul.f32 %v5235_v61, %v2782_v2  ;;  %v6692_v53 = vld [vmem:[#allocation96_spill] sm:$0xff] }
 0x359   :  { %v2784_v37 = vpop.permute.xlu1 %2783 }
 0x35a   :  { %3089 = vrot.lane.b32.xlu0 %v2933_v47, %s4332_s3  ;;  %v2940_v24 = vmul.f32 %v5250_v20, %v2784_v37  ;;  %v6693_v37 = vld [vmem:[#allocation53_spill] sm:$0xff] }
 0x35b   :  { %v2786_v52 = vpop.permute.xlu0 %2785 }
 0x35c   :  { %3087 = vrot.lane.b32.xlu1 %v2932_v56, %s4332_s3  ;;  %v2941_v38 = vmul.f32 %v5260_v22, %v2786_v52  ;;  %v6694_v52 = vld [vmem:[#allocation94_spill] sm:$0xff] }
 0x35d   :  { %v2788_v58 = vpop.permute.xlu1 %2787 }
 0x35e   :  { %3093 = vrot.lane.b32.xlu0 %v2935_v18, %s4332_s3  ;;  %v2942_v19 = vmul.f32 %v5274_v16, %v2788_v58 }
 0x35f   :  { %v2790_v4 = vpop.permute.xlu0 %2789 }
 0x360   :  { %3091 = vrot.lane.b32.xlu1 %v2934_v33, %s4332_s3  ;;  %v2943_v61 = vmul.f32 %v5286_v55, %v2790_v4  ;;  %v6695_v4 = vld [vmem:[#allocation59_spill] sm:$0xff] }
 0x361   :  { %v2792_v6 = vpop.permute.xlu1 %2791 }
 0x362   :  { %3097 = vrot.lane.b32.xlu0 %v2937_v7, %s4332_s3  ;;  %v2944_v20 = vmul.f32 %v5302_v35, %v2792_v6  ;;  %v6696_v6 = vld [vmem:[#allocation97_spill] sm:$0xff] }
 0x363   :  { %v2810_v62 = vpop.permute.xlu0 %2809 }
 0x364   :  { %3095 = vrot.lane.b32.xlu1 %v2936_v26, %s4332_s3  ;;  %v2953_v22 = vmul.f32 %v5316_v10, %v2810_v62 }
 0x365   :  { %v2812_v40 = vpop.permute.xlu1 %2811 }
 0x366   :  { %3101 = vrot.lane.b32.xlu0 %v2939_v51, %s4332_s3  ;;  %v2954_v16 = vmul.f32 %v5311_v44, %v2812_v40  ;;  %v6697_v40 = vld [vmem:[#allocation95_spill] sm:$0xff] }
 0x367   :  { %v2794_v30 = vpop.permute.xlu0 %2793 }
 0x368   :  { %3099 = vrot.lane.b32.xlu1 %v2938_v34, %s4332_s3  ;;  %v2945_v55 = vmul.f32 %v5323_v11, %v2794_v30 }
 0x369   :  { %v2816_v27 = vpop.permute.xlu1 %2815 }
 0x36a   :  { %3105 = vrot.lane.b32.xlu0 %v2941_v38, %s4332_s3  ;;  %v2956_v36 = vmul.f32 %v5329_v25, %v2816_v27  ;;  %v6698_v38 = vld [vmem:[#allocation99_spill] sm:$0xff] }
 0x36b   :  { %v2814_v13 = vpop.permute.xlu0 %2813 }
 0x36c   :  { %3103 = vrot.lane.b32.xlu1 %v2940_v24, %s4332_s3  ;;  %v2955_v10 = vmul.f32 %v5339_v54, %v2814_v13  ;;  %v6699_v13 = vld [vmem:[#allocation98_spill] sm:$0xff] }
 0x36d   :  { %v2796_v1 = vpop.permute.xlu1 %2795 }
 0x36e   :  { %3109 = vrot.lane.b32.xlu0 %v2943_v61, %s4332_s3  ;;  %v2946_v8 = vmul.f32 %v6687_v15, %v2796_v1 }
 0x36f   :  { %v2818_v0 = vpop.permute.xlu0 %2817 }
 0x370   :  { %3107 = vrot.lane.b32.xlu1 %v2942_v19, %s4332_s3  ;;  %v2957_v11 = vmul.f32 %v6686_v17, %v2818_v0  ;;  %v6702_v17 = vld [vmem:[#allocation70_spill] sm:$0xff] }
 0x371   :  { %v2820_v42 = vpop.permute.xlu1 %2819 }
 0x372   :  { %3129 = vrot.lane.b32.xlu0 %v2953_v22, %s4332_s3  ;;  %v2958_v25 = vmul.f32 %v6689_v45, %v2820_v42  ;;  %v6700_v22 = vld [vmem:[#allocation69_spill] sm:$0xff] }
 0x373   :  { %v2798_v57 = vpop.permute.xlu0 %2797 }
 0x374   :  { %3111 = vrot.lane.b32.xlu1 %v2944_v20, %s4332_s3  ;;  %v2947_v41 = vmul.f32 %v6688_v50, %v2798_v57 }
 0x375   :  { %v2824_v32 = vpop.permute.xlu1 %2823 }
 0x376   :  { %3113 = vrot.lane.b32.xlu0 %v2945_v55, %s4332_s3  ;;  %v2960_v43 = vmul.f32 %v6691_v5, %v2824_v32  ;;  %v6701_v32 = vld [vmem:[#allocation68_spill] sm:$0xff] }
 0x377   :  { %v2822_v12 = vpop.permute.xlu0 %2821 }
 0x378   :  { %3131 = vrot.lane.b32.xlu1 %v2954_v16, %s4332_s3  ;;  %v2959_v29 = vmul.f32 %v6690_v46, %v2822_v12  ;;  %v6705_v46 = vld [vmem:[#allocation40_spill] sm:$0xff] }
 0x379   :  { %v2800_v35 = vpop.permute.xlu1 %2799 }
 0x37a   :  { %3133 = vrot.lane.b32.xlu0 %v2955_v10, %s4332_s3  ;;  %v2948_v18 = vmul.f32 %v6694_v52, %v2800_v35 }
 0x37b   :  { %v2826_v49 = vpop.permute.xlu0 %2825 }
 0x37c   :  { %3135 = vrot.lane.b32.xlu1 %v2956_v36, %s4332_s3  ;;  %v2961_v2 = vmul.f32 %v6692_v53, %v2826_v49  ;;  %v6706_v53 = vld [vmem:[#allocation11_spill] sm:$0xff] }
 0x37d   :  { %v2828_v54 = vpop.permute.xlu1 %2827 }
 0x37e   :  { %3137 = vrot.lane.b32.xlu0 %v2957_v11, %s4332_s3  ;;  %v2962_v34 = vmul.f32 %v6697_v40, %v2828_v54 }
 0x37f   :  { %v2802_v44 = vpop.permute.xlu0 %2801 }
 0x380   :  { %3115 = vrot.lane.b32.xlu1 %v2946_v8, %s4332_s3  ;;  %v2949_v26 = vmul.f32 %v6696_v6, %v2802_v44  ;;  %v6703_v8 = vld [vmem:[#allocation71_spill] sm:$0xff] }
 0x381   :  { %v2832_v14 = vpop.permute.xlu1 %2831 }
 0x382   :  { %3117 = vrot.lane.b32.xlu0 %v2947_v41, %s4332_s3  ;;  %v2964_v61 = vmul.f32 %v6699_v13, %v2832_v14 }
 0x383   :  { %v2830_v28 = vpop.permute.xlu0 %2829 }
 0x384   :  { %3139 = vrot.lane.b32.xlu1 %v2958_v25, %s4332_s3  ;;  %v2963_v27 = vmul.f32 %v6698_v38, %v2830_v28  ;;  %v6711_v38 = vld [vmem:[#allocation103_spill] sm:$0xff] }
 0x386   :  { %3141 = vrot.lane.b32.xlu0 %v2959_v29, %s4332_s3 }
 0x388   :  { %3143 = vrot.lane.b32.xlu1 %v2960_v43, %s4332_s3  ;;  %v3034_v47 = vpop.permute.xlu0 %3033 }
 0x389   :  { %v3226_v56 = vsel %vm3225_vm0, %v3034_v47, %v6693_v37 }
 0x38a   :  { %v3291_v58 = vsel %vm3290_vm1, %v3226_v56, 0.0  ;;  %v3036_v33 = vpop.permute.xlu1 %3035  ;;  %3145 = vrot.lane.b32.xlu0 %v2961_v2, %s4332_s3 }
 0x38b   :  { %3355 = vst [vmem:[#allocation5] sm:$0xff] %v3291_v58  ;;  %v3227_v7 = vsel %vm3225_vm0, %v3036_v33, %v6695_v4  ;;  %v6708_v58 = vld [vmem:[#allocation101_spill] sm:$0xff] }
 0x38c   :  { %v3292_v62 = vsel %vm3290_vm1, %v3227_v7, 0.0  ;;  %3119 = vrot.lane.b32.xlu1 %v2948_v18, %s4332_s3  ;;  %v2834_v51 = vpop.permute.xlu0 %2833  ;;  %v6709_v7 = vld [vmem:[#allocation10_spill] sm:$0xff] }
 0x38d   :  { %3356 = vst [vmem:[#allocation5 + $0x8] sm:$0xff] %v3292_v62  ;;  %v2965_v19 = vmul.f32 %v6538_v39, %v2834_v51  ;;  %v6710_v51 = vld [vmem:[#allocation102_spill] sm:$0xff] }
 0x38e   :  { %v2804_v30 = vpop.permute.xlu1 %2803  ;;  %3121 = vrot.lane.b32.xlu0 %v2949_v26, %s4332_s3 }
 0x38f   :  { %v2950_v20 = vmul.f32 %v6671_v31, %v2804_v30 }
 0x390   :  { %3147 = vrot.lane.b32.xlu1 %v2962_v34, %s4332_s3  ;;  %v2806_v24 = vpop.permute.xlu0 %2805 }
 0x391   :  { %v2951_v12 = vmul.f32 %v6545_v23, %v2806_v24 }
 0x392   :  { %v2836_v1 = vpop.permute.xlu1 %2835  ;;  %3149 = vrot.lane.b32.xlu0 %v2963_v27, %s4332_s3 }
 0x393   :  { %v2966_v36 = vmul.f32 %v6541_v21, %v2836_v1 }
 0x394   :  { %3151 = vrot.lane.b32.xlu1 %v2964_v61, %s4332_s3  ;;  %v3038_v0 = vpop.permute.xlu0 %3037  ;;  %v6712_v61 = vld [vmem:[#allocation43_spill] sm:$0xff] }
 0x395   :  { %v3228_v42 = vsel %vm3225_vm0, %v3038_v0, %v6700_v22  ;;  %v6713_v22 = vld [vmem:[#allocation12_spill] sm:$0xff] }
 0x396   :  { %v3293_v57 = vsel %vm3290_vm1, %v3228_v42, 0.0  ;;  %v3040_v55 = vpop.permute.xlu1 %3039  ;;  %3153 = vrot.lane.b32.xlu0 %v2965_v19, %s4332_s3 }
 0x397   :  { %3357 = vst [vmem:[#allocation5 + $0x10] sm:$0xff] %v3293_v57  ;;  %v3229_v16 = vsel %vm3225_vm0, %v3040_v55, %v6701_v32  ;;  %v6714_v55 = vld [vmem:[#allocation104_spill] sm:$0xff] }
 0x398   :  { %v3294_v39 = vsel %vm3290_vm1, %v3229_v16, 0.0  ;;  %3123 = vrot.lane.b32.xlu1 %v2950_v20, %s4332_s3  ;;  %v2838_v10 = vpop.permute.xlu0 %2837 }
 0x399   :  { %3358 = vst [vmem:[#allocation5 + $0x18] sm:$0xff] %v3294_v39  ;;  %v2967_v35 = vmul.f32 %v6550_v63, %v2838_v10  ;;  %v6704_v63 = vld [vmem:[#allocation9_spill] sm:$0xff] }
 0x39a   :  { %v2840_v31 = vpop.permute.xlu1 %2839  ;;  %3125 = vrot.lane.b32.xlu0 %v2951_v12, %s4332_s3  ;;  %v6715_v39 = vld [vmem:[#allocation105_spill] sm:$0xff] }
 0x39b   :  { %v2968_v14 = vmul.f32 %v6547_v9, %v2840_v31 }
 0x39c   :  { %3155 = vrot.lane.b32.xlu1 %v2966_v36, %s4332_s3  ;;  %v3042_v49 = vpop.permute.xlu0 %3041 }
 0x39d   :  { %v3230_v11 = vsel %vm3225_vm0, %v3042_v49, %v6702_v17 }
 0x39e   :  { %v3295_v23 = vsel %vm3290_vm1, %v3230_v11, 0.0  ;;  %v3044_v15 = vpop.permute.xlu1 %3043  ;;  %3157 = vrot.lane.b32.xlu0 %v2967_v35, %s4332_s3  ;;  %v6716_v35 = vld [vmem:[#allocation13_spill] sm:$0xff] }
 0x39f   :  { %3359 = vst [vmem:[#allocation5 + $0x20] sm:$0xff] %v3295_v23  ;;  %v3231_v21 = vsel %vm3225_vm0, %v3044_v15, %v6703_v8  ;;  %v6717_v23 = vld [vmem:[#allocation14_spill] sm:$0xff] }
 0x3a0   :  { %v3296_v44 = vsel %vm3290_vm1, %v3231_v21, 0.0  ;;  %v3046_v50 = vpop.permute.xlu0 %3045 }
 0x3a1   :  { %3360 = vst [vmem:[#allocation5 + $0x28] sm:$0xff] %v3296_v44  ;;  %v3232_v41 = vsel %vm3225_vm0, %v3046_v50, %v6704_v63  ;;  %v6718_v44 = vld [vmem:[#allocation15_spill] sm:$0xff] }
 0x3a2   :  { %v3297_v54 = vsel %vm3290_vm1, %v3232_v41, 0.0  ;;  %v2808_v45 = vpop.permute.xlu1 %2807 }
 0x3a3   :  { %3361 = vst [vmem:[#allocation5 + $0x30] sm:$0xff] %v3297_v54  ;;  %v2952_v25 = vmul.f32 %v5446_v48, %v2808_v45  ;;  %v6707_v48 = vld [vmem:[#allocation8_spill] sm:$0xff] }
 0x3a4   :  { %v3050_v28 = vpop.permute.xlu0 %3049  ;;  %v6719_v54 = vld [vmem:[#allocation16_spill] sm:$0xff] }
 0x3a5   :  { %v3234_v29 = vsel %vm3225_vm0, %v3050_v28, %v6705_v46  ;;  %3127 = vrot.lane.b32.xlu1 %v2952_v25, %s4332_s3  ;;  %v6720_v46 = vld [vmem:[#allocation17_spill] sm:$0xff] }
 0x3a6   :  { %v3299_v5 = vsel %vm3290_vm1, %v3234_v29, 0.0  ;;  %v3048_v43 = vpop.permute.xlu1 %3047 }
 0x3a7   :  { %3363 = vst [vmem:[#allocation5 + $0x40] sm:$0xff] %v3299_v5  ;;  %v3233_v2 = vsel %vm3225_vm0, %v3048_v43, %v6706_v53 }
 0x3a8   :  { %v3298_v47 = vsel %vm3290_vm1, %v3233_v2, 0.0  ;;  %v3054_v37 = vpop.permute.xlu0 %3053 }
 0x3a9   :  { %3362 = vst [vmem:[#allocation5 + $0x38] sm:$0xff] %v3298_v47  ;;  %v3236_v56 = vsel %vm3225_vm0, %v3054_v37, %v6707_v48  ;;  %3159 = vrot.lane.b32.xlu1 %v2968_v14, %s4332_s3  ;;  %v6721_v14 = vld [vmem:[#allocation18_spill] sm:$0xff]  ;;  %v6722_v37 = vld [vmem:[#allocation19_spill] sm:$0xff] }
 0x3aa   :  { %v3301_v52 = vsel %vm3290_vm1, %v3236_v56, 0.0  ;;  %v3052_v18 = vpop.permute.xlu1 %3051 }
 0x3ab   :  { %3365 = vst [vmem:[#allocation5 + $0x50] sm:$0xff] %v3301_v52  ;;  %v3235_v9 = vsel %vm3225_vm0, %v3052_v18, %v6708_v58  ;;  %v6723_v18 = vld [vmem:[#allocation20_spill] sm:$0xff] }
 0x3ac   :  { %v3300_v33 = vsel %vm3290_vm1, %v3235_v9, 0.0  ;;  %v3058_v4 = vpop.permute.xlu0 %3057 }
 0x3ad   :  { %3364 = vst [vmem:[#allocation5 + $0x48] sm:$0xff] %v3300_v33  ;;  %v3238_v6 = vsel %vm3225_vm0, %v3058_v4, %v6709_v7  ;;  %v6724_v4 = vld [vmem:[#allocation21_spill] sm:$0xff] }
 0x3ae   :  { %v3303_v26 = vsel %vm3290_vm1, %v3238_v6, 0.0  ;;  %v3056_v62 = vpop.permute.xlu1 %3055 }
 0x3af   :  { %3367 = vst [vmem:[#allocation5 + $0x60] sm:$0xff] %v3303_v26  ;;  %v3237_v40 = vsel %vm3225_vm0, %v3056_v62, %v6710_v51  ;;  %v6725_v62 = vld [vmem:[#allocation22_spill] sm:$0xff] }
 0x3b0   :  { %v3302_v34 = vsel %vm3290_vm1, %v3237_v40, 0.0  ;;  %v3062_v30 = vpop.permute.xlu0 %3061 }
 0x3b1   :  { %3366 = vst [vmem:[#allocation5 + $0x58] sm:$0xff] %v3302_v34  ;;  %v3240_v27 = vsel %vm3225_vm0, %v3062_v30, %v6711_v38  ;;  %v6726_v30 = vld [vmem:[#allocation23_spill] sm:$0xff] }
 0x3b2   :  { %v3305_v24 = vsel %vm3290_vm1, %v3240_v27, 0.0  ;;  %v3060_v13 = vpop.permute.xlu1 %3059 }
 0x3b3   :  { %3369 = vst [vmem:[#allocation5 + $0x70] sm:$0xff] %v3305_v24  ;;  %v3239_v1 = vsel %vm3225_vm0, %v3060_v13, %v6712_v61  ;;  %v6727_v13 = vld [vmem:[#allocation24_spill] sm:$0xff] }
 0x3b4   :  { %v3304_v19 = vsel %vm3290_vm1, %v3239_v1, 0.0  ;;  %v3066_v0 = vpop.permute.xlu0 %3065 }
 0x3b5   :  { %3368 = vst [vmem:[#allocation5 + $0x68] sm:$0xff] %v3304_v19  ;;  %v3242_v42 = vsel %vm3225_vm0, %v3066_v0, %v6713_v22  ;;  %v6728_v0 = vld [vmem:[#allocation25_spill] sm:$0xff] }
 0x3b6   :  { %v3307_v20 = vsel %vm3290_vm1, %v3242_v42, 0.0  ;;  %v3064_v57 = vpop.permute.xlu1 %3063 }
 0x3b7   :  { %3371 = vst [vmem:[#allocation5 + $0x80] sm:$0xff] %v3307_v20  ;;  %v3241_v32 = vsel %vm3225_vm0, %v3064_v57, %v6714_v55  ;;  %v6729_v57 = vld [vmem:[#allocation26_spill] sm:$0xff] }
 0x3b8   :  { %v3306_v16 = vsel %vm3290_vm1, %v3241_v32, 0.0  ;;  %v3070_v12 = vpop.permute.xlu0 %3069 }
 0x3b9   :  { %3370 = vst [vmem:[#allocation5 + $0x78] sm:$0xff] %v3306_v16  ;;  %v3244_v10 = vsel %vm3225_vm0, %v3070_v12, %v6715_v39  ;;  %v6730_v12 = vld [vmem:[#allocation27_spill] sm:$0xff] }
 0x3ba   :  { %v3309_v36 = vsel %vm3290_vm1, %v3244_v10, 0.0  ;;  %v3068_v31 = vpop.permute.xlu1 %3067 }
 0x3bb   :  { %3373 = vst [vmem:[#allocation5 + $0x90] sm:$0xff] %v3309_v36  ;;  %v3243_v49 = vsel %vm3225_vm0, %v3068_v31, %v6716_v35  ;;  %v6731_v31 = vld [vmem:[#allocation55_spill] sm:$0xff] }
 0x3bc   :  { %v3308_v17 = vsel %vm3290_vm1, %v3243_v49, 0.0  ;;  %v3074_v11 = vpop.permute.xlu0 %3073 }
 0x3bd   :  { %3372 = vst [vmem:[#allocation5 + $0x88] sm:$0xff] %v3308_v17  ;;  %v3246_v15 = vsel %vm3225_vm0, %v3074_v11, %v6717_v23  ;;  %v6732_v11 = vld [vmem:[#allocation29_spill] sm:$0xff] }
 0x3be   :  { %v3311_v8 = vsel %vm3290_vm1, %v3246_v15, 0.0  ;;  %v3072_v21 = vpop.permute.xlu1 %3071 }
 0x3bf   :  { %3375 = vst [vmem:[#allocation5 + $0xa0] sm:$0xff] %v3311_v8  ;;  %v3245_v50 = vsel %vm3225_vm0, %v3072_v21, %v6718_v44  ;;  %v6733_v21 = vld [vmem:[#allocation31_spill] sm:$0xff] }
 0x3c0   :  { %v3310_v63 = vsel %vm3290_vm1, %v3245_v50, 0.0  ;;  %v3078_v41 = vpop.permute.xlu0 %3077 }
 0x3c1   :  { %3374 = vst [vmem:[#allocation5 + $0x98] sm:$0xff] %v3310_v63  ;;  %v3248_v45 = vsel %vm3225_vm0, %v3078_v41, %v6719_v54  ;;  %v6734_v41 = vld [vmem:[#allocation28_spill] sm:$0xff] }
 0x3c2   :  { %v3313_v25 = vsel %vm3290_vm1, %v3248_v45, 0.0  ;;  %v3076_v28 = vpop.permute.xlu1 %3075 }
 0x3c3   :  { %3377 = vst [vmem:[#allocation5 + $0xb0] sm:$0xff] %v3313_v25  ;;  %v3247_v29 = vsel %vm3225_vm0, %v3076_v28, %v6720_v46  ;;  %v6735_v28 = vld [vmem:[#allocation33_spill] sm:$0xff] }
 0x3c4   :  { %v3312_v5 = vsel %vm3290_vm1, %v3247_v29, 0.0  ;;  %v3082_v43 = vpop.permute.xlu0 %3081 }
 0x3c5   :  { %3376 = vst [vmem:[#allocation5 + $0xa8] sm:$0xff] %v3312_v5  ;;  %v3250_v53 = vsel %vm3225_vm0, %v3082_v43, %v6721_v14  ;;  %v6736_v43 = vld [vmem:[#allocation30_spill] sm:$0xff] }
 0x3c6   :  { %v3315_v2 = vsel %vm3290_vm1, %v3250_v53, 0.0  ;;  %v3080_v47 = vpop.permute.xlu1 %3079 }
 0x3c7   :  { %3379 = vst [vmem:[#allocation5 + $0xc0] sm:$0xff] %v3315_v2  ;;  %v3249_v48 = vsel %vm3225_vm0, %v3080_v47, %v6722_v37  ;;  %v6737_v47 = vld [vmem:[#allocation35_spill] sm:$0xff] }
 0x3c8   :  { %v3314_v56 = vsel %vm3290_vm1, %v3249_v48, 0.0  ;;  %v3086_v52 = vpop.permute.xlu0 %3085 }
 0x3c9   :  { %3378 = vst [vmem:[#allocation5 + $0xb8] sm:$0xff] %v3314_v56  ;;  %v3252_v58 = vsel %vm3225_vm0, %v3086_v52, %v6723_v18  ;;  %v6738_v52 = vld [vmem:[#allocation32_spill] sm:$0xff] }
 0x3ca   :  { %v3317_v9 = vsel %vm3290_vm1, %v3252_v58, 0.0  ;;  %v3084_v33 = vpop.permute.xlu1 %3083 }
 0x3cb   :  { %3381 = vst [vmem:[#allocation5 + $0xd0] sm:$0xff] %v3317_v9  ;;  %v3251_v7 = vsel %vm3225_vm0, %v3084_v33, %v6724_v4  ;;  %v6739_v33 = vld [vmem:[#allocation34_spill] sm:$0xff] }
 0x3cc   :  { %v3316_v6 = vsel %vm3290_vm1, %v3251_v7, 0.0  ;;  %v3090_v26 = vpop.permute.xlu0 %3089 }
 0x3cd   :  { %3380 = vst [vmem:[#allocation5 + $0xc8] sm:$0xff] %v3316_v6  ;;  %v3254_v51 = vsel %vm3225_vm0, %v3090_v26, %v6725_v62  ;;  %v6740_v26 = vld [vmem:[#allocation65_spill] sm:$0xff] }
 0x3ce   :  { %v3319_v40 = vsel %vm3290_vm1, %v3254_v51, 0.0  ;;  %v3088_v34 = vpop.permute.xlu1 %3087 }
 0x3cf   :  { %3383 = vst [vmem:[#allocation5 + $0xe0] sm:$0xff] %v3319_v40  ;;  %v3253_v38 = vsel %vm3225_vm0, %v3088_v34, %v6726_v30  ;;  %v6741_v34 = vld [vmem:[#allocation37_spill] sm:$0xff] }
 0x3d0   :  { %v3318_v27 = vsel %vm3290_vm1, %v3253_v38, 0.0  ;;  %v3094_v24 = vpop.permute.xlu0 %3093 }
 0x3d1   :  { %3382 = vst [vmem:[#allocation5 + $0xd8] sm:$0xff] %v3318_v27  ;;  %v3256_v61 = vsel %vm3225_vm0, %v3094_v24, %v6727_v13  ;;  %v6742_v24 = vld [vmem:[#allocation64_spill] sm:$0xff] }
 0x3d2   :  { %v3321_v1 = vsel %vm3290_vm1, %v3256_v61, 0.0  ;;  %v3092_v19 = vpop.permute.xlu1 %3091 }
 0x3d3   :  { %3385 = vst [vmem:[#allocation5 + $0xf0] sm:$0xff] %v3321_v1  ;;  %v3255_v22 = vsel %vm3225_vm0, %v3092_v19, %v6728_v0  ;;  %v6743_v19 = vld [vmem:[#allocation39_spill] sm:$0xff] }
 0x3d4   :  { %v3320_v42 = vsel %vm3290_vm1, %v3255_v22, 0.0  ;;  %v3098_v20 = vpop.permute.xlu0 %3097 }
 0x3d5   :  { %3384 = vst [vmem:[#allocation5 + $0xe8] sm:$0xff] %v3320_v42  ;;  %v3258_v55 = vsel %vm3225_vm0, %v3098_v20, %v6729_v57  ;;  %v6744_v20 = vld [vmem:[#allocation36_spill] sm:$0xff] }
 0x3d6   :  { %v3323_v32 = vsel %vm3290_vm1, %v3258_v55, 0.0  ;;  %v3096_v16 = vpop.permute.xlu1 %3095 }
 0x3d7   :  { %3387 = vst [vmem:[#allocation5 + $0x100] sm:$0xff] %v3323_v32  ;;  %v3257_v39 = vsel %vm3225_vm0, %v3096_v16, %v6730_v12  ;;  %v6745_v16 = vld [vmem:[#allocation44_spill] sm:$0xff] }
 0x3d8   :  { %v3322_v10 = vsel %vm3290_vm1, %v3257_v39, 0.0  ;;  %v3102_v36 = vpop.permute.xlu0 %3101 }
 0x3d9   :  { %3386 = vst [vmem:[#allocation5 + $0xf8] sm:$0xff] %v3322_v10  ;;  %v3260_v35 = vsel %vm3225_vm0, %v3102_v36, %v6731_v31  ;;  %v6746_v36 = vld [vmem:[#allocation38_spill] sm:$0xff] }
 0x3da   :  { %v3325_v49 = vsel %vm3290_vm1, %v3260_v35, 0.0  ;;  %v3100_v17 = vpop.permute.xlu1 %3099 }
 0x3db   :  { %3389 = vst [vmem:[#allocation5 + $0x110] sm:$0xff] %v3325_v49  ;;  %v3259_v23 = vsel %vm3225_vm0, %v3100_v17, %v6732_v11  ;;  %v6747_v17 = vld [vmem:[#allocation46_spill] sm:$0xff] }
 0x3dc   :  { %v3324_v15 = vsel %vm3290_vm1, %v3259_v23, 0.0  ;;  %v3106_v8 = vpop.permute.xlu0 %3105 }
 0x3dd   :  { %3388 = vst [vmem:[#allocation5 + $0x108] sm:$0xff] %v3324_v15  ;;  %v3262_v44 = vsel %vm3225_vm0, %v3106_v8, %v6733_v21  ;;  %v6748_v8 = vld [vmem:[#allocation42_spill] sm:$0xff] }
 0x3de   :  { %v3327_v50 = vsel %vm3290_vm1, %v3262_v44, 0.0  ;;  %v3104_v63 = vpop.permute.xlu1 %3103 }
 0x3df   :  { %3391 = vst [vmem:[#allocation5 + $0x120] sm:$0xff] %v3327_v50  ;;  %v3261_v54 = vsel %vm3225_vm0, %v3104_v63, %v6734_v41  ;;  %v6749_v63 = vld [vmem:[#allocation48_spill] sm:$0xff] }
 0x3e0   :  { %v3326_v45 = vsel %vm3290_vm1, %v3261_v54, 0.0  ;;  %v3110_v25 = vpop.permute.xlu0 %3109 }
 0x3e1   :  { %3390 = vst [vmem:[#allocation5 + $0x118] sm:$0xff] %v3326_v45  ;;  %v3264_v46 = vsel %vm3225_vm0, %v3110_v25, %v6735_v28  ;;  %v6750_v25 = vld [vmem:[#allocation45_spill] sm:$0xff] }
 0x3e2   :  { %v3329_v29 = vsel %vm3290_vm1, %v3264_v46, 0.0  ;;  %v3108_v5 = vpop.permute.xlu1 %3107 }
 0x3e3   :  { %3393 = vst [vmem:[#allocation5 + $0x130] sm:$0xff] %v3329_v29  ;;  %v3263_v14 = vsel %vm3225_vm0, %v3108_v5, %v6736_v43  ;;  %v6751_v5 = vld [vmem:[#allocation50_spill] sm:$0xff] }
 0x3e4   :  { %v3328_v53 = vsel %vm3290_vm1, %v3263_v14, 0.0  ;;  %v3130_v2 = vpop.permute.xlu0 %3129 }
 0x3e5   :  { %3392 = vst [vmem:[#allocation5 + $0x128] sm:$0xff] %v3328_v53  ;;  %v3274_v37 = vsel %vm3225_vm0, %v3130_v2, %v6737_v47  ;;  %v6752_v2 = vld [vmem:[#allocation47_spill] sm:$0xff] }
 0x3e6   :  { %v3339_v48 = vsel %vm3290_vm1, %v3274_v37, 0.0  ;;  %v3112_v56 = vpop.permute.xlu1 %3111 }
 0x3e7   :  { %3403 = vst [vmem:[#allocation5 + $0x180] sm:$0xff] %v3339_v48  ;;  %v3265_v18 = vsel %vm3225_vm0, %v3112_v56, %v6738_v52  ;;  %v6753_v56 = vld [vmem:[#allocation73_spill] sm:$0xff] }
 0x3e8   :  { %v3330_v58 = vsel %vm3290_vm1, %v3265_v18, 0.0  ;;  %v3114_v9 = vpop.permute.xlu0 %3113 }
 0x3e9   :  { %3394 = vst [vmem:[#allocation5 + $0x138] sm:$0xff] %v3330_v58  ;;  %v3266_v4 = vsel %vm3225_vm0, %v3114_v9, %v6739_v33  ;;  %v6754_v9 = vld [vmem:[#allocation49_spill] sm:$0xff] }
 0x3ea   :  { %v3331_v7 = vsel %vm3290_vm1, %v3266_v4, 0.0  ;;  %v3132_v6 = vpop.permute.xlu1 %3131 }
 0x3eb   :  { %3395 = vst [vmem:[#allocation5 + $0x140] sm:$0xff] %v3331_v7  ;;  %v3275_v62 = vsel %vm3225_vm0, %v3132_v6, %v6740_v26 }
 0x3ec   :  { %v3340_v51 = vsel %vm3290_vm1, %v3275_v62, 0.0  ;;  %v3134_v40 = vpop.permute.xlu0 %3133 }
 0x3ed   :  { %3404 = vst [vmem:[#allocation5 + $0x188] sm:$0xff] %v3340_v51  ;;  %v3276_v30 = vsel %vm3225_vm0, %v3134_v40, %v6741_v34 }
 0x3ee   :  { %v3341_v38 = vsel %vm3290_vm1, %v3276_v30, 0.0  ;;  %v3136_v27 = vpop.permute.xlu1 %3135  ;;  %v6755_v30 = vld [vmem:[#allocation72_spill] sm:$0xff] }
 0x3ef   :  { %3405 = vst [vmem:[#allocation5 + $0x190] sm:$0xff] %v3341_v38  ;;  %v3277_v13 = vsel %vm3225_vm0, %v3136_v27, %v6742_v24 }
 0x3f0   :  { %v3342_v61 = vsel %vm3290_vm1, %v3277_v13, 0.0  ;;  %v3138_v1 = vpop.permute.xlu0 %3137  ;;  %v6756_v13 = vld [vmem:[#allocation52_spill] sm:$0xff] }
 0x3f1   :  { %3406 = vst [vmem:[#allocation5 + $0x198] sm:$0xff] %v3342_v61  ;;  %v3278_v0 = vsel %vm3225_vm0, %v3138_v1, %v6743_v19  ;;  %v6757_v19 = vld [vmem:[#allocation74_spill] sm:$0xff] }
 0x3f2   :  { %v3343_v22 = vsel %vm3290_vm1, %v3278_v0, 0.0  ;;  %v3116_v42 = vpop.permute.xlu1 %3115 }
 0x3f3   :  { %3407 = vst [vmem:[#allocation5 + $0x1a0] sm:$0xff] %v3343_v22  ;;  %v3267_v57 = vsel %vm3225_vm0, %v3116_v42, %v6744_v20 }
 0x3f4   :  { %v3332_v55 = vsel %vm3290_vm1, %v3267_v57, 0.0  ;;  %v3118_v32 = vpop.permute.xlu0 %3117 }
 0x3f5   :  { %3396 = vst [vmem:[#allocation5 + $0x148] sm:$0xff] %v3332_v55  ;;  %v3268_v12 = vsel %vm3225_vm0, %v3118_v32, %v6745_v16  ;;  %v6758_v55 = vld [vmem:[#allocation75_spill] sm:$0xff] }
 0x3f6   :  { %v3333_v39 = vsel %vm3290_vm1, %v3268_v12, 0.0  ;;  %v3140_v10 = vpop.permute.xlu1 %3139 }
 0x3f7   :  { %3397 = vst [vmem:[#allocation5 + $0x150] sm:$0xff] %v3333_v39  ;;  %v3279_v31 = vsel %vm3225_vm0, %v3140_v10, %v6746_v36 }
 0x3f8   :  { %v3344_v35 = vsel %vm3290_vm1, %v3279_v31, 0.0  ;;  %v3142_v49 = vpop.permute.xlu0 %3141 }
 0x3f9   :  { %3408 = vst [vmem:[#allocation5 + $0x1a8] sm:$0xff] %v3344_v35  ;;  %v3280_v11 = vsel %vm3225_vm0, %v3142_v49, %v6747_v17 }
 0x3fa   :  { %v3345_v23 = vsel %vm3290_vm1, %v3280_v11, 0.0  ;;  %v3144_v15 = vpop.permute.xlu1 %3143 }
 0x3fb   :  { %3409 = vst [vmem:[#allocation5 + $0x1b0] sm:$0xff] %v3345_v23  ;;  %v3281_v21 = vsel %vm3225_vm0, %v3144_v15, %v6748_v8 }
 0x3fc   :  { %v3346_v44 = vsel %vm3290_vm1, %v3281_v21, 0.0  ;;  %v3146_v50 = vpop.permute.xlu0 %3145 }
 0x3fd   :  { %3410 = vst [vmem:[#allocation5 + $0x1b8] sm:$0xff] %v3346_v44  ;;  %v3282_v41 = vsel %vm3225_vm0, %v3146_v50, %v6749_v63 }
 0x3fe   :  { %v3347_v54 = vsel %vm3290_vm1, %v3282_v41, 0.0  ;;  %v3120_v45 = vpop.permute.xlu1 %3119 }
 0x3ff   :  { %3411 = vst [vmem:[#allocation5 + $0x1c0] sm:$0xff] %v3347_v54  ;;  %v3269_v28 = vsel %vm3225_vm0, %v3120_v45, %v6750_v25 }
 0x400   :  { %v3334_v46 = vsel %vm3290_vm1, %v3269_v28, 0.0  ;;  %v3122_v29 = vpop.permute.xlu0 %3121 }
 0x401   :  { %3398 = vst [vmem:[#allocation5 + $0x158] sm:$0xff] %v3334_v46  ;;  %v3270_v43 = vsel %vm3225_vm0, %v3122_v29, %v6751_v5 }
 0x402   :  { %v3335_v14 = vsel %vm3290_vm1, %v3270_v43, 0.0  ;;  %v3148_v53 = vpop.permute.xlu1 %3147 }
 0x403   :  { %3399 = vst [vmem:[#allocation5 + $0x160] sm:$0xff] %v3335_v14  ;;  %v3283_v47 = vsel %vm3225_vm0, %v3148_v53, %v6752_v2 }
 0x404   :  { %v3348_v37 = vsel %vm3290_vm1, %v3283_v47, 0.0  ;;  %v3150_v48 = vpop.permute.xlu0 %3149 }
 0x405   :  { %3412 = vst [vmem:[#allocation5 + $0x1c8] sm:$0xff] %v3348_v37  ;;  %v3284_v52 = vsel %vm3225_vm0, %v3150_v48, %v6753_v56 }
 0x406   :  { %v3349_v18 = vsel %vm3290_vm1, %v3284_v52, 0.0  ;;  %v3152_v58 = vpop.permute.xlu1 %3151 }
 0x407   :  { %3413 = vst [vmem:[#allocation5 + $0x1d0] sm:$0xff] %v3349_v18  ;;  %v3285_v33 = vsel %vm3225_vm0, %v3152_v58, %v6754_v9 }
 0x408   :  { %v3350_v4 = vsel %vm3290_vm1, %v3285_v33, 0.0  ;;  %v3154_v7 = vpop.permute.xlu0 %3153 }
 0x409   :  { %3414 = vst [vmem:[#allocation5 + $0x1d8] sm:$0xff] %v3350_v4  ;;  %v3286_v6 = vsel %vm3225_vm0, %v3154_v7, %v5916_v60 }
 0x40a   :  { %v3351_v26 = vsel %vm3290_vm1, %v3286_v6, 0.0  ;;  %v3124_v62 = vpop.permute.xlu1 %3123 }
 0x40b   :  { %3415 = vst [vmem:[#allocation5 + $0x1e0] sm:$0xff] %v3351_v26  ;;  %v3271_v51 = vsel %vm3225_vm0, %v3124_v62, %v5919_v59 }
 0x40c   :  { %v3336_v40 = vsel %vm3290_vm1, %v3271_v51, 0.0  ;;  %v3126_v34 = vpop.permute.xlu0 %3125 }
 0x40d   :  { %3400 = vst [vmem:[#allocation5 + $0x168] sm:$0xff] %v3336_v40  ;;  %v3272_v38 = vsel %vm3225_vm0, %v3126_v34, %v6755_v30 }
 0x40e   :  { %v3337_v27 = vsel %vm3290_vm1, %v3272_v38, 0.0  ;;  %v3156_v24 = vpop.permute.xlu1 %3155 }
 0x40f   :  { %3401 = vst [vmem:[#allocation5 + $0x170] sm:$0xff] %v3337_v27  ;;  %v3287_v60 = vsel %vm3225_vm0, %v3156_v24, %v6756_v13 }
 0x410   :  { %v3352_v61 = vsel %vm3290_vm1, %v3287_v60, 0.0  ;;  %v3158_v1 = vpop.permute.xlu0 %3157 }
 0x411   :  { %3416 = vst [vmem:[#allocation5 + $0x1e8] sm:$0xff] %v3352_v61  ;;  %v3288_v59 = vsel %vm3225_vm0, %v3158_v1, %v6757_v19 }
 0x412   :  { %v3353_v0 = vsel %vm3290_vm1, %v3288_v59, 0.0 }
 0x413   :  { %3417 = vst [vmem:[#allocation5 + $0x1f0] sm:$0xff] %v3353_v0 }
 0x417   :  { %v3128_v22 = vpop.permute.xlu1 %3127 }
 0x418   :  { %v3273_v42 = vsel %vm3225_vm0, %v3128_v22, %v5957_v3 }
 0x419   :  { %v3338_v20 = vsel %vm3290_vm1, %v3273_v42, 0.0 }
 0x41a   :  { %3402 = vst [vmem:[#allocation5 + $0x178] sm:$0xff] %v3338_v20 }
 0x41b   :  { %v3160_v57 = vpop.permute.xlu1 %3159 }
 0x41c   :  { %v3289_v32 = vsel %vm3225_vm0, %v3160_v57, %v6758_v55 }
 0x41d   :  { %v3354_v16 = vsel %vm3290_vm1, %v3289_v32, 0.0 }
 0x41e   :  { %3418 = vst [vmem:[#allocation5 + $0x1f8] sm:$0xff] %v3354_v16 }
 0x41f   :  { %4312 = shalt.err (!%p4309_p12)
}
 0x420   :  { %s4313_s2 = scalar_lea.hbm %s6294_s4, 8192 }
 0x421   :  { %p4314_p13 = scmp.ne.s32.totalorder %s6294_s4, %s4313_s2  ;;  %p4317_p0 = scmp.lt.u32.totalorder %s4313_s2, %s6294_s4 }
 0x423   :  { %p4319_p1 = pnand %p4317_p0, %p4314_p13 }
 0x425   :  { %4322 = shalt.err (!%p4319_p1)
}
 0x426   :  { %s4334_s22 = smov 128   ;;  %s4335_s23 = smov 8  }
 0x427   :  { %3430 = dma.vmem_to_hbm [thread:$0]  %s3425_s13, 8192, %s6294_s4, [#allocation4], %s4334_s22, %s4334_s22, %s4335_s23  }
 0x428   :  { %4325 = dma.done.wait [#allocation4], 8192  }
 0x429   :  { %4326 = vsyncadd [#allocation4], 4294959104 }
 0x42a   :  { %3434 = vsyncpa [#allocation3], 1 }
 0x42b   :  { %3435 = vsyncpa [#allocation4], 1 }

</bundles_post_ra>
